<compile_context>
chip_gen: v6e
topology: v6e:2x2x1
jax: 0.10.0
libtpu: 0.0.40
codegen_flags: <defaults>
</compile_context>

<pallas_src>
import numpy as np
import jax
import jax.numpy as jnp
from jax.experimental import pallas as pl
from jax.experimental.pallas import tpu as pltpu

LN_EPS = 1e-5


# ----------------------------------------------------------------------------
# In-kernel building blocks
# ----------------------------------------------------------------------------
def _lstm_cell(gates, c, H):
    """PyTorch gate order i, f, g, o.  One sigmoid + one tanh over the full
    (B, 4H) gate tile (2 EUP passes instead of 4 on narrow slices)."""
    sig = jax.nn.sigmoid(gates)
    th = jnp.tanh(gates)
    i_g = sig[:, 0:H]
    f_g = sig[:, H:2 * H]
    o_g = sig[:, 3 * H:4 * H]
    g_g = th[:, 2 * H:3 * H]
    c_new = f_g * c + i_g * g_g
    h_new = o_g * jnp.tanh(c_new)
    return h_new, c_new


def _apply_mlp_refs(x, kinds, refs, idx):
    """Row-wise MLP stack: linear(+ReLU) / ResMLP(LayerNorm+Linear+ReLU+Linear)."""
    for kind in kinds:
        if kind in ("linear_relu", "linear"):
            w = refs[idx][...]
            b = refs[idx + 1][...]
            idx += 2
            x = jnp.dot(x, w, preferred_element_type=jnp.float32) + b
            if kind == "linear_relu":
                x = jnp.maximum(x, 0.0)
        else:  # "resmlp"
            g = refs[idx][...]
            be = refs[idx + 1][...]
            w1 = refs[idx + 2][...]
            b1 = refs[idx + 3][...]
            w2 = refs[idx + 4][...]
            b2 = refs[idx + 5][...]
            idx += 6
            mu = jnp.mean(x, axis=-1, keepdims=True)
            var = jnp.mean((x - mu) ** 2, axis=-1, keepdims=True)  # biased (PyTorch LN)
            xn = (x - mu) * jax.lax.rsqrt(var + LN_EPS)
            xn = xn * g + be
            hdn = jnp.maximum(
                jnp.dot(xn, w1, preferred_element_type=jnp.float32) + b1, 0.0)
            x = x + jnp.dot(hdn, w2, preferred_element_type=jnp.float32) + b2
    return x, idx


def make_fused_forward_kernel(S, B, H, num_layers, mlp_kinds, n_tem_layers,
                              ford_rest_kinds, n_in):
    """One kernel = whole forward.

    refs layout (all 2-D, all resident in VMEM):
      [hist2d (S*B,F),
       wih0T (F,4H), whh0T (H,4H), b0 (1,4H),
       (wcat_l (2H,4H), b_l (1,4H)) * (num_layers-1),
       mlp params ...,
       (wblk_k, bcol_k) * n_tem_layers        # block-packed mlpTem (contracts over rows)
       wford_top (Dm,h1), ic_proj (B,h1),      # split first mlpford linear
       remaining mlpford params ...,
       out (B,Dout),                           # output ref
       hseq (S*B,H)]                           # VMEM scratch
    """
    def kernel(*refs):
        out_ref = refs[n_in]
        hseq_ref = refs[n_in + 1]

        idx = 0
        x_ref = refs[idx]; idx += 1
        wih0 = refs[idx][...]
        whh0 = refs[idx + 1][...]
        b0 = refs[idx + 2][...]
        idx += 3
        wcats, bcs = [], []
        for _ in range(num_layers - 1):
            wcats.append(refs[idx][...])
            # hoist bias broadcasts out of the time loop (JAX does not CSE broadcast_in_dim)
            bcs.append(jnp.broadcast_to(refs[idx + 1][...], (B, 4 * H)))
            idx += 2

        # ---------------- LSTM ----------------
        # layer-0 input projection hoisted: one (S*B, F) @ (F, 4H) MXU matmul
        gx = jnp.dot(x_ref[...], wih0, preferred_element_type=jnp.float32) + b0

        zero = jnp.zeros((B, H), jnp.float32)
        h = [zero] * num_layers
        c = [zero] * num_layers
        for t in range(S):                       # unrolled; h/c stay in vregs
            g0 = gx[t * B:(t + 1) * B, :] + jnp.dot(
                h[0], whh0, preferred_element_type=jnp.float32)
            h[0], c[0] = _lstm_cell(g0, c[0], H)
            for l in range(1, num_layers):
                xh = jnp.concatenate([h[l - 1], h[l]], axis=-1)        # (B, 2H)
                gl = jnp.dot(xh, wcats[l - 1],
                             preferred_element_type=jnp.float32) + bcs[l - 1]
                h[l], c[l] = _lstm_cell(gl, c[l], H)
            hseq_ref[pl.ds(t * B, B), :] = h[-1]

        hm = hseq_ref[...]                       # (S*B, H) time-major, rows = s*B + b

        # ---------------- mlp (row-wise) ----------------
        hm, idx = _apply_mlp_refs(hm, mlp_kinds, refs, idx)            # (S*B, Dm)

        # ---------------- mlpTem (acts along the time axis) ----------------
        # torch: transpose(0,-1) -> Linear/ReLU/Linear on last dim -> transpose back.
        # Here: block-diagonal packed weights contract over the time-major ROW axis,
        # so no transposes are needed.  z ends up as (B, Dm) == h_hist[0, b, d].
        z = hm
        for k in range(n_tem_layers):
            wblk = refs[idx][...]
            bcol = refs[idx + 1][...]
            idx += 2
            z = jnp.dot(wblk, z, preferred_element_type=jnp.float32) + bcol
            if k < n_tem_layers - 1:
                z = jnp.maximum(z, 0.0)

        # ---------------- mlpford ----------------
        # first Linear split: h_hist part in-kernel, (init|constant) part pre-folded
        wford_top = refs[idx][...]
        ic_proj = refs[idx + 1][...]
        idx += 2
        y = jnp.maximum(
            jnp.dot(z, wford_top, preferred_element_type=jnp.float32) + ic_proj, 0.0)
        y, idx = _apply_mlp_refs(y, ford_rest_kinds, refs, idx)
        out_ref[...] = y
    return kernel


# ----------------------------------------------------------------------------
# pallas_call wrapper: packs weights and launches the single fused kernel
# ----------------------------------------------------------------------------
def fused_forward_pallas(params, inp, constant):
    Tall, B, F = inp.shape
    S = Tall - 1
    H = params["lstm"][0][1].shape[0]
    num_layers = len(params["lstm"])

    hist2d = inp[:-1].reshape(S * B, F)          # (S*B, F) time-major rows
    init2d = inp[-1]                             # (B, F)

    args = [hist2d]
    wih0T, whh0T, b0 = params["lstm"][0]
    args += [wih0T, whh0T, b0]
    for (wihT, whhT, b) in params["lstm"][1:]:
        args.append(jnp.concatenate([wihT, whhT], axis=0))   # fused [W_ih^T ; W_hh^T]
        args.append(b)

    mlp_kinds = [l[0] for l in params["mlp"]]
    args += [a for layer in params["mlp"] for a in layer[1:]]

    # mlpTem packing: per-(feature, batch) MLP along time -> block-diagonal weights
    # contracting over the time-major row axis of the (S*B, Dm) activations.
    # TODO(synk): fused path supports Linear/ReLU chains only (true for mlpTemFeatures of
    #             length 3); ResMLP blocks along the time axis would need per-batch LayerNorm.
    tem = params["mlpTem"]
    assert all(l[0] in ("linear", "linear_relu") for l in tem)
    eyeB = jnp.eye(B, dtype=jnp.float32)
    n_tem = len(tem)
    for k, layer in enumerate(tem):
        w = layer[1]                              # (f_in, f_out) pre-transposed
        bvec = layer[2].reshape(-1)               # (f_out,)
        fin, fout = w.shape
        if k == 0:
            # rows: b*fout + j ; cols: s*B + b   (time-major input rows)
            wblk = jnp.einsum("sj,bc->bjsc", w, eyeB).reshape(B * fout, fin * B)
        else:
            # rows: b*fout + j ; cols: b*fin + i
            wblk = jnp.einsum("ij,bc->bjci", w, eyeB).reshape(B * fout, B * fin)
        bcol = jnp.tile(bvec, (B,)).reshape(B * fout, 1)
        args += [wblk, bcol]

    # mlpford: split the first Linear, pre-fold the (init | constant) projection
    ford = params["mlpford"]
    kind0, w0, b0f = ford[0]
    assert kind0 == "linear_relu"
    Dm = params["mlp"][-1][1].shape[1]
    ic = jnp.concatenate([init2d, constant], axis=-1)         # (B, F + C)
    ic_proj = jnp.dot(ic, w0[Dm:, :]) + b0f                   # (B, h1)
    args += [w0[:Dm, :], ic_proj]
    ford_rest_kinds = [l[0] for l in ford[1:]]
    args += [a for layer in ford[1:] for a in layer[1:]]

    Dout = ford[-1][1].shape[1]
    n_in = len(args)
    kernel = make_fused_forward_kernel(S, B, H, num_layers, mlp_kinds, n_tem,
                                       ford_rest_kinds, n_in)
    in_specs = [pl.BlockSpec(a.shape, lambda i: (0, 0)) for a in args]   # all 2-D

    out = pl.pallas_call(
        kernel,
        out_shape=jax.ShapeDtypeStruct((B, Dout), jnp.float32),
        grid=(1,),
        in_specs=in_specs,
        out_specs=pl.BlockSpec((B, Dout), lambda i: (0, 0)),
        scratch_shapes=[pltpu.VMEM((S * B, H), jnp.float32)],
        compiler_params=pltpu.CompilerParams(dimension_semantics=("arbitrary",)),
    )(*args)
    return out.reshape(1, B, Dout)


# ----------------------------------------------------------------------------
# Pure-JAX reference (correctness check only) — mirrors the PyTorch module
# ----------------------------------------------------------------------------
def _dot(a, b):
    return jnp.dot(a, b, precision=jax.lax.Precision.HIGHEST)


def apply_mlp_ref(layers, x):
    for layer in layers:
        if layer[0] in ("linear_relu", "linear"):
            y = _dot(x, layer[1]) + layer[2]
            x = jnp.maximum(y, 0.0) if layer[0] == "linear_relu" else y
        else:
            _, g, be, w1T, b1, w2T, b2 = layer
            mu = jnp.mean(x, axis=-1, keepdims=True)
            var = jnp.mean((x - mu) ** 2, axis=-1, keepdims=True)
            xn = (x - mu) / jnp.sqrt(var + LN_EPS) * g + be
            hdn = jnp.maximum(_dot(xn, w1T) + b1, 0.0)
            x = x + _dot(hdn, w2T) + b2
    return x


def lstm_ref(x2d, lstm_layers, T, B):
    Din = x2d.shape[1]
    H = lstm_layers[0][1].shape[0]
    x = x2d.reshape(T, B, Din)
    for (wihT, whhT, b) in lstm_layers:
        h = jnp.zeros((B, H), jnp.float32)
        c = jnp.zeros((B, H), jnp.float32)
        outs = []
        for t in range(T):
            gates = _dot(x[t], wihT) + _dot(h, whhT) + b
            i_g = jax.nn.sigmoid(gates[:, :H])
            f_g = jax.nn.sigmoid(gates[:, H:2 * H])
            g_g = jnp.tanh(gates[:, 2 * H:3 * H])
            o_g = jax.nn.sigmoid(gates[:, 3 * H:])
            c = f_g * c + i_g * g_g
            h = o_g * jnp.tanh(c)
            outs.append(h)
        x = jnp.stack(outs, axis=0)
    return x.reshape(T * B, H)


def forward_ref(params, inp, constant):
    Tall, B, F = inp.shape
    S = Tall - 1
    hist2d = inp[:-1].reshape(S * B, F)
    init = inp[-1:]
    h2d = lstm_ref(hist2d, params["lstm"], S, B)
    h2d = apply_mlp_ref(params["mlp"], h2d)
    Dm = h2d.shape[-1]
    h = jnp.swapaxes(h2d.reshape(S, B, Dm), 0, -1)        # torch .transpose(0, -1)
    h2d = apply_mlp_ref(params["mlpTem"], h.reshape(Dm * B, S))
    h = jnp.swapaxes(h2d.reshape(Dm, B, -1), 0, -1)       # (1, B, Dm)
    xcat = jnp.concatenate([h, init], axis=-1)
    const_exp = jnp.broadcast_to(constant[None], (xcat.shape[0],) + constant.shape)
    xcat = jnp.concatenate([xcat, const_exp], axis=-1)
    R, Bb, Dcat = xcat.shape
    return apply_mlp_ref(params["mlpford"], xcat.reshape(R * Bb, Dcat)).reshape(R, Bb, -1)


# ----------------------------------------------------------------------------
# Deterministic parameter construction (synthetic; weights stored pre-transposed)
# ----------------------------------------------------------------------------
def _w(key, shape, scale=0.1):
    return (scale * jax.random.normal(key, shape)).astype(jnp.float32)


def make_mlp_params(key, feats):
    layers = []
    keys = iter(jax.random.split(key, 8 * len(feats) + 8))
    layers.append(("linear_relu", _w(next(keys), (feats[0], feats[1])),
                   _w(next(keys), (1, feats[1]))))
    for i in range(1, len(feats) - 2):                    # ResMLP(feats[i], feats[i+1])
        d, hd = feats[i], feats[i + 1]
        layers.append(("resmlp",
                       1.0 + _w(next(keys), (1, d)),      # LayerNorm gamma
                       _w(next(keys), (1, d)),            # LayerNorm beta
                       _w(next(keys), (d, hd)), _w(next(keys), (1, hd)),
                       _w(next(keys), (hd, d)), _w(next(keys), (1, d))))
    layers.append(("linear", _w(next(keys), (feats[-2], feats[-1])),
                   _w(next(keys), (1, feats[-1]))))
    return layers


def make_params(key, lstmFeatures, mlpFeatures, mlpTemFeatures, mlpfordFeatures):
    k_lstm, k_mlp, k_tem, k_ford = jax.random.split(key, 4)
    in_dim, H, n_layers = lstmFeatures
    lstm_layers = []
    lkeys = iter(jax.random.split(k_lstm, 4 * n_layers))
    for l in range(n_layers):
        din = in_dim if l == 0 else H
        wihT = _w(next(lkeys), (din, 4 * H))                            # W_ih^T
        whhT = _w(next(lkeys), (H, 4 * H))                              # W_hh^T
        b = _w(next(lkeys), (1, 4 * H)) + _w(next(lkeys), (1, 4 * H))   # b_ih + b_hh
        lstm_layers.append((wihT, whhT, b))
    return {"lstm": lstm_layers,
            "mlp": make_mlp_params(k_mlp, mlpFeatures),
            "mlpTem": make_mlp_params(k_tem, mlpTemFeatures),
            "mlpford": make_mlp_params(k_ford, mlpfordFeatures)}


# ----------------------------------------------------------------------------
if __name__ == "__main__":
    key = jax.random.PRNGKey(0)
    T, B = 9, 2                                  # seq len 9 -> hist has 8 steps
    C_const = 4
    lstmFeatures = [8, 32, 2]                    # in=8, hidden=32, 2 LSTM layers
    mlpFeatures = [32, 32, 32, 32]               # Linear, ReLU, ResMLP, Linear
    mlpTemFeatures = [T - 1, 16, 1]              # acts along the time axis
    mlpfordFeatures = [mlpFeatures[-1] + lstmFeatures[0] + C_const, 64, 64, 16]

    k_inp, k_const, k_par = jax.random.split(key, 3)
    inp = jax.random.normal(k_inp, (T, B, lstmFeatures[0]), dtype=jnp.float32)
    constant = jax.random.normal(k_const, (B, C_const), dtype=jnp.float32)
    params = make_params(k_par, lstmFeatures, mlpFeatures, mlpTemFeatures, mlpfordFeatures)

    # jit the whole forward; params captured in closure (layer-kind tags are Python strs).
    fwd = jax.jit(lambda x, c: fused_forward_pallas(params, x, c))
    u = jax.block_until_ready(fwd(inp, constant))

    u_ref = forward_ref(params, inp, constant)
    assert u.shape == (1, B, mlpfordFeatures[-1])
    np.testing.assert_allclose(np.asarray(u), np.asarray(u_ref), rtol=2e-2, atol=2e-2)

    print("KERNEL_OK")
</pallas_src>

<mosaic_0001>
module attributes {stable_mosaic.version = 11 : i64} {
  func.func @kernel(%arg0: i32, %arg1: memref<16x8xf32, #tpu.memory_space<vmem>>, %arg2: memref<8x128xf32, #tpu.memory_space<vmem>>, %arg3: memref<32x128xf32, #tpu.memory_space<vmem>>, %arg4: memref<1x128xf32, #tpu.memory_space<vmem>>, %arg5: memref<64x128xf32, #tpu.memory_space<vmem>>, %arg6: memref<1x128xf32, #tpu.memory_space<vmem>>, %arg7: memref<32x32xf32, #tpu.memory_space<vmem>>, %arg8: memref<1x32xf32, #tpu.memory_space<vmem>>, %arg9: memref<1x32xf32, #tpu.memory_space<vmem>>, %arg10: memref<1x32xf32, #tpu.memory_space<vmem>>, %arg11: memref<32x32xf32, #tpu.memory_space<vmem>>, %arg12: memref<1x32xf32, #tpu.memory_space<vmem>>, %arg13: memref<32x32xf32, #tpu.memory_space<vmem>>, %arg14: memref<1x32xf32, #tpu.memory_space<vmem>>, %arg15: memref<32x32xf32, #tpu.memory_space<vmem>>, %arg16: memref<1x32xf32, #tpu.memory_space<vmem>>, %arg17: memref<32x16xf32, #tpu.memory_space<vmem>>, %arg18: memref<32x1xf32, #tpu.memory_space<vmem>>, %arg19: memref<2x32xf32, #tpu.memory_space<vmem>>, %arg20: memref<2x1xf32, #tpu.memory_space<vmem>>, %arg21: memref<32x64xf32, #tpu.memory_space<vmem>>, %arg22: memref<2x64xf32, #tpu.memory_space<vmem>>, %arg23: memref<1x64xf32, #tpu.memory_space<vmem>>, %arg24: memref<1x64xf32, #tpu.memory_space<vmem>>, %arg25: memref<64x64xf32, #tpu.memory_space<vmem>>, %arg26: memref<1x64xf32, #tpu.memory_space<vmem>>, %arg27: memref<64x64xf32, #tpu.memory_space<vmem>>, %arg28: memref<1x64xf32, #tpu.memory_space<vmem>>, %arg29: memref<64x16xf32, #tpu.memory_space<vmem>>, %arg30: memref<1x16xf32, #tpu.memory_space<vmem>>, %arg31: memref<2x16xf32, #tpu.memory_space<vmem>>, %arg32: memref<16x32xf32, #tpu.memory_space<vmem>>) attributes {dimension_semantics = [#tpu.dimension_semantics<arbitrary>], iteration_bounds = array<i64: 1>, scalar_prefetch = 0 : i64, scratch_operands = 1 : i64, tpu.core_type = #tpu.core_type<tc>, window_params = [{pipeline_mode = #tpu.pipeline_mode<synchronous>, transform_indices = @transform_0, window_bounds = array<i64: 16, 8>}, {pipeline_mode = #tpu.pipeline_mode<synchronous>, transform_indices = @transform_1, window_bounds = array<i64: 8, 128>}, {pipeline_mode = #tpu.pipeline_mode<synchronous>, transform_indices = @transform_2, window_bounds = array<i64: 32, 128>}, {pipeline_mode = #tpu.pipeline_mode<synchronous>, transform_indices = @transform_3, window_bounds = array<i64: 1, 128>}, {pipeline_mode = #tpu.pipeline_mode<synchronous>, transform_indices = @transform_4, window_bounds = array<i64: 64, 128>}, {pipeline_mode = #tpu.pipeline_mode<synchronous>, transform_indices = @transform_5, window_bounds = array<i64: 1, 128>}, {pipeline_mode = #tpu.pipeline_mode<synchronous>, transform_indices = @transform_6, window_bounds = array<i64: 32, 32>}, {pipeline_mode = #tpu.pipeline_mode<synchronous>, transform_indices = @transform_7, window_bounds = array<i64: 1, 32>}, {pipeline_mode = #tpu.pipeline_mode<synchronous>, transform_indices = @transform_8, window_bounds = array<i64: 1, 32>}, {pipeline_mode = #tpu.pipeline_mode<synchronous>, transform_indices = @transform_9, window_bounds = array<i64: 1, 32>}, {pipeline_mode = #tpu.pipeline_mode<synchronous>, transform_indices = @transform_10, window_bounds = array<i64: 32, 32>}, {pipeline_mode = #tpu.pipeline_mode<synchronous>, transform_indices = @transform_11, window_bounds = array<i64: 1, 32>}, {pipeline_mode = #tpu.pipeline_mode<synchronous>, transform_indices = @transform_12, window_bounds = array<i64: 32, 32>}, {pipeline_mode = #tpu.pipeline_mode<synchronous>, transform_indices = @transform_13, window_bounds = array<i64: 1, 32>}, {pipeline_mode = #tpu.pipeline_mode<synchronous>, transform_indices = @transform_14, window_bounds = array<i64: 32, 32>}, {pipeline_mode = #tpu.pipeline_mode<synchronous>, transform_indices = @transform_15, window_bounds = array<i64: 1, 32>}, {pipeline_mode = #tpu.pipeline_mode<synchronous>, transform_indices = @transform_16, window_bounds = array<i64: 32, 16>}, {pipeline_mode = #tpu.pipeline_mode<synchronous>, transform_indices = @transform_17, window_bounds = array<i64: 32, 1>}, {pipeline_mode = #tpu.pipeline_mode<synchronous>, transform_indices = @transform_18, window_bounds = array<i64: 2, 32>}, {pipeline_mode = #tpu.pipeline_mode<synchronous>, transform_indices = @transform_19, window_bounds = array<i64: 2, 1>}, {pipeline_mode = #tpu.pipeline_mode<synchronous>, transform_indices = @transform_20, window_bounds = array<i64: 32, 64>}, {pipeline_mode = #tpu.pipeline_mode<synchronous>, transform_indices = @transform_21, window_bounds = array<i64: 2, 64>}, {pipeline_mode = #tpu.pipeline_mode<synchronous>, transform_indices = @transform_22, window_bounds = array<i64: 1, 64>}, {pipeline_mode = #tpu.pipeline_mode<synchronous>, transform_indices = @transform_23, window_bounds = array<i64: 1, 64>}, {pipeline_mode = #tpu.pipeline_mode<synchronous>, transform_indices = @transform_24, window_bounds = array<i64: 64, 64>}, {pipeline_mode = #tpu.pipeline_mode<synchronous>, transform_indices = @transform_25, window_bounds = array<i64: 1, 64>}, {pipeline_mode = #tpu.pipeline_mode<synchronous>, transform_indices = @transform_26, window_bounds = array<i64: 64, 64>}, {pipeline_mode = #tpu.pipeline_mode<synchronous>, transform_indices = @transform_27, window_bounds = array<i64: 1, 64>}, {pipeline_mode = #tpu.pipeline_mode<synchronous>, transform_indices = @transform_28, window_bounds = array<i64: 64, 16>}, {pipeline_mode = #tpu.pipeline_mode<synchronous>, transform_indices = @transform_29, window_bounds = array<i64: 1, 16>}, {pipeline_mode = #tpu.pipeline_mode<synchronous>, transform_indices = @transform_30, window_bounds = array<i64: 2, 16>}]} {
    %c0 = arith.constant 0 : index
    %c0_0 = arith.constant 0 : index
    %0 = vector.load %arg2[%c0, %c0_0] : memref<8x128xf32, #tpu.memory_space<vmem>>, vector<8x128xf32>
    %c0_1 = arith.constant 0 : index
    %c0_2 = arith.constant 0 : index
    %1 = vector.load %arg3[%c0_1, %c0_2] : memref<32x128xf32, #tpu.memory_space<vmem>>, vector<32x128xf32>
    %c0_3 = arith.constant 0 : index
    %c0_4 = arith.constant 0 : index
    %2 = vector.load %arg4[%c0_3, %c0_4] : memref<1x128xf32, #tpu.memory_space<vmem>>, vector<1x128xf32>
    %c0_5 = arith.constant 0 : index
    %c0_6 = arith.constant 0 : index
    %3 = vector.load %arg5[%c0_5, %c0_6] : memref<64x128xf32, #tpu.memory_space<vmem>>, vector<64x128xf32>
    %c0_7 = arith.constant 0 : index
    %c0_8 = arith.constant 0 : index
    %4 = vector.load %arg6[%c0_7, %c0_8] : memref<1x128xf32, #tpu.memory_space<vmem>>, vector<1x128xf32>
    %5 = vector.shape_cast %4 : vector<1x128xf32> to vector<1x128xf32>
    %6 = vector.broadcast %5 : vector<1x128xf32> to vector<2x128xf32>
    %c0_9 = arith.constant 0 : index
    %c0_10 = arith.constant 0 : index
    %7 = vector.load %arg1[%c0_9, %c0_10] : memref<16x8xf32, #tpu.memory_space<vmem>>, vector<16x8xf32>
    %cst = arith.constant dense<0.000000e+00> : vector<16x128xf32>
    %8 = tpu.matmul %7, %0, %cst {dimension_numbers = #tpu.dot_dimension_numbers<[1], [0], [0], [1], [0, 0, 1, 1], [], []>} : vector<16x8xf32>, vector<8x128xf32>, vector<16x128xf32> -> vector<16x128xf32>
    %9 = vector.broadcast %2 : vector<1x128xf32> to vector<16x128xf32>
    %10 = arith.addf %8, %9 : vector<16x128xf32>
    %cst_11 = arith.constant 0.000000e+00 : f32
    %11 = vector.broadcast %cst_11 : f32 to vector<2x32xf32>
    %12 = vector.extract_strided_slice %10 {offsets = [0, 0], sizes = [2, 128], strides = [1, 1]} : vector<16x128xf32> to vector<2x128xf32>
    %cst_12 = arith.constant dense<0.000000e+00> : vector<2x128xf32>
    %13 = tpu.matmul %11, %1, %cst_12 {dimension_numbers = #tpu.dot_dimension_numbers<[1], [0], [0], [1], [0, 0, 1, 1], [], []>} : vector<2x32xf32>, vector<32x128xf32>, vector<2x128xf32> -> vector<2x128xf32>
    %14 = arith.addf %12, %13 : vector<2x128xf32>
    %15 = arith.negf %14 : vector<2x128xf32>
    %16 = math.exp %15 : vector<2x128xf32>
    %cst_13 = arith.constant 1.000000e+00 : f32
    %17 = vector.broadcast %cst_13 : f32 to vector<2x128xf32>
    %18 = arith.addf %17, %16 : vector<2x128xf32>
    %19 = arith.divf %17, %18 : vector<2x128xf32>
    %20 = math.tanh %14 : vector<2x128xf32>
    %21 = vector.extract_strided_slice %19 {offsets = [0, 0], sizes = [2, 32], strides = [1, 1]} : vector<2x128xf32> to vector<2x32xf32>
    %22 = vector.extract_strided_slice %19 {offsets = [0, 32], sizes = [2, 32], strides = [1, 1]} : vector<2x128xf32> to vector<2x32xf32>
    %23 = vector.extract_strided_slice %19 {offsets = [0, 96], sizes = [2, 32], strides = [1, 1]} : vector<2x128xf32> to vector<2x32xf32>
    %24 = vector.extract_strided_slice %20 {offsets = [0, 64], sizes = [2, 32], strides = [1, 1]} : vector<2x128xf32> to vector<2x32xf32>
    %25 = arith.mulf %22, %11 : vector<2x32xf32>
    %26 = arith.mulf %21, %24 : vector<2x32xf32>
    %27 = arith.addf %25, %26 : vector<2x32xf32>
    %28 = math.tanh %27 : vector<2x32xf32>
    %29 = arith.mulf %23, %28 : vector<2x32xf32>
    %30 = tpu.concatenate %29, %11 in 1 : vector<2x32xf32>, vector<2x32xf32> -> vector<2x64xf32>
    %cst_14 = arith.constant dense<0.000000e+00> : vector<2x128xf32>
    %31 = tpu.matmul %30, %3, %cst_14 {dimension_numbers = #tpu.dot_dimension_numbers<[1], [0], [0], [1], [0, 0, 1, 1], [], []>} : vector<2x64xf32>, vector<64x128xf32>, vector<2x128xf32> -> vector<2x128xf32>
    %32 = arith.addf %31, %6 : vector<2x128xf32>
    %33 = arith.negf %32 : vector<2x128xf32>
    %34 = math.exp %33 : vector<2x128xf32>
    %cst_15 = arith.constant 1.000000e+00 : f32
    %35 = vector.broadcast %cst_15 : f32 to vector<2x128xf32>
    %36 = arith.addf %35, %34 : vector<2x128xf32>
    %37 = arith.divf %35, %36 : vector<2x128xf32>
    %38 = math.tanh %32 : vector<2x128xf32>
    %39 = vector.extract_strided_slice %37 {offsets = [0, 0], sizes = [2, 32], strides = [1, 1]} : vector<2x128xf32> to vector<2x32xf32>
    %40 = vector.extract_strided_slice %37 {offsets = [0, 32], sizes = [2, 32], strides = [1, 1]} : vector<2x128xf32> to vector<2x32xf32>
    %41 = vector.extract_strided_slice %37 {offsets = [0, 96], sizes = [2, 32], strides = [1, 1]} : vector<2x128xf32> to vector<2x32xf32>
    %42 = vector.extract_strided_slice %38 {offsets = [0, 64], sizes = [2, 32], strides = [1, 1]} : vector<2x128xf32> to vector<2x32xf32>
    %43 = arith.mulf %40, %11 : vector<2x32xf32>
    %44 = arith.mulf %39, %42 : vector<2x32xf32>
    %45 = arith.addf %43, %44 : vector<2x32xf32>
    %46 = math.tanh %45 : vector<2x32xf32>
    %47 = arith.mulf %41, %46 : vector<2x32xf32>
    %c0_16 = arith.constant 0 : index
    %c0_17 = arith.constant 0 : index
    %48 = vector.load %arg32[%c0_16, %c0_17] : memref<16x32xf32, #tpu.memory_space<vmem>>, vector<2x32xf32>
    tpu.vector_store %arg32[%c0_16, %c0_17], %47 {strides = array<i32>} : memref<16x32xf32, #tpu.memory_space<vmem>>, vector<2x32xf32>,
    %49 = vector.extract_strided_slice %10 {offsets = [2, 0], sizes = [2, 128], strides = [1, 1]} : vector<16x128xf32> to vector<2x128xf32>
    %cst_18 = arith.constant dense<0.000000e+00> : vector<2x128xf32>
    %50 = tpu.matmul %29, %1, %cst_18 {dimension_numbers = #tpu.dot_dimension_numbers<[1], [0], [0], [1], [0, 0, 1, 1], [], []>} : vector<2x32xf32>, vector<32x128xf32>, vector<2x128xf32> -> vector<2x128xf32>
    %51 = arith.addf %49, %50 : vector<2x128xf32>
    %52 = arith.negf %51 : vector<2x128xf32>
    %53 = math.exp %52 : vector<2x128xf32>
    %cst_19 = arith.constant 1.000000e+00 : f32
    %54 = vector.broadcast %cst_19 : f32 to vector<2x128xf32>
    %55 = arith.addf %54, %53 : vector<2x128xf32>
    %56 = arith.divf %54, %55 : vector<2x128xf32>
    %57 = math.tanh %51 : vector<2x128xf32>
    %58 = vector.extract_strided_slice %56 {offsets = [0, 0], sizes = [2, 32], strides = [1, 1]} : vector<2x128xf32> to vector<2x32xf32>
    %59 = vector.extract_strided_slice %56 {offsets = [0, 32], sizes = [2, 32], strides = [1, 1]} : vector<2x128xf32> to vector<2x32xf32>
    %60 = vector.extract_strided_slice %56 {offsets = [0, 96], sizes = [2, 32], strides = [1, 1]} : vector<2x128xf32> to vector<2x32xf32>
    %61 = vector.extract_strided_slice %57 {offsets = [0, 64], sizes = [2, 32], strides = [1, 1]} : vector<2x128xf32> to vector<2x32xf32>
    %62 = arith.mulf %59, %27 : vector<2x32xf32>
    %63 = arith.mulf %58, %61 : vector<2x32xf32>
    %64 = arith.addf %62, %63 : vector<2x32xf32>
    %65 = math.tanh %64 : vector<2x32xf32>
    %66 = arith.mulf %60, %65 : vector<2x32xf32>
    %67 = tpu.concatenate %66, %47 in 1 : vector<2x32xf32>, vector<2x32xf32> -> vector<2x64xf32>
    %cst_20 = arith.constant dense<0.000000e+00> : vector<2x128xf32>
    %68 = tpu.matmul %67, %3, %cst_20 {dimension_numbers = #tpu.dot_dimension_numbers<[1], [0], [0], [1], [0, 0, 1, 1], [], []>} : vector<2x64xf32>, vector<64x128xf32>, vector<2x128xf32> -> vector<2x128xf32>
    %69 = arith.addf %68, %6 : vector<2x128xf32>
    %70 = arith.negf %69 : vector<2x128xf32>
    %71 = math.exp %70 : vector<2x128xf32>
    %cst_21 = arith.constant 1.000000e+00 : f32
    %72 = vector.broadcast %cst_21 : f32 to vector<2x128xf32>
    %73 = arith.addf %72, %71 : vector<2x128xf32>
    %74 = arith.divf %72, %73 : vector<2x128xf32>
    %75 = math.tanh %69 : vector<2x128xf32>
    %76 = vector.extract_strided_slice %74 {offsets = [0, 0], sizes = [2, 32], strides = [1, 1]} : vector<2x128xf32> to vector<2x32xf32>
    %77 = vector.extract_strided_slice %74 {offsets = [0, 32], sizes = [2, 32], strides = [1, 1]} : vector<2x128xf32> to vector<2x32xf32>
    %78 = vector.extract_strided_slice %74 {offsets = [0, 96], sizes = [2, 32], strides = [1, 1]} : vector<2x128xf32> to vector<2x32xf32>
    %79 = vector.extract_strided_slice %75 {offsets = [0, 64], sizes = [2, 32], strides = [1, 1]} : vector<2x128xf32> to vector<2x32xf32>
    %80 = arith.mulf %77, %45 : vector<2x32xf32>
    %81 = arith.mulf %76, %79 : vector<2x32xf32>
    %82 = arith.addf %80, %81 : vector<2x32xf32>
    %83 = math.tanh %82 : vector<2x32xf32>
    %84 = arith.mulf %78, %83 : vector<2x32xf32>
    %c2 = arith.constant 2 : index
    %c0_22 = arith.constant 0 : index
    %85 = vector.load %arg32[%c2, %c0_22] : memref<16x32xf32, #tpu.memory_space<vmem>>, vector<2x32xf32>
    tpu.vector_store %arg32[%c2, %c0_22], %84 {strides = array<i32>} : memref<16x32xf32, #tpu.memory_space<vmem>>, vector<2x32xf32>,
    %86 = vector.extract_strided_slice %10 {offsets = [4, 0], sizes = [2, 128], strides = [1, 1]} : vector<16x128xf32> to vector<2x128xf32>
    %cst_23 = arith.constant dense<0.000000e+00> : vector<2x128xf32>
    %87 = tpu.matmul %66, %1, %cst_23 {dimension_numbers = #tpu.dot_dimension_numbers<[1], [0], [0], [1], [0, 0, 1, 1], [], []>} : vector<2x32xf32>, vector<32x128xf32>, vector<2x128xf32> -> vector<2x128xf32>
    %88 = arith.addf %86, %87 : vector<2x128xf32>
    %89 = arith.negf %88 : vector<2x128xf32>
    %90 = math.exp %89 : vector<2x128xf32>
    %cst_24 = arith.constant 1.000000e+00 : f32
    %91 = vector.broadcast %cst_24 : f32 to vector<2x128xf32>
    %92 = arith.addf %91, %90 : vector<2x128xf32>
    %93 = arith.divf %91, %92 : vector<2x128xf32>
    %94 = math.tanh %88 : vector<2x128xf32>
    %95 = vector.extract_strided_slice %93 {offsets = [0, 0], sizes = [2, 32], strides = [1, 1]} : vector<2x128xf32> to vector<2x32xf32>
    %96 = vector.extract_strided_slice %93 {offsets = [0, 32], sizes = [2, 32], strides = [1, 1]} : vector<2x128xf32> to vector<2x32xf32>
    %97 = vector.extract_strided_slice %93 {offsets = [0, 96], sizes = [2, 32], strides = [1, 1]} : vector<2x128xf32> to vector<2x32xf32>
    %98 = vector.extract_strided_slice %94 {offsets = [0, 64], sizes = [2, 32], strides = [1, 1]} : vector<2x128xf32> to vector<2x32xf32>
    %99 = arith.mulf %96, %64 : vector<2x32xf32>
    %100 = arith.mulf %95, %98 : vector<2x32xf32>
    %101 = arith.addf %99, %100 : vector<2x32xf32>
    %102 = math.tanh %101 : vector<2x32xf32>
    %103 = arith.mulf %97, %102 : vector<2x32xf32>
    %104 = tpu.concatenate %103, %84 in 1 : vector<2x32xf32>, vector<2x32xf32> -> vector<2x64xf32>
    %cst_25 = arith.constant dense<0.000000e+00> : vector<2x128xf32>
    %105 = tpu.matmul %104, %3, %cst_25 {dimension_numbers = #tpu.dot_dimension_numbers<[1], [0], [0], [1], [0, 0, 1, 1], [], []>} : vector<2x64xf32>, vector<64x128xf32>, vector<2x128xf32> -> vector<2x128xf32>
    %106 = arith.addf %105, %6 : vector<2x128xf32>
    %107 = arith.negf %106 : vector<2x128xf32>
    %108 = math.exp %107 : vector<2x128xf32>
    %cst_26 = arith.constant 1.000000e+00 : f32
    %109 = vector.broadcast %cst_26 : f32 to vector<2x128xf32>
    %110 = arith.addf %109, %108 : vector<2x128xf32>
    %111 = arith.divf %109, %110 : vector<2x128xf32>
    %112 = math.tanh %106 : vector<2x128xf32>
    %113 = vector.extract_strided_slice %111 {offsets = [0, 0], sizes = [2, 32], strides = [1, 1]} : vector<2x128xf32> to vector<2x32xf32>
    %114 = vector.extract_strided_slice %111 {offsets = [0, 32], sizes = [2, 32], strides = [1, 1]} : vector<2x128xf32> to vector<2x32xf32>
    %115 = vector.extract_strided_slice %111 {offsets = [0, 96], sizes = [2, 32], strides = [1, 1]} : vector<2x128xf32> to vector<2x32xf32>
    %116 = vector.extract_strided_slice %112 {offsets = [0, 64], sizes = [2, 32], strides = [1, 1]} : vector<2x128xf32> to vector<2x32xf32>
    %117 = arith.mulf %114, %82 : vector<2x32xf32>
    %118 = arith.mulf %113, %116 : vector<2x32xf32>
    %119 = arith.addf %117, %118 : vector<2x32xf32>
    %120 = math.tanh %119 : vector<2x32xf32>
    %121 = arith.mulf %115, %120 : vector<2x32xf32>
    %c4 = arith.constant 4 : index
    %c0_27 = arith.constant 0 : index
    %122 = vector.load %arg32[%c4, %c0_27] : memref<16x32xf32, #tpu.memory_space<vmem>>, vector<2x32xf32>
    tpu.vector_store %arg32[%c4, %c0_27], %121 {strides = array<i32>} : memref<16x32xf32, #tpu.memory_space<vmem>>, vector<2x32xf32>,
    %123 = vector.extract_strided_slice %10 {offsets = [6, 0], sizes = [2, 128], strides = [1, 1]} : vector<16x128xf32> to vector<2x128xf32>
    %cst_28 = arith.constant dense<0.000000e+00> : vector<2x128xf32>
    %124 = tpu.matmul %103, %1, %cst_28 {dimension_numbers = #tpu.dot_dimension_numbers<[1], [0], [0], [1], [0, 0, 1, 1], [], []>} : vector<2x32xf32>, vector<32x128xf32>, vector<2x128xf32> -> vector<2x128xf32>
    %125 = arith.addf %123, %124 : vector<2x128xf32>
    %126 = arith.negf %125 : vector<2x128xf32>
    %127 = math.exp %126 : vector<2x128xf32>
    %cst_29 = arith.constant 1.000000e+00 : f32
    %128 = vector.broadcast %cst_29 : f32 to vector<2x128xf32>
    %129 = arith.addf %128, %127 : vector<2x128xf32>
    %130 = arith.divf %128, %129 : vector<2x128xf32>
    %131 = math.tanh %125 : vector<2x128xf32>
    %132 = vector.extract_strided_slice %130 {offsets = [0, 0], sizes = [2, 32], strides = [1, 1]} : vector<2x128xf32> to vector<2x32xf32>
    %133 = vector.extract_strided_slice %130 {offsets = [0, 32], sizes = [2, 32], strides = [1, 1]} : vector<2x128xf32> to vector<2x32xf32>
    %134 = vector.extract_strided_slice %130 {offsets = [0, 96], sizes = [2, 32], strides = [1, 1]} : vector<2x128xf32> to vector<2x32xf32>
    %135 = vector.extract_strided_slice %131 {offsets = [0, 64], sizes = [2, 32], strides = [1, 1]} : vector<2x128xf32> to vector<2x32xf32>
    %136 = arith.mulf %133, %101 : vector<2x32xf32>
    %137 = arith.mulf %132, %135 : vector<2x32xf32>
    %138 = arith.addf %136, %137 : vector<2x32xf32>
    %139 = math.tanh %138 : vector<2x32xf32>
    %140 = arith.mulf %134, %139 : vector<2x32xf32>
    %141 = tpu.concatenate %140, %121 in 1 : vector<2x32xf32>, vector<2x32xf32> -> vector<2x64xf32>
    %cst_30 = arith.constant dense<0.000000e+00> : vector<2x128xf32>
    %142 = tpu.matmul %141, %3, %cst_30 {dimension_numbers = #tpu.dot_dimension_numbers<[1], [0], [0], [1], [0, 0, 1, 1], [], []>} : vector<2x64xf32>, vector<64x128xf32>, vector<2x128xf32> -> vector<2x128xf32>
    %143 = arith.addf %142, %6 : vector<2x128xf32>
    %144 = arith.negf %143 : vector<2x128xf32>
    %145 = math.exp %144 : vector<2x128xf32>
    %cst_31 = arith.constant 1.000000e+00 : f32
    %146 = vector.broadcast %cst_31 : f32 to vector<2x128xf32>
    %147 = arith.addf %146, %145 : vector<2x128xf32>
    %148 = arith.divf %146, %147 : vector<2x128xf32>
    %149 = math.tanh %143 : vector<2x128xf32>
    %150 = vector.extract_strided_slice %148 {offsets = [0, 0], sizes = [2, 32], strides = [1, 1]} : vector<2x128xf32> to vector<2x32xf32>
    %151 = vector.extract_strided_slice %148 {offsets = [0, 32], sizes = [2, 32], strides = [1, 1]} : vector<2x128xf32> to vector<2x32xf32>
    %152 = vector.extract_strided_slice %148 {offsets = [0, 96], sizes = [2, 32], strides = [1, 1]} : vector<2x128xf32> to vector<2x32xf32>
    %153 = vector.extract_strided_slice %149 {offsets = [0, 64], sizes = [2, 32], strides = [1, 1]} : vector<2x128xf32> to vector<2x32xf32>
    %154 = arith.mulf %151, %119 : vector<2x32xf32>
    %155 = arith.mulf %150, %153 : vector<2x32xf32>
    %156 = arith.addf %154, %155 : vector<2x32xf32>
    %157 = math.tanh %156 : vector<2x32xf32>
    %158 = arith.mulf %152, %157 : vector<2x32xf32>
    %c6 = arith.constant 6 : index
    %c0_32 = arith.constant 0 : index
    %159 = vector.load %arg32[%c6, %c0_32] : memref<16x32xf32, #tpu.memory_space<vmem>>, vector<2x32xf32>
    tpu.vector_store %arg32[%c6, %c0_32], %158 {strides = array<i32>} : memref<16x32xf32, #tpu.memory_space<vmem>>, vector<2x32xf32>,
    %160 = vector.extract_strided_slice %10 {offsets = [8, 0], sizes = [2, 128], strides = [1, 1]} : vector<16x128xf32> to vector<2x128xf32>
    %cst_33 = arith.constant dense<0.000000e+00> : vector<2x128xf32>
    %161 = tpu.matmul %140, %1, %cst_33 {dimension_numbers = #tpu.dot_dimension_numbers<[1], [0], [0], [1], [0, 0, 1, 1], [], []>} : vector<2x32xf32>, vector<32x128xf32>, vector<2x128xf32> -> vector<2x128xf32>
    %162 = arith.addf %160, %161 : vector<2x128xf32>
    %163 = arith.negf %162 : vector<2x128xf32>
    %164 = math.exp %163 : vector<2x128xf32>
    %cst_34 = arith.constant 1.000000e+00 : f32
    %165 = vector.broadcast %cst_34 : f32 to vector<2x128xf32>
    %166 = arith.addf %165, %164 : vector<2x128xf32>
    %167 = arith.divf %165, %166 : vector<2x128xf32>
    %168 = math.tanh %162 : vector<2x128xf32>
    %169 = vector.extract_strided_slice %167 {offsets = [0, 0], sizes = [2, 32], strides = [1, 1]} : vector<2x128xf32> to vector<2x32xf32>
    %170 = vector.extract_strided_slice %167 {offsets = [0, 32], sizes = [2, 32], strides = [1, 1]} : vector<2x128xf32> to vector<2x32xf32>
    %171 = vector.extract_strided_slice %167 {offsets = [0, 96], sizes = [2, 32], strides = [1, 1]} : vector<2x128xf32> to vector<2x32xf32>
    %172 = vector.extract_strided_slice %168 {offsets = [0, 64], sizes = [2, 32], strides = [1, 1]} : vector<2x128xf32> to vector<2x32xf32>
    %173 = arith.mulf %170, %138 : vector<2x32xf32>
    %174 = arith.mulf %169, %172 : vector<2x32xf32>
    %175 = arith.addf %173, %174 : vector<2x32xf32>
    %176 = math.tanh %175 : vector<2x32xf32>
    %177 = arith.mulf %171, %176 : vector<2x32xf32>
    %178 = tpu.concatenate %177, %158 in 1 : vector<2x32xf32>, vector<2x32xf32> -> vector<2x64xf32>
    %cst_35 = arith.constant dense<0.000000e+00> : vector<2x128xf32>
    %179 = tpu.matmul %178, %3, %cst_35 {dimension_numbers = #tpu.dot_dimension_numbers<[1], [0], [0], [1], [0, 0, 1, 1], [], []>} : vector<2x64xf32>, vector<64x128xf32>, vector<2x128xf32> -> vector<2x128xf32>
    %180 = arith.addf %179, %6 : vector<2x128xf32>
    %181 = arith.negf %180 : vector<2x128xf32>
    %182 = math.exp %181 : vector<2x128xf32>
    %cst_36 = arith.constant 1.000000e+00 : f32
    %183 = vector.broadcast %cst_36 : f32 to vector<2x128xf32>
    %184 = arith.addf %183, %182 : vector<2x128xf32>
    %185 = arith.divf %183, %184 : vector<2x128xf32>
    %186 = math.tanh %180 : vector<2x128xf32>
    %187 = vector.extract_strided_slice %185 {offsets = [0, 0], sizes = [2, 32], strides = [1, 1]} : vector<2x128xf32> to vector<2x32xf32>
    %188 = vector.extract_strided_slice %185 {offsets = [0, 32], sizes = [2, 32], strides = [1, 1]} : vector<2x128xf32> to vector<2x32xf32>
    %189 = vector.extract_strided_slice %185 {offsets = [0, 96], sizes = [2, 32], strides = [1, 1]} : vector<2x128xf32> to vector<2x32xf32>
    %190 = vector.extract_strided_slice %186 {offsets = [0, 64], sizes = [2, 32], strides = [1, 1]} : vector<2x128xf32> to vector<2x32xf32>
    %191 = arith.mulf %188, %156 : vector<2x32xf32>
    %192 = arith.mulf %187, %190 : vector<2x32xf32>
    %193 = arith.addf %191, %192 : vector<2x32xf32>
    %194 = math.tanh %193 : vector<2x32xf32>
    %195 = arith.mulf %189, %194 : vector<2x32xf32>
    %c8 = arith.constant 8 : index
    %c0_37 = arith.constant 0 : index
    %196 = vector.load %arg32[%c8, %c0_37] : memref<16x32xf32, #tpu.memory_space<vmem>>, vector<2x32xf32>
    tpu.vector_store %arg32[%c8, %c0_37], %195 {strides = array<i32>} : memref<16x32xf32, #tpu.memory_space<vmem>>, vector<2x32xf32>,
    %197 = vector.extract_strided_slice %10 {offsets = [10, 0], sizes = [2, 128], strides = [1, 1]} : vector<16x128xf32> to vector<2x128xf32>
    %cst_38 = arith.constant dense<0.000000e+00> : vector<2x128xf32>
    %198 = tpu.matmul %177, %1, %cst_38 {dimension_numbers = #tpu.dot_dimension_numbers<[1], [0], [0], [1], [0, 0, 1, 1], [], []>} : vector<2x32xf32>, vector<32x128xf32>, vector<2x128xf32> -> vector<2x128xf32>
    %199 = arith.addf %197, %198 : vector<2x128xf32>
    %200 = arith.negf %199 : vector<2x128xf32>
    %201 = math.exp %200 : vector<2x128xf32>
    %cst_39 = arith.constant 1.000000e+00 : f32
    %202 = vector.broadcast %cst_39 : f32 to vector<2x128xf32>
    %203 = arith.addf %202, %201 : vector<2x128xf32>
    %204 = arith.divf %202, %203 : vector<2x128xf32>
    %205 = math.tanh %199 : vector<2x128xf32>
    %206 = vector.extract_strided_slice %204 {offsets = [0, 0], sizes = [2, 32], strides = [1, 1]} : vector<2x128xf32> to vector<2x32xf32>
    %207 = vector.extract_strided_slice %204 {offsets = [0, 32], sizes = [2, 32], strides = [1, 1]} : vector<2x128xf32> to vector<2x32xf32>
    %208 = vector.extract_strided_slice %204 {offsets = [0, 96], sizes = [2, 32], strides = [1, 1]} : vector<2x128xf32> to vector<2x32xf32>
    %209 = vector.extract_strided_slice %205 {offsets = [0, 64], sizes = [2, 32], strides = [1, 1]} : vector<2x128xf32> to vector<2x32xf32>
    %210 = arith.mulf %207, %175 : vector<2x32xf32>
    %211 = arith.mulf %206, %209 : vector<2x32xf32>
    %212 = arith.addf %210, %211 : vector<2x32xf32>
    %213 = math.tanh %212 : vector<2x32xf32>
    %214 = arith.mulf %208, %213 : vector<2x32xf32>
    %215 = tpu.concatenate %214, %195 in 1 : vector<2x32xf32>, vector<2x32xf32> -> vector<2x64xf32>
    %cst_40 = arith.constant dense<0.000000e+00> : vector<2x128xf32>
    %216 = tpu.matmul %215, %3, %cst_40 {dimension_numbers = #tpu.dot_dimension_numbers<[1], [0], [0], [1], [0, 0, 1, 1], [], []>} : vector<2x64xf32>, vector<64x128xf32>, vector<2x128xf32> -> vector<2x128xf32>
    %217 = arith.addf %216, %6 : vector<2x128xf32>
    %218 = arith.negf %217 : vector<2x128xf32>
    %219 = math.exp %218 : vector<2x128xf32>
    %cst_41 = arith.constant 1.000000e+00 : f32
    %220 = vector.broadcast %cst_41 : f32 to vector<2x128xf32>
    %221 = arith.addf %220, %219 : vector<2x128xf32>
    %222 = arith.divf %220, %221 : vector<2x128xf32>
    %223 = math.tanh %217 : vector<2x128xf32>
    %224 = vector.extract_strided_slice %222 {offsets = [0, 0], sizes = [2, 32], strides = [1, 1]} : vector<2x128xf32> to vector<2x32xf32>
    %225 = vector.extract_strided_slice %222 {offsets = [0, 32], sizes = [2, 32], strides = [1, 1]} : vector<2x128xf32> to vector<2x32xf32>
    %226 = vector.extract_strided_slice %222 {offsets = [0, 96], sizes = [2, 32], strides = [1, 1]} : vector<2x128xf32> to vector<2x32xf32>
    %227 = vector.extract_strided_slice %223 {offsets = [0, 64], sizes = [2, 32], strides = [1, 1]} : vector<2x128xf32> to vector<2x32xf32>
    %228 = arith.mulf %225, %193 : vector<2x32xf32>
    %229 = arith.mulf %224, %227 : vector<2x32xf32>
    %230 = arith.addf %228, %229 : vector<2x32xf32>
    %231 = math.tanh %230 : vector<2x32xf32>
    %232 = arith.mulf %226, %231 : vector<2x32xf32>
    %c10 = arith.constant 10 : index
    %c0_42 = arith.constant 0 : index
    %233 = vector.load %arg32[%c10, %c0_42] : memref<16x32xf32, #tpu.memory_space<vmem>>, vector<2x32xf32>
    tpu.vector_store %arg32[%c10, %c0_42], %232 {strides = array<i32>} : memref<16x32xf32, #tpu.memory_space<vmem>>, vector<2x32xf32>,
    %234 = vector.extract_strided_slice %10 {offsets = [12, 0], sizes = [2, 128], strides = [1, 1]} : vector<16x128xf32> to vector<2x128xf32>
    %cst_43 = arith.constant dense<0.000000e+00> : vector<2x128xf32>
    %235 = tpu.matmul %214, %1, %cst_43 {dimension_numbers = #tpu.dot_dimension_numbers<[1], [0], [0], [1], [0, 0, 1, 1], [], []>} : vector<2x32xf32>, vector<32x128xf32>, vector<2x128xf32> -> vector<2x128xf32>
    %236 = arith.addf %234, %235 : vector<2x128xf32>
    %237 = arith.negf %236 : vector<2x128xf32>
    %238 = math.exp %237 : vector<2x128xf32>
    %cst_44 = arith.constant 1.000000e+00 : f32
    %239 = vector.broadcast %cst_44 : f32 to vector<2x128xf32>
    %240 = arith.addf %239, %238 : vector<2x128xf32>
    %241 = arith.divf %239, %240 : vector<2x128xf32>
    %242 = math.tanh %236 : vector<2x128xf32>
    %243 = vector.extract_strided_slice %241 {offsets = [0, 0], sizes = [2, 32], strides = [1, 1]} : vector<2x128xf32> to vector<2x32xf32>
    %244 = vector.extract_strided_slice %241 {offsets = [0, 32], sizes = [2, 32], strides = [1, 1]} : vector<2x128xf32> to vector<2x32xf32>
    %245 = vector.extract_strided_slice %241 {offsets = [0, 96], sizes = [2, 32], strides = [1, 1]} : vector<2x128xf32> to vector<2x32xf32>
    %246 = vector.extract_strided_slice %242 {offsets = [0, 64], sizes = [2, 32], strides = [1, 1]} : vector<2x128xf32> to vector<2x32xf32>
    %247 = arith.mulf %244, %212 : vector<2x32xf32>
    %248 = arith.mulf %243, %246 : vector<2x32xf32>
    %249 = arith.addf %247, %248 : vector<2x32xf32>
    %250 = math.tanh %249 : vector<2x32xf32>
    %251 = arith.mulf %245, %250 : vector<2x32xf32>
    %252 = tpu.concatenate %251, %232 in 1 : vector<2x32xf32>, vector<2x32xf32> -> vector<2x64xf32>
    %cst_45 = arith.constant dense<0.000000e+00> : vector<2x128xf32>
    %253 = tpu.matmul %252, %3, %cst_45 {dimension_numbers = #tpu.dot_dimension_numbers<[1], [0], [0], [1], [0, 0, 1, 1], [], []>} : vector<2x64xf32>, vector<64x128xf32>, vector<2x128xf32> -> vector<2x128xf32>
    %254 = arith.addf %253, %6 : vector<2x128xf32>
    %255 = arith.negf %254 : vector<2x128xf32>
    %256 = math.exp %255 : vector<2x128xf32>
    %cst_46 = arith.constant 1.000000e+00 : f32
    %257 = vector.broadcast %cst_46 : f32 to vector<2x128xf32>
    %258 = arith.addf %257, %256 : vector<2x128xf32>
    %259 = arith.divf %257, %258 : vector<2x128xf32>
    %260 = math.tanh %254 : vector<2x128xf32>
    %261 = vector.extract_strided_slice %259 {offsets = [0, 0], sizes = [2, 32], strides = [1, 1]} : vector<2x128xf32> to vector<2x32xf32>
    %262 = vector.extract_strided_slice %259 {offsets = [0, 32], sizes = [2, 32], strides = [1, 1]} : vector<2x128xf32> to vector<2x32xf32>
    %263 = vector.extract_strided_slice %259 {offsets = [0, 96], sizes = [2, 32], strides = [1, 1]} : vector<2x128xf32> to vector<2x32xf32>
    %264 = vector.extract_strided_slice %260 {offsets = [0, 64], sizes = [2, 32], strides = [1, 1]} : vector<2x128xf32> to vector<2x32xf32>
    %265 = arith.mulf %262, %230 : vector<2x32xf32>
    %266 = arith.mulf %261, %264 : vector<2x32xf32>
    %267 = arith.addf %265, %266 : vector<2x32xf32>
    %268 = math.tanh %267 : vector<2x32xf32>
    %269 = arith.mulf %263, %268 : vector<2x32xf32>
    %c12 = arith.constant 12 : index
    %c0_47 = arith.constant 0 : index
    %270 = vector.load %arg32[%c12, %c0_47] : memref<16x32xf32, #tpu.memory_space<vmem>>, vector<2x32xf32>
    tpu.vector_store %arg32[%c12, %c0_47], %269 {strides = array<i32>} : memref<16x32xf32, #tpu.memory_space<vmem>>, vector<2x32xf32>,
    %271 = vector.extract_strided_slice %10 {offsets = [14, 0], sizes = [2, 128], strides = [1, 1]} : vector<16x128xf32> to vector<2x128xf32>
    %cst_48 = arith.constant dense<0.000000e+00> : vector<2x128xf32>
    %272 = tpu.matmul %251, %1, %cst_48 {dimension_numbers = #tpu.dot_dimension_numbers<[1], [0], [0], [1], [0, 0, 1, 1], [], []>} : vector<2x32xf32>, vector<32x128xf32>, vector<2x128xf32> -> vector<2x128xf32>
    %273 = arith.addf %271, %272 : vector<2x128xf32>
    %274 = arith.negf %273 : vector<2x128xf32>
    %275 = math.exp %274 : vector<2x128xf32>
    %cst_49 = arith.constant 1.000000e+00 : f32
    %276 = vector.broadcast %cst_49 : f32 to vector<2x128xf32>
    %277 = arith.addf %276, %275 : vector<2x128xf32>
    %278 = arith.divf %276, %277 : vector<2x128xf32>
    %279 = math.tanh %273 : vector<2x128xf32>
    %280 = vector.extract_strided_slice %278 {offsets = [0, 0], sizes = [2, 32], strides = [1, 1]} : vector<2x128xf32> to vector<2x32xf32>
    %281 = vector.extract_strided_slice %278 {offsets = [0, 32], sizes = [2, 32], strides = [1, 1]} : vector<2x128xf32> to vector<2x32xf32>
    %282 = vector.extract_strided_slice %278 {offsets = [0, 96], sizes = [2, 32], strides = [1, 1]} : vector<2x128xf32> to vector<2x32xf32>
    %283 = vector.extract_strided_slice %279 {offsets = [0, 64], sizes = [2, 32], strides = [1, 1]} : vector<2x128xf32> to vector<2x32xf32>
    %284 = arith.mulf %281, %249 : vector<2x32xf32>
    %285 = arith.mulf %280, %283 : vector<2x32xf32>
    %286 = arith.addf %284, %285 : vector<2x32xf32>
    %287 = math.tanh %286 : vector<2x32xf32>
    %288 = arith.mulf %282, %287 : vector<2x32xf32>
    %289 = tpu.concatenate %288, %269 in 1 : vector<2x32xf32>, vector<2x32xf32> -> vector<2x64xf32>
    %cst_50 = arith.constant dense<0.000000e+00> : vector<2x128xf32>
    %290 = tpu.matmul %289, %3, %cst_50 {dimension_numbers = #tpu.dot_dimension_numbers<[1], [0], [0], [1], [0, 0, 1, 1], [], []>} : vector<2x64xf32>, vector<64x128xf32>, vector<2x128xf32> -> vector<2x128xf32>
    %291 = arith.addf %290, %6 : vector<2x128xf32>
    %292 = arith.negf %291 : vector<2x128xf32>
    %293 = math.exp %292 : vector<2x128xf32>
    %cst_51 = arith.constant 1.000000e+00 : f32
    %294 = vector.broadcast %cst_51 : f32 to vector<2x128xf32>
    %295 = arith.addf %294, %293 : vector<2x128xf32>
    %296 = arith.divf %294, %295 : vector<2x128xf32>
    %297 = math.tanh %291 : vector<2x128xf32>
    %298 = vector.extract_strided_slice %296 {offsets = [0, 0], sizes = [2, 32], strides = [1, 1]} : vector<2x128xf32> to vector<2x32xf32>
    %299 = vector.extract_strided_slice %296 {offsets = [0, 32], sizes = [2, 32], strides = [1, 1]} : vector<2x128xf32> to vector<2x32xf32>
    %300 = vector.extract_strided_slice %296 {offsets = [0, 96], sizes = [2, 32], strides = [1, 1]} : vector<2x128xf32> to vector<2x32xf32>
    %301 = vector.extract_strided_slice %297 {offsets = [0, 64], sizes = [2, 32], strides = [1, 1]} : vector<2x128xf32> to vector<2x32xf32>
    %302 = arith.mulf %299, %267 : vector<2x32xf32>
    %303 = arith.mulf %298, %301 : vector<2x32xf32>
    %304 = arith.addf %302, %303 : vector<2x32xf32>
    %305 = math.tanh %304 : vector<2x32xf32>
    %306 = arith.mulf %300, %305 : vector<2x32xf32>
    %c14 = arith.constant 14 : index
    %c0_52 = arith.constant 0 : index
    %307 = vector.load %arg32[%c14, %c0_52] : memref<16x32xf32, #tpu.memory_space<vmem>>, vector<2x32xf32>
    tpu.vector_store %arg32[%c14, %c0_52], %306 {strides = array<i32>} : memref<16x32xf32, #tpu.memory_space<vmem>>, vector<2x32xf32>,
    %c0_53 = arith.constant 0 : index
    %c0_54 = arith.constant 0 : index
    %308 = vector.load %arg32[%c0_53, %c0_54] : memref<16x32xf32, #tpu.memory_space<vmem>>, vector<16x32xf32>
    %c0_55 = arith.constant 0 : index
    %c0_56 = arith.constant 0 : index
    %309 = vector.load %arg7[%c0_55, %c0_56] : memref<32x32xf32, #tpu.memory_space<vmem>>, vector<32x32xf32>
    %c0_57 = arith.constant 0 : index
    %c0_58 = arith.constant 0 : index
    %310 = vector.load %arg8[%c0_57, %c0_58] : memref<1x32xf32, #tpu.memory_space<vmem>>, vector<1x32xf32>
    %cst_59 = arith.constant dense<0.000000e+00> : vector<16x32xf32>
    %311 = tpu.matmul %308, %309, %cst_59 {dimension_numbers = #tpu.dot_dimension_numbers<[1], [0], [0], [1], [0, 0, 1, 1], [], []>} : vector<16x32xf32>, vector<32x32xf32>, vector<16x32xf32> -> vector<16x32xf32>
    %312 = vector.broadcast %310 : vector<1x32xf32> to vector<16x32xf32>
    %313 = arith.addf %311, %312 : vector<16x32xf32>
    %cst_60 = arith.constant 0.000000e+00 : f32
    %314 = vector.broadcast %cst_60 : f32 to vector<16x32xf32>
    %315 = arith.maximumf %313, %314 : vector<16x32xf32>
    %c0_61 = arith.constant 0 : index
    %c0_62 = arith.constant 0 : index
    %316 = vector.load %arg9[%c0_61, %c0_62] : memref<1x32xf32, #tpu.memory_space<vmem>>, vector<1x32xf32>
    %c0_63 = arith.constant 0 : index
    %c0_64 = arith.constant 0 : index
    %317 = vector.load %arg10[%c0_63, %c0_64] : memref<1x32xf32, #tpu.memory_space<vmem>>, vector<1x32xf32>
    %c0_65 = arith.constant 0 : index
    %c0_66 = arith.constant 0 : index
    %318 = vector.load %arg11[%c0_65, %c0_66] : memref<32x32xf32, #tpu.memory_space<vmem>>, vector<32x32xf32>
    %c0_67 = arith.constant 0 : index
    %c0_68 = arith.constant 0 : index
    %319 = vector.load %arg12[%c0_67, %c0_68] : memref<1x32xf32, #tpu.memory_space<vmem>>, vector<1x32xf32>
    %c0_69 = arith.constant 0 : index
    %c0_70 = arith.constant 0 : index
    %320 = vector.load %arg13[%c0_69, %c0_70] : memref<32x32xf32, #tpu.memory_space<vmem>>, vector<32x32xf32>
    %c0_71 = arith.constant 0 : index
    %c0_72 = arith.constant 0 : index
    %321 = vector.load %arg14[%c0_71, %c0_72] : memref<1x32xf32, #tpu.memory_space<vmem>>, vector<1x32xf32>
    %cst_73 = arith.constant dense<0.000000e+00> : vector<16xf32>
    %322 = vector.multi_reduction <add>, %315, %cst_73 [1] : vector<16x32xf32> to vector<16xf32>
    %323 = vector.shape_cast %322 : vector<16xf32> to vector<16x1xf32>
    %cst_74 = arith.constant 3.200000e+01 : f32
    %324 = vector.broadcast %cst_74 : f32 to vector<16x1xf32>
    %325 = arith.divf %323, %324 : vector<16x1xf32>
    %326 = vector.broadcast %325 : vector<16x1xf32> to vector<16x32xf32>
    %327 = arith.subf %315, %326 : vector<16x32xf32>
    %328 = arith.mulf %327, %327 : vector<16x32xf32>
    %cst_75 = arith.constant dense<0.000000e+00> : vector<16xf32>
    %329 = vector.multi_reduction <add>, %328, %cst_75 [1] : vector<16x32xf32> to vector<16xf32>
    %330 = vector.shape_cast %329 : vector<16xf32> to vector<16x1xf32>
    %cst_76 = arith.constant 3.200000e+01 : f32
    %331 = vector.broadcast %cst_76 : f32 to vector<16x1xf32>
    %332 = arith.divf %330, %331 : vector<16x1xf32>
    %333 = vector.broadcast %325 : vector<16x1xf32> to vector<16x32xf32>
    %334 = arith.subf %315, %333 : vector<16x32xf32>
    %cst_77 = arith.constant 9.99999974E-6 : f32
    %335 = vector.broadcast %cst_77 : f32 to vector<16x1xf32>
    %336 = arith.addf %332, %335 : vector<16x1xf32>
    %337 = math.rsqrt %336 : vector<16x1xf32>
    %338 = vector.broadcast %337 : vector<16x1xf32> to vector<16x32xf32>
    %339 = arith.mulf %334, %338 : vector<16x32xf32>
    %340 = vector.broadcast %316 : vector<1x32xf32> to vector<16x32xf32>
    %341 = arith.mulf %339, %340 : vector<16x32xf32>
    %342 = vector.broadcast %317 : vector<1x32xf32> to vector<16x32xf32>
    %343 = arith.addf %341, %342 : vector<16x32xf32>
    %cst_78 = arith.constant dense<0.000000e+00> : vector<16x32xf32>
    %344 = tpu.matmul %343, %318, %cst_78 {dimension_numbers = #tpu.dot_dimension_numbers<[1], [0], [0], [1], [0, 0, 1, 1], [], []>} : vector<16x32xf32>, vector<32x32xf32>, vector<16x32xf32> -> vector<16x32xf32>
    %345 = vector.broadcast %319 : vector<1x32xf32> to vector<16x32xf32>
    %346 = arith.addf %344, %345 : vector<16x32xf32>
    %cst_79 = arith.constant 0.000000e+00 : f32
    %347 = vector.broadcast %cst_79 : f32 to vector<16x32xf32>
    %348 = arith.maximumf %346, %347 : vector<16x32xf32>
    %cst_80 = arith.constant dense<0.000000e+00> : vector<16x32xf32>
    %349 = tpu.matmul %348, %320, %cst_80 {dimension_numbers = #tpu.dot_dimension_numbers<[1], [0], [0], [1], [0, 0, 1, 1], [], []>} : vector<16x32xf32>, vector<32x32xf32>, vector<16x32xf32> -> vector<16x32xf32>
    %350 = arith.addf %315, %349 : vector<16x32xf32>
    %351 = vector.broadcast %321 : vector<1x32xf32> to vector<16x32xf32>
    %352 = arith.addf %350, %351 : vector<16x32xf32>
    %c0_81 = arith.constant 0 : index
    %c0_82 = arith.constant 0 : index
    %353 = vector.load %arg15[%c0_81, %c0_82] : memref<32x32xf32, #tpu.memory_space<vmem>>, vector<32x32xf32>
    %c0_83 = arith.constant 0 : index
    %c0_84 = arith.constant 0 : index
    %354 = vector.load %arg16[%c0_83, %c0_84] : memref<1x32xf32, #tpu.memory_space<vmem>>, vector<1x32xf32>
    %cst_85 = arith.constant dense<0.000000e+00> : vector<16x32xf32>
    %355 = tpu.matmul %352, %353, %cst_85 {dimension_numbers = #tpu.dot_dimension_numbers<[1], [0], [0], [1], [0, 0, 1, 1], [], []>} : vector<16x32xf32>, vector<32x32xf32>, vector<16x32xf32> -> vector<16x32xf32>
    %356 = vector.broadcast %354 : vector<1x32xf32> to vector<16x32xf32>
    %357 = arith.addf %355, %356 : vector<16x32xf32>
    %c0_86 = arith.constant 0 : index
    %c0_87 = arith.constant 0 : index
    %358 = vector.load %arg17[%c0_86, %c0_87] : memref<32x16xf32, #tpu.memory_space<vmem>>, vector<32x16xf32>
    %c0_88 = arith.constant 0 : index
    %c0_89 = arith.constant 0 : index
    %359 = vector.load %arg18[%c0_88, %c0_89] : memref<32x1xf32, #tpu.memory_space<vmem>>, vector<32x1xf32>
    %cst_90 = arith.constant dense<0.000000e+00> : vector<32x32xf32>
    %360 = tpu.matmul %358, %357, %cst_90 {dimension_numbers = #tpu.dot_dimension_numbers<[1], [0], [0], [1], [0, 0, 1, 1], [], []>} : vector<32x16xf32>, vector<16x32xf32>, vector<32x32xf32> -> vector<32x32xf32>
    %361 = vector.broadcast %359 : vector<32x1xf32> to vector<32x32xf32>
    %362 = arith.addf %360, %361 : vector<32x32xf32>
    %cst_91 = arith.constant 0.000000e+00 : f32
    %363 = vector.broadcast %cst_91 : f32 to vector<32x32xf32>
    %364 = arith.maximumf %362, %363 : vector<32x32xf32>
    %c0_92 = arith.constant 0 : index
    %c0_93 = arith.constant 0 : index
    %365 = vector.load %arg19[%c0_92, %c0_93] : memref<2x32xf32, #tpu.memory_space<vmem>>, vector<2x32xf32>
    %c0_94 = arith.constant 0 : index
    %c0_95 = arith.constant 0 : index
    %366 = vector.load %arg20[%c0_94, %c0_95] : memref<2x1xf32, #tpu.memory_space<vmem>>, vector<2x1xf32>
    %cst_96 = arith.constant dense<0.000000e+00> : vector<2x32xf32>
    %367 = tpu.matmul %365, %364, %cst_96 {dimension_numbers = #tpu.dot_dimension_numbers<[1], [0], [0], [1], [0, 0, 1, 1], [], []>} : vector<2x32xf32>, vector<32x32xf32>, vector<2x32xf32> -> vector<2x32xf32>
    %368 = vector.broadcast %366 : vector<2x1xf32> to vector<2x32xf32>
    %369 = arith.addf %367, %368 : vector<2x32xf32>
    %c0_97 = arith.constant 0 : index
    %c0_98 = arith.constant 0 : index
    %370 = vector.load %arg21[%c0_97, %c0_98] : memref<32x64xf32, #tpu.memory_space<vmem>>, vector<32x64xf32>
    %c0_99 = arith.constant 0 : index
    %c0_100 = arith.constant 0 : index
    %371 = vector.load %arg22[%c0_99, %c0_100] : memref<2x64xf32, #tpu.memory_space<vmem>>, vector<2x64xf32>
    %cst_101 = arith.constant dense<0.000000e+00> : vector<2x64xf32>
    %372 = tpu.matmul %369, %370, %cst_101 {dimension_numbers = #tpu.dot_dimension_numbers<[1], [0], [0], [1], [0, 0, 1, 1], [], []>} : vector<2x32xf32>, vector<32x64xf32>, vector<2x64xf32> -> vector<2x64xf32>
    %373 = arith.addf %372, %371 : vector<2x64xf32>
    %cst_102 = arith.constant 0.000000e+00 : f32
    %374 = vector.broadcast %cst_102 : f32 to vector<2x64xf32>
    %375 = arith.maximumf %373, %374 : vector<2x64xf32>
    %c0_103 = arith.constant 0 : index
    %c0_104 = arith.constant 0 : index
    %376 = vector.load %arg23[%c0_103, %c0_104] : memref<1x64xf32, #tpu.memory_space<vmem>>, vector<1x64xf32>
    %c0_105 = arith.constant 0 : index
    %c0_106 = arith.constant 0 : index
    %377 = vector.load %arg24[%c0_105, %c0_106] : memref<1x64xf32, #tpu.memory_space<vmem>>, vector<1x64xf32>
    %c0_107 = arith.constant 0 : index
    %c0_108 = arith.constant 0 : index
    %378 = vector.load %arg25[%c0_107, %c0_108] : memref<64x64xf32, #tpu.memory_space<vmem>>, vector<64x64xf32>
    %c0_109 = arith.constant 0 : index
    %c0_110 = arith.constant 0 : index
    %379 = vector.load %arg26[%c0_109, %c0_110] : memref<1x64xf32, #tpu.memory_space<vmem>>, vector<1x64xf32>
    %c0_111 = arith.constant 0 : index
    %c0_112 = arith.constant 0 : index
    %380 = vector.load %arg27[%c0_111, %c0_112] : memref<64x64xf32, #tpu.memory_space<vmem>>, vector<64x64xf32>
    %c0_113 = arith.constant 0 : index
    %c0_114 = arith.constant 0 : index
    %381 = vector.load %arg28[%c0_113, %c0_114] : memref<1x64xf32, #tpu.memory_space<vmem>>, vector<1x64xf32>
    %cst_115 = arith.constant dense<0.000000e+00> : vector<2xf32>
    %382 = vector.multi_reduction <add>, %375, %cst_115 [1] : vector<2x64xf32> to vector<2xf32>
    %383 = vector.shape_cast %382 : vector<2xf32> to vector<2x1xf32>
    %cst_116 = arith.constant 6.400000e+01 : f32
    %384 = vector.broadcast %cst_116 : f32 to vector<2x1xf32>
    %385 = arith.divf %383, %384 : vector<2x1xf32>
    %386 = vector.broadcast %385 : vector<2x1xf32> to vector<2x64xf32>
    %387 = arith.subf %375, %386 : vector<2x64xf32>
    %388 = arith.mulf %387, %387 : vector<2x64xf32>
    %cst_117 = arith.constant dense<0.000000e+00> : vector<2xf32>
    %389 = vector.multi_reduction <add>, %388, %cst_117 [1] : vector<2x64xf32> to vector<2xf32>
    %390 = vector.shape_cast %389 : vector<2xf32> to vector<2x1xf32>
    %cst_118 = arith.constant 6.400000e+01 : f32
    %391 = vector.broadcast %cst_118 : f32 to vector<2x1xf32>
    %392 = arith.divf %390, %391 : vector<2x1xf32>
    %393 = vector.broadcast %385 : vector<2x1xf32> to vector<2x64xf32>
    %394 = arith.subf %375, %393 : vector<2x64xf32>
    %cst_119 = arith.constant 9.99999974E-6 : f32
    %395 = vector.broadcast %cst_119 : f32 to vector<2x1xf32>
    %396 = arith.addf %392, %395 : vector<2x1xf32>
    %397 = math.rsqrt %396 : vector<2x1xf32>
    %398 = vector.broadcast %397 : vector<2x1xf32> to vector<2x64xf32>
    %399 = arith.mulf %394, %398 : vector<2x64xf32>
    %400 = vector.broadcast %376 : vector<1x64xf32> to vector<2x64xf32>
    %401 = arith.mulf %399, %400 : vector<2x64xf32>
    %402 = vector.broadcast %377 : vector<1x64xf32> to vector<2x64xf32>
    %403 = arith.addf %401, %402 : vector<2x64xf32>
    %cst_120 = arith.constant dense<0.000000e+00> : vector<2x64xf32>
    %404 = tpu.matmul %403, %378, %cst_120 {dimension_numbers = #tpu.dot_dimension_numbers<[1], [0], [0], [1], [0, 0, 1, 1], [], []>} : vector<2x64xf32>, vector<64x64xf32>, vector<2x64xf32> -> vector<2x64xf32>
    %405 = vector.broadcast %379 : vector<1x64xf32> to vector<2x64xf32>
    %406 = arith.addf %404, %405 : vector<2x64xf32>
    %cst_121 = arith.constant 0.000000e+00 : f32
    %407 = vector.broadcast %cst_121 : f32 to vector<2x64xf32>
    %408 = arith.maximumf %406, %407 : vector<2x64xf32>
    %cst_122 = arith.constant dense<0.000000e+00> : vector<2x64xf32>
    %409 = tpu.matmul %408, %380, %cst_122 {dimension_numbers = #tpu.dot_dimension_numbers<[1], [0], [0], [1], [0, 0, 1, 1], [], []>} : vector<2x64xf32>, vector<64x64xf32>, vector<2x64xf32> -> vector<2x64xf32>
    %410 = arith.addf %375, %409 : vector<2x64xf32>
    %411 = vector.broadcast %381 : vector<1x64xf32> to vector<2x64xf32>
    %412 = arith.addf %410, %411 : vector<2x64xf32>
    %c0_123 = arith.constant 0 : index
    %c0_124 = arith.constant 0 : index
    %413 = vector.load %arg29[%c0_123, %c0_124] : memref<64x16xf32, #tpu.memory_space<vmem>>, vector<64x16xf32>
    %c0_125 = arith.constant 0 : index
    %c0_126 = arith.constant 0 : index
    %414 = vector.load %arg30[%c0_125, %c0_126] : memref<1x16xf32, #tpu.memory_space<vmem>>, vector<1x16xf32>
    %cst_127 = arith.constant dense<0.000000e+00> : vector<2x16xf32>
    %415 = tpu.matmul %412, %413, %cst_127 {dimension_numbers = #tpu.dot_dimension_numbers<[1], [0], [0], [1], [0, 0, 1, 1], [], []>} : vector<2x64xf32>, vector<64x16xf32>, vector<2x16xf32> -> vector<2x16xf32>
    %416 = vector.broadcast %414 : vector<1x16xf32> to vector<2x16xf32>
    %417 = arith.addf %415, %416 : vector<2x16xf32>
    %c0_128 = arith.constant 0 : index
    %c0_129 = arith.constant 0 : index
    %418 = vector.load %arg31[%c0_128, %c0_129] : memref<2x16xf32, #tpu.memory_space<vmem>>, vector<2x16xf32>
    tpu.vector_store %arg31[%c0_128, %c0_129], %417 {strides = array<i32>} : memref<2x16xf32, #tpu.memory_space<vmem>>, vector<2x16xf32>,
    return
  }
  func.func @transform_0(%arg0: i32) -> (i32, i32) {
    %c0_i32 = arith.constant 0 : i32
    %c0_i32_0 = arith.constant 0 : i32
    %c0_i32_1 = arith.constant 0 : i32
    return %c0_i32, %c0_i32_0 : i32, i32
  }
  func.func @transform_1(%arg0: i32) -> (i32, i32) {
    %c0_i32 = arith.constant 0 : i32
    %c0_i32_0 = arith.constant 0 : i32
    %c0_i32_1 = arith.constant 0 : i32
    return %c0_i32, %c0_i32_0 : i32, i32
  }
  func.func @transform_2(%arg0: i32) -> (i32, i32) {
    %c0_i32 = arith.constant 0 : i32
    %c0_i32_0 = arith.constant 0 : i32
    %c0_i32_1 = arith.constant 0 : i32
    return %c0_i32, %c0_i32_0 : i32, i32
  }
  func.func @transform_3(%arg0: i32) -> (i32, i32) {
    %c0_i32 = arith.constant 0 : i32
    %c0_i32_0 = arith.constant 0 : i32
    %c0_i32_1 = arith.constant 0 : i32
    return %c0_i32, %c0_i32_0 : i32, i32
  }
  func.func @transform_4(%arg0: i32) -> (i32, i32) {
    %c0_i32 = arith.constant 0 : i32
    %c0_i32_0 = arith.constant 0 : i32
    %c0_i32_1 = arith.constant 0 : i32
    return %c0_i32, %c0_i32_0 : i32, i32
  }
  func.func @transform_5(%arg0: i32) -> (i32, i32) {
    %c0_i32 = arith.constant 0 : i32
    %c0_i32_0 = arith.constant 0 : i32
    %c0_i32_1 = arith.constant 0 : i32
    return %c0_i32, %c0_i32_0 : i32, i32
  }
  func.func @transform_6(%arg0: i32) -> (i32, i32) {
    %c0_i32 = arith.constant 0 : i32
    %c0_i32_0 = arith.constant 0 : i32
    %c0_i32_1 = arith.constant 0 : i32
    return %c0_i32, %c0_i32_0 : i32, i32
  }
  func.func @transform_7(%arg0: i32) -> (i32, i32) {
    %c0_i32 = arith.constant 0 : i32
    %c0_i32_0 = arith.constant 0 : i32
    %c0_i32_1 = arith.constant 0 : i32
    return %c0_i32, %c0_i32_0 : i32, i32
  }
  func.func @transform_8(%arg0: i32) -> (i32, i32) {
    %c0_i32 = arith.constant 0 : i32
    %c0_i32_0 = arith.constant 0 : i32
    %c0_i32_1 = arith.constant 0 : i32
    return %c0_i32, %c0_i32_0 : i32, i32
  }
  func.func @transform_9(%arg0: i32) -> (i32, i32) {
    %c0_i32 = arith.constant 0 : i32
    %c0_i32_0 = arith.constant 0 : i32
    %c0_i32_1 = arith.constant 0 : i32
    return %c0_i32, %c0_i32_0 : i32, i32
  }
  func.func @transform_10(%arg0: i32) -> (i32, i32) {
    %c0_i32 = arith.constant 0 : i32
    %c0_i32_0 = arith.constant 0 : i32
    %c0_i32_1 = arith.constant 0 : i32
    return %c0_i32, %c0_i32_0 : i32, i32
  }
  func.func @transform_11(%arg0: i32) -> (i32, i32) {
    %c0_i32 = arith.constant 0 : i32
    %c0_i32_0 = arith.constant 0 : i32
    %c0_i32_1 = arith.constant 0 : i32
    return %c0_i32, %c0_i32_0 : i32, i32
  }
  func.func @transform_12(%arg0: i32) -> (i32, i32) {
    %c0_i32 = arith.constant 0 : i32
    %c0_i32_0 = arith.constant 0 : i32
    %c0_i32_1 = arith.constant 0 : i32
    return %c0_i32, %c0_i32_0 : i32, i32
  }
  func.func @transform_13(%arg0: i32) -> (i32, i32) {
    %c0_i32 = arith.constant 0 : i32
    %c0_i32_0 = arith.constant 0 : i32
    %c0_i32_1 = arith.constant 0 : i32
    return %c0_i32, %c0_i32_0 : i32, i32
  }
  func.func @transform_14(%arg0: i32) -> (i32, i32) {
    %c0_i32 = arith.constant 0 : i32
    %c0_i32_0 = arith.constant 0 : i32
    %c0_i32_1 = arith.constant 0 : i32
    return %c0_i32, %c0_i32_0 : i32, i32
  }
  func.func @transform_15(%arg0: i32) -> (i32, i32) {
    %c0_i32 = arith.constant 0 : i32
    %c0_i32_0 = arith.constant 0 : i32
    %c0_i32_1 = arith.constant 0 : i32
    return %c0_i32, %c0_i32_0 : i32, i32
  }
  func.func @transform_16(%arg0: i32) -> (i32, i32) {
    %c0_i32 = arith.constant 0 : i32
    %c0_i32_0 = arith.constant 0 : i32
    %c0_i32_1 = arith.constant 0 : i32
    return %c0_i32, %c0_i32_0 : i32, i32
  }
  func.func @transform_17(%arg0: i32) -> (i32, i32) {
    %c0_i32 = arith.constant 0 : i32
    %c0_i32_0 = arith.constant 0 : i32
    %c0_i32_1 = arith.constant 0 : i32
    return %c0_i32, %c0_i32_0 : i32, i32
  }
  func.func @transform_18(%arg0: i32) -> (i32, i32) {
    %c0_i32 = arith.constant 0 : i32
    %c0_i32_0 = arith.constant 0 : i32
    %c0_i32_1 = arith.constant 0 : i32
    return %c0_i32, %c0_i32_0 : i32, i32
  }
  func.func @transform_19(%arg0: i32) -> (i32, i32) {
    %c0_i32 = arith.constant 0 : i32
    %c0_i32_0 = arith.constant 0 : i32
    %c0_i32_1 = arith.constant 0 : i32
    return %c0_i32, %c0_i32_0 : i32, i32
  }
  func.func @transform_20(%arg0: i32) -> (i32, i32) {
    %c0_i32 = arith.constant 0 : i32
    %c0_i32_0 = arith.constant 0 : i32
    %c0_i32_1 = arith.constant 0 : i32
    return %c0_i32, %c0_i32_0 : i32, i32
  }
  func.func @transform_21(%arg0: i32) -> (i32, i32) {
    %c0_i32 = arith.constant 0 : i32
    %c0_i32_0 = arith.constant 0 : i32
    %c0_i32_1 = arith.constant 0 : i32
    return %c0_i32, %c0_i32_0 : i32, i32
  }
  func.func @transform_22(%arg0: i32) -> (i32, i32) {
    %c0_i32 = arith.constant 0 : i32
    %c0_i32_0 = arith.constant 0 : i32
    %c0_i32_1 = arith.constant 0 : i32
    return %c0_i32, %c0_i32_0 : i32, i32
  }
  func.func @transform_23(%arg0: i32) -> (i32, i32) {
    %c0_i32 = arith.constant 0 : i32
    %c0_i32_0 = arith.constant 0 : i32
    %c0_i32_1 = arith.constant 0 : i32
    return %c0_i32, %c0_i32_0 : i32, i32
  }
  func.func @transform_24(%arg0: i32) -> (i32, i32) {
    %c0_i32 = arith.constant 0 : i32
    %c0_i32_0 = arith.constant 0 : i32
    %c0_i32_1 = arith.constant 0 : i32
    return %c0_i32, %c0_i32_0 : i32, i32
  }
  func.func @transform_25(%arg0: i32) -> (i32, i32) {
    %c0_i32 = arith.constant 0 : i32
    %c0_i32_0 = arith.constant 0 : i32
    %c0_i32_1 = arith.constant 0 : i32
    return %c0_i32, %c0_i32_0 : i32, i32
  }
  func.func @transform_26(%arg0: i32) -> (i32, i32) {
    %c0_i32 = arith.constant 0 : i32
    %c0_i32_0 = arith.constant 0 : i32
    %c0_i32_1 = arith.constant 0 : i32
    return %c0_i32, %c0_i32_0 : i32, i32
  }
  func.func @transform_27(%arg0: i32) -> (i32, i32) {
    %c0_i32 = arith.constant 0 : i32
    %c0_i32_0 = arith.constant 0 : i32
    %c0_i32_1 = arith.constant 0 : i32
    return %c0_i32, %c0_i32_0 : i32, i32
  }
  func.func @transform_28(%arg0: i32) -> (i32, i32) {
    %c0_i32 = arith.constant 0 : i32
    %c0_i32_0 = arith.constant 0 : i32
    %c0_i32_1 = arith.constant 0 : i32
    return %c0_i32, %c0_i32_0 : i32, i32
  }
  func.func @transform_29(%arg0: i32) -> (i32, i32) {
    %c0_i32 = arith.constant 0 : i32
    %c0_i32_0 = arith.constant 0 : i32
    %c0_i32_1 = arith.constant 0 : i32
    return %c0_i32, %c0_i32_0 : i32, i32
  }
  func.func @transform_30(%arg0: i32) -> (i32, i32) {
    %c0_i32 = arith.constant 0 : i32
    %c0_i32_0 = arith.constant 0 : i32
    %c0_i32_1 = arith.constant 0 : i32
    return %c0_i32, %c0_i32_0 : i32, i32
  }
}

</mosaic_0001>

<bundles_post_ra>
// kernel: tile.6
= control target key start
LH: loop header
LB: loop body
LE: loop exit
PB: predicated region body
PF: predicated region fallthrough
CT: control target
= control target key end

     0   :  { %s22_s0 = inlined_call_operand.vmem [shape: f32[16], index: 0, kind: input, shape index: {}]   ;;  %s23_s1 = inlined_call_operand.vmem [shape: f32[2,16], index: 1, kind: output, shape index: {}]  }
   0x1   :  { %v4_v0 = vld [vmem:[%s22_s0] ss:$0 sm:$0xff] }
   0x2   :  { %5 = vst [vmem:[%s23_s1] sm:$0x3] %v4_v0 }

// kernel: tile.0
= control target key start
LH: loop header
LB: loop body
LE: loop exit
PB: predicated region body
PF: predicated region fallthrough
CT: control target
= control target key end

     0   :  { %s131_s8 = smov 125   ;;  %s132_s9 = smov 126   ;;  %vm8_vm0 = vcmask 7168   ;;  %s222_s0 = inlined_call_operand.vmem [shape: f32[2,16], index: 0, kind: input, shape index: {}]   ;;  %s223_s1 = inlined_call_operand.vmem [shape: f32[32,1], index: 1, kind: output, shape index: {}]  }
   0x1   :  { %v5_v0 = vld [vmem:[%s222_s0] sm:$0x3]  ;;  %s130_s0 = smov 127   ;;  %s133_s10 = smov 124  }
   0x2   :  { %6 = vst [vmem:[#allocation0] sm:$0x3] %v5_v0  ;;  %s134_s11 = smov 123   ;;  %s135_s12 = smov 122  }
   0x3   :  { %s136_s13 = smov 121   ;;  %s137_s14 = smov 120  }
   0x4   :  { %s138_s17 = smov 119   ;;  %s139_s18 = smov 118  }
   0x5   :  { %s140_s19 = smov 117   ;;  %s141_s20 = smov 116  }
   0x6   :  { %s142_s21 = smov 115   ;;  %s143_s22 = smov 114  }
   0x7   :  { %s144_s23 = smov 113  }
   0x9   :  { %v10_v1 = vld [vmem:[#allocation0] sm:$0x3]  }
   0xa   :  { %v22_v2 = vld [vmem:[#allocation0] sm:$0x3]   ;;  %11 = vrot.lane.b32.xlu0 %v10_v1, %s130_s0 }
   0xb   :  { %23 = vrot.lane.b32.xlu1 %v22_v2, %s131_s8  ;;  %v16_v3 = vld [vmem:[#allocation0] sm:$0x3]  }
   0xc   :  { %v28_v4 = vld [vmem:[#allocation0] sm:$0x3]  }
   0xd   :  { %v34_v5 = vld [vmem:[#allocation0] sm:$0x3]  }
   0xe   :  { %17 = vrot.lane.b32.xlu0 %v16_v3, %s132_s9  ;;  %v40_v6 = vld [vmem:[#allocation0] sm:$0x3]  }
   0xf   :  { %29 = vrot.lane.b32.xlu1 %v28_v4, %s133_s10  ;;  %v46_v7 = vld [vmem:[#allocation0] sm:$0x3]  }
  0x10   :  { %v52_v8 = vld [vmem:[#allocation0] sm:$0x3]  }
  0x11   :  { %v58_v9 = vld [vmem:[#allocation0] sm:$0x3]  }
  0x12   :  { %35 = vrot.lane.b32.xlu0 %v34_v5, %s134_s11  ;;  %v64_v10 = vld [vmem:[#allocation0] sm:$0x3]  }
  0x13   :  { %41 = vrot.lane.b32.xlu1 %v40_v6, %s135_s12  ;;  %v7_v11 = vld [vmem:[#allocation0] sm:$0x3]  }
  0x14   :  { %9 = vst.msk [vmem:[%s223_s1] ss:$16 sm:$0x3] %vm8_vm0, %v7_v11   ;;  %v70_v12 = vld [vmem:[#allocation0] sm:$0x3]  }
  0x15   :  { %v76_v13 = vld [vmem:[#allocation0] sm:$0x3]  }
  0x16   :  { %47 = vrot.lane.b32.xlu0 %v46_v7, %s136_s13  ;;  %v82_v14 = vld [vmem:[#allocation0] sm:$0x3]  }
  0x17   :  { %53 = vrot.lane.b32.xlu1 %v52_v8, %s137_s14  ;;  %v88_v15 = vld [vmem:[#allocation0] sm:$0x3]  }
  0x18   :  { %v94_v16 = vld [vmem:[#allocation0] sm:$0x3]  }
  0x1a   :  { %59 = vrot.lane.b32.xlu0 %v58_v9, %s138_s17 }
  0x1b   :  { %65 = vrot.lane.b32.xlu1 %v64_v10, %s139_s18 }
  0x1e   :  { %71 = vrot.lane.b32.xlu0 %v70_v12, %s140_s19 }
  0x1f   :  { %77 = vrot.lane.b32.xlu1 %v76_v13, %s141_s20 }
  0x22   :  { %83 = vrot.lane.b32.xlu0 %v82_v14, %s142_s21 }
  0x23   :  { %89 = vrot.lane.b32.xlu1 %v88_v15, %s143_s22 }
  0x26   :  { %95 = vrot.lane.b32.xlu0 %v94_v16, %s144_s23 }
  0x7c   :  { %v12_v17 = vpop.permute.xlu0 %11  }
  0x7d   :  { %v24_v18 = vpop.permute.xlu1 %23   ;;  %100 = vst.msk [vmem:[%s223_s1 + $0x1] ss:$16 sm:$0x3] %vm8_vm0, %v12_v17  }
  0x7e   :  { %102 = vst.msk [vmem:[%s223_s1 + $0x3] ss:$16 sm:$0x3] %vm8_vm0, %v24_v18  }
  0x80   :  { %v18_v19 = vpop.permute.xlu0 %17  }
  0x81   :  { %v30_v20 = vpop.permute.xlu1 %29   ;;  %101 = vst.msk [vmem:[%s223_s1 + $0x2] ss:$16 sm:$0x3] %vm8_vm0, %v18_v19  }
  0x82   :  { %103 = vst.msk [vmem:[%s223_s1 + $0x4] ss:$16 sm:$0x3] %vm8_vm0, %v30_v20  }
  0x84   :  { %v36_v21 = vpop.permute.xlu0 %35  }
  0x85   :  { %v42_v22 = vpop.permute.xlu1 %41   ;;  %104 = vst.msk [vmem:[%s223_s1 + $0x5] ss:$16 sm:$0x3] %vm8_vm0, %v36_v21  }
  0x86   :  { %105 = vst.msk [vmem:[%s223_s1 + $0x6] ss:$16 sm:$0x3] %vm8_vm0, %v42_v22  }
  0x88   :  { %v48_v23 = vpop.permute.xlu0 %47  }
  0x89   :  { %v54_v24 = vpop.permute.xlu1 %53   ;;  %106 = vst.msk [vmem:[%s223_s1 + $0x7] ss:$16 sm:$0x3] %vm8_vm0, %v48_v23  }
  0x8a   :  { %107 = vst.msk [vmem:[%s223_s1 + $0x8] ss:$16 sm:$0x3] %vm8_vm0, %v54_v24  }
  0x8c   :  { %v60_v25 = vpop.permute.xlu0 %59  }
  0x8d   :  { %v66_v26 = vpop.permute.xlu1 %65   ;;  %108 = vst.msk [vmem:[%s223_s1 + $0x9] ss:$16 sm:$0x3] %vm8_vm0, %v60_v25  }
  0x8e   :  { %109 = vst.msk [vmem:[%s223_s1 + $0xa] ss:$16 sm:$0x3] %vm8_vm0, %v66_v26  }
  0x90   :  { %v72_v27 = vpop.permute.xlu0 %71  }
  0x91   :  { %v78_v28 = vpop.permute.xlu1 %77   ;;  %110 = vst.msk [vmem:[%s223_s1 + $0xb] ss:$16 sm:$0x3] %vm8_vm0, %v72_v27  }
  0x92   :  { %111 = vst.msk [vmem:[%s223_s1 + $0xc] ss:$16 sm:$0x3] %vm8_vm0, %v78_v28  }
  0x94   :  { %v84_v29 = vpop.permute.xlu0 %83  }
  0x95   :  { %v90_v30 = vpop.permute.xlu1 %89   ;;  %112 = vst.msk [vmem:[%s223_s1 + $0xd] ss:$16 sm:$0x3] %vm8_vm0, %v84_v29  }
  0x96   :  { %113 = vst.msk [vmem:[%s223_s1 + $0xe] ss:$16 sm:$0x3] %vm8_vm0, %v90_v30  }
  0x98   :  { %v96_v31 = vpop.permute.xlu0 %95  }
  0x99   :  { %114 = vst.msk [vmem:[%s223_s1 + $0xf] ss:$16 sm:$0x3] %vm8_vm0, %v96_v31  }

// kernel: _lambda_.1
= control target key start
LH: loop header
LB: loop body
LE: loop exit
PB: predicated region body
PF: predicated region fallthrough
CT: control target
= control target key end

     0   :  { %s4475_s6 = smov 1   ;;  %s4476_s10 = smov 2   ;;  %s5302_s0 = inlined_call_operand.smem [shape: u32[31], index: -1, kind: input, shape index: {}] }
   0x1   :  { %s4539_s5 = sld [smem:[%s5302_s0]]   ;;  %s4477_s14 = smov 3  }
   0x2   :  { %s4544_s9 = sld [smem:[%s5302_s0 + %s4475_s6]]   ;;  %s4478_s18 = smov 4  }
   0x3   :  { %s4549_s13 = sld [smem:[%s5302_s0 + %s4476_s10]]   ;;  %s4479_s22 = smov 5  }
   0x4   :  { %s4554_s17 = sld [smem:[%s5302_s0 + %s4477_s14]]   ;;  %s4480_s26 = smov 6  }
   0x5   :  { %s4559_s21 = sld [smem:[%s5302_s0 + %s4478_s18]]   ;;  %s4481_s30 = smov 7  }
   0x6   :  { %s4564_s25 = sld [smem:[%s5302_s0 + %s4479_s22]]   ;;  %s4482_s4 = smov 8  }
   0x7   :  { %5310 = sst [smem:[#allocation44_spill]] %s4539_s5  ;;  %s4483_s10 = smov 9  }
   0x8   :  { %5311 = sst [smem:[#allocation45_spill]] %s4544_s9  ;;  %s4484_s15 = smov 10  }
   0x9   :  { %s4569_s29 = sld [smem:[%s5302_s0 + %s4480_s26]]   ;;  %s4485_s20 = smov 11  }
   0xa   :  { %s4574_s3 = sld [smem:[%s5302_s0 + %s4481_s30]]   ;;  %s4486_s26 = smov 12  }
   0xb   :  { %5312 = sst [smem:[#allocation46_spill]] %s4559_s21  ;;  %s4487_s1 = smov 13  }
   0xc   :  { %s4579_s8 = sld [smem:[%s5302_s0 + %s4482_s4]]   ;;  %s4488_s7 = smov 14  }
   0xd   :  { %s4584_s14 = sld [smem:[%s5302_s0 + %s4483_s10]]   ;;  %s4490_s22 = smov 16  }
   0xe   :  { %s4589_s19 = sld [smem:[%s5302_s0 + %s4484_s15]]   ;;  %s4489_s15 = smov 15  }
   0xf   :  { %s4594_s24 = sld [smem:[%s5302_s0 + %s4485_s20]]   ;;  %s4491_s28 = smov 17  }
  0x10   :  { %s4599_s30 = sld [smem:[%s5302_s0 + %s4486_s26]]  }
  0x11   :  { %s4604_s6 = sld [smem:[%s5302_s0 + %s4487_s1]]  }
  0x12   :  { %s4609_s12 = sld [smem:[%s5302_s0 + %s4488_s7]]   ;;  %s4492_s7 = smov 18  }
  0x13   :  { %s4614_s20 = sld [smem:[%s5302_s0 + %s4489_s15]]   ;;  %s4493_s15 = smov 19  }
  0x14   :  { %s4619_s27 = sld [smem:[%s5302_s0 + %s4490_s22]]   ;;  %s4494_s22 = smov 20  }
  0x15   :  { %s4624_s4 = sld [smem:[%s5302_s0 + %s4491_s28]]   ;;  %s4495_s28 = smov 21  }
  0x16   :  { %s4629_s21 = sld [smem:[%s5302_s0 + %s4492_s7]]   ;;  %s4496_s7 = smov 22  }
  0x17   :  { %s4634_s5 = sld [smem:[%s5302_s0 + %s4493_s15]]   ;;  %s4497_s15 = smov 23  }
  0x19   :  { %5313 = sst [smem:[#allocation47_spill]] %s4614_s20 }
  0x1a   :  { %5314 = sst [smem:[#allocation48_spill]] %s4619_s27 }
  0x1b   :  { %5315 = sst [smem:[#allocation49_spill]] %s4624_s4 }
  0x1c   :  { %5316 = sst [smem:[#allocation50_spill]] %s4629_s21 }
  0x1d   :  { %5317 = sst [smem:[#allocation51_spill]] %s4634_s5 }
  0x1e   :  { %s4639_s27 = sld [smem:[%s5302_s0 + %s4494_s22]]   ;;  %s4498_s22 = smov 24  }
  0x1f   :  { %s4644_s4 = sld [smem:[%s5302_s0 + %s4495_s28]]   ;;  %s4499_s28 = smov 25  }
  0x20   :  { %s4649_s21 = sld [smem:[%s5302_s0 + %s4496_s7]]   ;;  %s4500_s7 = smov 26  }
  0x21   :  { %s4654_s5 = sld [smem:[%s5302_s0 + %s4497_s15]]   ;;  %s4501_s15 = smov 27  }
  0x22   :  { %s4669_s9 = sld [smem:[%s5302_s0 + %s4500_s7]]   ;;  %s4504_s7 = smov 30  }
  0x24   :  { %5318 = sst [smem:[#allocation52_spill]] %s4639_s27 }
  0x25   :  { %5319 = sst [smem:[#allocation53_spill]] %s4644_s4 }
  0x26   :  { %s4659_s27 = sld [smem:[%s5302_s0 + %s4498_s22]]   ;;  %s4502_s22 = smov 28  }
  0x27   :  { %5320 = sst [smem:[#allocation54_spill]] %s4654_s5 }
  0x28   :  { %s4664_s4 = sld [smem:[%s5302_s0 + %s4499_s28]]   ;;  %s4503_s28 = smov 29  }
  0x29   :  { %5322 = sst [smem:[#allocation56_spill]] %s4669_s9 }
  0x2a   :  { %s4674_s5 = sld [smem:[%s5302_s0 + %s4501_s15]]  }
  0x2b   :  { %s4684_s20 = sld [smem:[%s5302_s0 + %s4503_s28]]  }
  0x2c   :  { %5321 = sst [smem:[#allocation55_spill]] %s4659_s27 }
  0x2d   :  { %s4679_s27 = sld [smem:[%s5302_s0 + %s4502_s22]]  }
  0x2e   :  { %s4689_s9 = sld [smem:[%s5302_s0 + %s4504_s7]]  }
  0x2f   :  { %66 = vsyncpa [#allocation4], 0 }
  0x30   :  { %67 = vsyncpa [#allocation7], 0 }
  0x31   :  { %68 = vsyncpa [#allocation10], 0 }
  0x32   :  { %69 = vsyncpa [#allocation13], 0 }
  0x33   :  { %70 = vsyncpa [#allocation16], 0 }
  0x34   :  { %71 = vsyncpa [#allocation19], 0 }
  0x35   :  { %72 = vsyncpa [#allocation22], 0 }
  0x36   :  { %73 = vsyncpa [#allocation25], 0 }
  0x37   :  { %74 = vsyncpa [#allocation28], 0 }
  0x38   :  { %75 = vsyncpa [#allocation31], 0 }
  0x39   :  { %76 = vsyncpa [#allocation5], 0  ;;  %s4505_s15 = smov [#allocation6]  }
  0x3a   :  { %s99_s16 = sshll.u32 %s4505_s15, 4  ;;  %s100_s16 = int_to_ptr.vmem [resolvable:$true] %s99_s16 }
  0x3b   :  { %s4081_s18 = scalar_lea.vmem %s100_s16, 16  ;;  %s4085_s22 = scalar_lea.vmem %s100_s16, 32 }
  0x3c   :  { %p4082_p0 = scmp.ne.s32.totalorder %s100_s16, %s4081_s18  ;;  %p4086_p1 = scmp.lt.s32.totalorder %s100_s16, %s100_s16 }
  0x3d   :  { %p4087_p2 = scmp.lt.s32.totalorder %s4085_s22, %s4081_s18 }
  0x3f   :  { %p4088_p3 = por %p4087_p2, %p4086_p1 }
  0x41   :  { %p4089_p4 = pnand %p4088_p3, %p4082_p0 }
  0x43   :  { %4092 = shalt.err (!%p4089_p4)
}
  0x44   :  { %102 = dma.hbm_to_vmem [thread:$0]  %s4554_s17, 16, %s100_s16, [#allocation7]  }
  0x45   :  { %s4506_s0 = smov [#allocation9]   ;;  %s4507_s26 = smov [#allocation12]  }
  0x46   :  { %s120_s23 = sshll.u32 %s4506_s0, 4  ;;  %s143_s28 = sshll.u32 %s4507_s26, 4  ;;  %s121_s23 = int_to_ptr.vmem [resolvable:$true] %s120_s23  ;;  %s144_s28 = int_to_ptr.vmem [resolvable:$true] %s143_s28 }
  0x47   :  { %s4101_s1 = scalar_lea.vmem %s121_s23, 512  ;;  %p4106_p6 = scmp.lt.s32.totalorder %s121_s23, %s121_s23 }
  0x48   :  { %p4102_p5 = scmp.ne.s32.totalorder %s121_s23, %s4101_s1  ;;  %p4107_p7 = scmp.lt.s32.totalorder %s4101_s1, %s4101_s1 }
  0x4a   :  { %p4108_p8 = por %p4107_p7, %p4106_p6 }
  0x4c   :  { %p4109_p9 = pnand %p4108_p8, %p4102_p5 }
  0x4e   :  { %4112 = shalt.err (!%p4109_p9)
}
  0x4f   :  { %s4508_s2 = smov 128   ;;  %s4509_s7 = smov 8  }
  0x50   :  { %126 = dma.hbm_to_vmem [thread:$0]  %s4569_s29, 512, %s121_s23, [#allocation10], %s4508_s2, %s4508_s2, %s4509_s7  }
  0x51   :  { %s4121_s17 = scalar_lea.vmem %s144_s28, 16  ;;  %s4125_s10 = scalar_lea.vmem %s144_s28, 32 }
  0x52   :  { %p4122_p10 = scmp.ne.s32.totalorder %s144_s28, %s4121_s17  ;;  %p4126_p11 = scmp.lt.s32.totalorder %s144_s28, %s144_s28 }
  0x53   :  { %p4127_p12 = scmp.lt.s32.totalorder %s4125_s10, %s4121_s17 }
  0x55   :  { %p4128_p13 = por %p4127_p12, %p4126_p11 }
  0x57   :  { %p4129_p0 = pnand %p4128_p13, %p4122_p10 }
  0x59   :  { %4132 = shalt.err (!%p4129_p0)
}
  0x5a   :  { %146 = dma.hbm_to_vmem [thread:$0]  %s4579_s8, 16, %s144_s28, [#allocation13]  }
  0x5b   :  { %s4510_s11 = smov [#allocation15]   ;;  %s4511_s16 = smov [#allocation18]  }
  0x5c   :  { %s162_s15 = sshll.u32 %s4510_s11, 4  ;;  %s184_s18 = sshll.u32 %s4511_s16, 4  ;;  %s163_s15 = int_to_ptr.vmem [resolvable:$true] %s162_s15  ;;  %s185_s18 = int_to_ptr.vmem [resolvable:$true] %s184_s18 }
  0x5d   :  { %s4141_s22 = scalar_lea.vmem %s163_s15, 512  ;;  %p4146_p2 = scmp.lt.s32.totalorder %s163_s15, %s163_s15 }
  0x5e   :  { %p4142_p1 = scmp.ne.s32.totalorder %s163_s15, %s4141_s22  ;;  %p4147_p3 = scmp.lt.s32.totalorder %s4141_s22, %s4141_s22 }
  0x60   :  { %p4148_p4 = por %p4147_p3, %p4146_p2 }
  0x62   :  { %p4149_p5 = pnand %p4148_p4, %p4142_p1 }
  0x64   :  { %4152 = shalt.err (!%p4149_p5)
}
  0x65   :  { %168 = dma.hbm_to_vmem [thread:$0]  %s4589_s19, 512, %s163_s15, [#allocation16], %s4508_s2, %s4508_s2, %s4509_s7  }
  0x66   :  { %s4161_s29 = scalar_lea.vmem %s185_s18, 512  ;;  %p4166_p7 = scmp.lt.s32.totalorder %s185_s18, %s185_s18 }
  0x67   :  { %p4162_p6 = scmp.ne.s32.totalorder %s185_s18, %s4161_s29  ;;  %p4167_p8 = scmp.lt.s32.totalorder %s4161_s29, %s4161_s29 }
  0x69   :  { %p4168_p9 = por %p4167_p8, %p4166_p7 }
  0x6b   :  { %p4169_p10 = pnand %p4168_p9, %p4162_p6 }
  0x6d   :  { %4172 = shalt.err (!%p4169_p10)
}
  0x6e   :  { %190 = dma.hbm_to_vmem [thread:$0]  %s4599_s30, 512, %s185_s18, [#allocation19], %s4508_s2, %s4508_s2, %s4509_s7  }
  0x6f   :  { %s4512_s8 = smov [#allocation21]   ;;  %s4513_s23 = smov [#allocation24]  }
  0x70   :  { %s206_s0 = sshll.u32 %s4512_s8, 4  ;;  %s241_s26 = sshll.u32 %s4513_s23, 4  ;;  %s207_s0 = int_to_ptr.vmem [resolvable:$true] %s206_s0  ;;  %s242_s26 = int_to_ptr.vmem [resolvable:$true] %s241_s26 }
  0x71   :  { %s4181_s28 = scalar_lea.vmem %s207_s0, 512  ;;  %p4186_p12 = scmp.lt.s32.totalorder %s207_s0, %s207_s0 }
  0x72   :  { %p4182_p11 = scmp.ne.s32.totalorder %s207_s0, %s4181_s28  ;;  %p4187_p13 = scmp.lt.s32.totalorder %s4181_s28, %s4181_s28 }
  0x74   :  { %p4188_p0 = por %p4187_p13, %p4186_p12 }
  0x76   :  { %p4189_p1 = pnand %p4188_p0, %p4182_p11 }
  0x78   :  { %4192 = shalt.err (!%p4189_p1)
}
  0x79   :  { %212 = dma.hbm_to_vmem [thread:$0]  %s4609_s12, 512, %s207_s0, [#allocation22], %s4508_s2, %s4508_s2, %s4509_s7  }
  0x7a   :  { %s4201_s19 = scalar_lea.vmem %s242_s26, 16  ;;  %s4205_s30 = scalar_lea.vmem %s242_s26, 32 }
  0x7b   :  { %p4202_p2 = scmp.ne.s32.totalorder %s242_s26, %s4201_s19  ;;  %p4206_p3 = scmp.lt.s32.totalorder %s242_s26, %s242_s26 }
  0x7c   :  { %p4207_p4 = scmp.lt.s32.totalorder %s4205_s30, %s4201_s19 }
  0x7e   :  { %p4208_p5 = por %p4207_p4, %p4206_p3 }
  0x80   :  { %p4209_p6 = pnand %p4208_p5, %p4202_p2 }
  0x82   :  { %4212 = shalt.err (!%p4209_p6)
}
  0x83   :  { %244 = dma.hbm_to_vmem [thread:$0]  %s4649_s21, 16, %s242_s26, [#allocation25]  }
  0x84   :  { %s4514_s1 = smov [#allocation27]   ;;  %s4515_s10 = smov [#allocation3]  }
  0x85   :  { %s263_s17 = sshll.u32 %s4514_s1, 4  ;;  %s86_s11 = sshll.u32 %s4515_s10, 4  ;;  %s264_s17 = int_to_ptr.vmem [resolvable:$true] %s263_s17  ;;  %s87_s11 = int_to_ptr.vmem [resolvable:$true] %s86_s11 }
  0x86   :  { %s4221_s15 = scalar_lea.vmem %s264_s17, 16  ;;  %s4225_s16 = scalar_lea.vmem %s264_s17, 32 }
  0x87   :  { %p4222_p7 = scmp.ne.s32.totalorder %s264_s17, %s4221_s15  ;;  %p4226_p8 = scmp.lt.s32.totalorder %s264_s17, %s264_s17 }
  0x88   :  { %p4227_p9 = scmp.lt.s32.totalorder %s4225_s16, %s4221_s15 }
  0x8a   :  { %p4228_p10 = por %p4227_p9, %p4226_p8 }
  0x8c   :  { %p4229_p11 = pnand %p4228_p10, %p4222_p7 }
  0x8e   :  { %4232 = shalt.err (!%p4229_p11)
}
  0x8f   :  { %266 = dma.hbm_to_vmem [thread:$0]  %s4664_s4, 16, %s264_s17, [#allocation28]  }
  0x90   :  { %s4241_s12 = scalar_lea.vmem %s87_s11, 512  ;;  %p4246_p13 = scmp.lt.s32.totalorder %s87_s11, %s87_s11 }
  0x91   :  { %p4242_p12 = scmp.ne.s32.totalorder %s87_s11, %s4241_s12  ;;  %p4247_p0 = scmp.lt.s32.totalorder %s4241_s12, %s4241_s12 }
  0x93   :  { %p4248_p1 = por %p4247_p0, %p4246_p13 }
  0x95   :  { %p4249_p2 = pnand %p4248_p1, %p4242_p12 }
  0x97   :  { %4252 = shalt.err (!%p4249_p2)
}
  0x98   :  { %92 = dma.hbm_to_vmem [thread:$0]  %s4549_s13, 512, %s87_s11, [#allocation4], %s4508_s2, %s4508_s2, %s4509_s7  }
  0x99   :  { %s4516_s21 = smov [#allocation8]   ;;  %s4517_s22 = smov [#allocation11]  }
  0x9a   :  { %s111_s18 = sshll.u32 %s4516_s21, 4  ;;  %s133_s29 = sshll.u32 %s4517_s22, 4  ;;  %s112_s18 = int_to_ptr.vmem [resolvable:$true] %s111_s18  ;;  %s134_s29 = int_to_ptr.vmem [resolvable:$true] %s133_s29 }
  0x9b   :  { %s4261_s8 = scalar_lea.vmem %s112_s18, 16  ;;  %s4265_s4 = scalar_lea.vmem %s112_s18, 32 }
  0x9c   :  { %p4262_p3 = scmp.ne.s32.totalorder %s112_s18, %s4261_s8  ;;  %p4266_p4 = scmp.lt.s32.totalorder %s112_s18, %s112_s18 }
  0x9d   :  { %p4267_p5 = scmp.lt.s32.totalorder %s4265_s4, %s4261_s8 }
  0x9f   :  { %p4268_p6 = por %p4267_p5, %p4266_p4 }
  0xa1   :  { %p4269_p7 = pnand %p4268_p6, %p4262_p3 }
  0xa3   :  { %4272 = shalt.err (!%p4269_p7)
}
  0xa4   :  { %114 = dma.hbm_to_vmem [thread:$0]  %s4564_s25, 16, %s112_s18, [#allocation7]  }
  0xa5   :  { %s4281_s0 = scalar_lea.vmem %s134_s29, 16  ;;  %s4285_s23 = scalar_lea.vmem %s134_s29, 32 }
  0xa6   :  { %p4282_p8 = scmp.ne.s32.totalorder %s134_s29, %s4281_s0  ;;  %p4286_p9 = scmp.lt.s32.totalorder %s134_s29, %s134_s29 }
  0xa7   :  { %p4287_p10 = scmp.lt.s32.totalorder %s4285_s23, %s4281_s0 }
  0xa9   :  { %p4288_p11 = por %p4287_p10, %p4286_p9 }
  0xab   :  { %p4289_p12 = pnand %p4288_p11, %p4282_p8 }
  0xad   :  { %4292 = shalt.err (!%p4289_p12)
}
  0xae   :  { %136 = dma.hbm_to_vmem [thread:$0]  %s4574_s3, 16, %s134_s29, [#allocation10]  }
  0xaf   :  { %s4518_s13 = smov [#allocation14]   ;;  %s4519_s7 = smov [#allocation17]  }
  0xb0   :  { %s153_s2 = sshll.u32 %s4518_s13, 4  ;;  %s175_s26 = sshll.u32 %s4519_s7, 4  ;;  %s154_s2 = int_to_ptr.vmem [resolvable:$true] %s153_s2  ;;  %s176_s26 = int_to_ptr.vmem [resolvable:$true] %s175_s26 }
  0xb1   :  { %s4301_s28 = scalar_lea.vmem %s154_s2, 16  ;;  %s4305_s19 = scalar_lea.vmem %s154_s2, 32 }
  0xb2   :  { %p4302_p13 = scmp.ne.s32.totalorder %s154_s2, %s4301_s28  ;;  %p4306_p0 = scmp.lt.s32.totalorder %s154_s2, %s154_s2 }
  0xb3   :  { %p4307_p1 = scmp.lt.s32.totalorder %s4305_s19, %s4301_s28 }
  0xb5   :  { %p4308_p2 = por %p4307_p1, %p4306_p0 }
  0xb7   :  { %p4309_p3 = pnand %p4308_p2, %p4302_p13 }
  0xb9   :  { %4312 = shalt.err (!%p4309_p3)
}
  0xba   :  { %156 = dma.hbm_to_vmem [thread:$0]  %s4584_s14, 16, %s154_s2, [#allocation13]  }
  0xbb   :  { %s4321_s25 = scalar_lea.vmem %s176_s26, 16  ;;  %s4325_s30 = scalar_lea.vmem %s176_s26, 32 }
  0xbc   :  { %p4322_p4 = scmp.ne.s32.totalorder %s176_s26, %s4321_s25  ;;  %p4326_p5 = scmp.lt.s32.totalorder %s176_s26, %s176_s26 }
  0xbd   :  { %p4327_p6 = scmp.lt.s32.totalorder %s4325_s30, %s4321_s25 }
  0xbf   :  { %p4328_p7 = por %p4327_p6, %p4326_p5 }
  0xc1   :  { %p4329_p8 = pnand %p4328_p7, %p4322_p4 }
  0xc3   :  { %4332 = shalt.err (!%p4329_p8)
}
  0xc4   :  { %178 = dma.hbm_to_vmem [thread:$0]  %s4594_s24, 16, %s176_s26, [#allocation16]  }
  0xc5   :  { %s4520_s3 = smov [#allocation20]   ;;  %s4521_s17 = smov [#allocation23]  }
  0xc6   :  { %s197_s1 = sshll.u32 %s4520_s3, 4  ;;  %s219_s10 = sshll.u32 %s4521_s17, 4  ;;  %s198_s1 = int_to_ptr.vmem [resolvable:$true] %s197_s1  ;;  %s220_s10 = int_to_ptr.vmem [resolvable:$true] %s219_s10 }
  0xc7   :  { %s4341_s11 = scalar_lea.vmem %s198_s1, 16  ;;  %s4345_s15 = scalar_lea.vmem %s198_s1, 32 }
  0xc8   :  { %p4342_p9 = scmp.ne.s32.totalorder %s198_s1, %s4341_s11  ;;  %p4346_p10 = scmp.lt.s32.totalorder %s198_s1, %s198_s1 }
  0xc9   :  { %p4347_p11 = scmp.lt.s32.totalorder %s4345_s15, %s4341_s11 }
  0xcb   :  { %p4348_p12 = por %p4347_p11, %p4346_p10 }
  0xcd   :  { %p4349_p13 = pnand %p4348_p12, %p4342_p9 }
  0xcf   :  { %4352 = shalt.err (!%p4349_p13)
}
  0xd0   :  { %200 = dma.hbm_to_vmem [thread:$0]  %s4604_s6, 16, %s198_s1, [#allocation19]  }
  0xd1   :  { %s4361_s14 = scalar_lea.vmem %s220_s10, 16  ;;  %s4365_s16 = scalar_lea.vmem %s220_s10, 32 }
  0xd2   :  { %p4362_p0 = scmp.ne.s32.totalorder %s220_s10, %s4361_s14  ;;  %p4366_p1 = scmp.lt.s32.totalorder %s220_s10, %s220_s10 }
  0xd3   :  { %p4367_p2 = scmp.lt.s32.totalorder %s4365_s16, %s4361_s14 }
  0xd5   :  { %p4368_p3 = por %p4367_p2, %p4366_p1 }
  0xd7   :  { %p4369_p4 = pnand %p4368_p3, %p4362_p0 }
  0xd9   :  { %4372 = shalt.err (!%p4369_p4)
}
  0xda   :  { %s5323_s24 = sld [smem:[#allocation47_spill]]  ;;  %s4522_s12 = smov [#allocation26]  }
  0xdb   :  { %s251_s21 = sshll.u32 %s4522_s12, 4  ;;  %s4523_s18 = smov [#allocation29]   ;;  %s252_s21 = int_to_ptr.vmem [resolvable:$true] %s251_s21 }
  0xdc   :  { %s275_s22 = sshll.u32 %s4523_s18, 4  ;;  %s4381_s29 = scalar_lea.vmem %s252_s21, 16  ;;  %s276_s22 = int_to_ptr.vmem [resolvable:$true] %s275_s22 }
  0xdd   :  { %p4382_p5 = scmp.ne.s32.totalorder %s252_s21, %s4381_s29  ;;  %s4385_s8 = scalar_lea.vmem %s252_s21, 32 }
  0xde   :  { %p4386_p6 = scmp.lt.s32.totalorder %s252_s21, %s252_s21  ;;  %p4387_p7 = scmp.lt.s32.totalorder %s4385_s8, %s4381_s29 }
  0xe0   :  { %222 = dma.hbm_to_vmem [thread:$0]  %s5323_s24, 16, %s220_s10, [#allocation22]  }
  0xe1   :  { %p4388_p8 = por %p4387_p7, %p4386_p6 }
  0xe3   :  { %p4389_p9 = pnand %p4388_p8, %p4382_p5 }
  0xe5   :  { %4392 = shalt.err (!%p4389_p9)
}
  0xe6   :  { %s5324_s6 = sld [smem:[#allocation54_spill]]  ;;  %s4401_s4 = scalar_lea.vmem %s276_s22, 16 }
  0xe7   :  { %p4402_p10 = scmp.ne.s32.totalorder %s276_s22, %s4401_s4  ;;  %s4405_s0 = scalar_lea.vmem %s276_s22, 32 }
  0xe8   :  { %p4406_p11 = scmp.lt.s32.totalorder %s276_s22, %s276_s22  ;;  %p4407_p12 = scmp.lt.s32.totalorder %s4405_s0, %s4401_s4 }
  0xea   :  { %p4408_p13 = por %p4407_p12, %p4406_p11 }
  0xec   :  { %254 = dma.hbm_to_vmem [thread:$0]  %s5324_s6, 16, %s252_s21, [#allocation25]  }
  0xed   :  { %p4409_p0 = pnand %p4408_p13, %p4402_p10 }
  0xef   :  { %4412 = shalt.err (!%p4409_p0)
}
  0xf0   :  { %278 = dma.hbm_to_vmem [thread:$0]  %s4674_s5, 16, %s276_s22, [#allocation28]  }
  0xf1   :  { %s4524_s23 = smov [#allocation30]  }
  0xf2   :  { %s287_s13 = sshll.u32 %s4524_s23, 4  ;;  %s288_s13 = int_to_ptr.vmem [resolvable:$true] %s287_s13 }
  0xf3   :  { %s4421_s2 = scalar_lea.vmem %s288_s13, 16  ;;  %s4425_s7 = scalar_lea.vmem %s288_s13, 32 }
  0xf4   :  { %p4422_p1 = scmp.ne.s32.totalorder %s288_s13, %s4421_s2  ;;  %p4426_p2 = scmp.lt.s32.totalorder %s288_s13, %s288_s13 }
  0xf5   :  { %p4427_p3 = scmp.lt.s32.totalorder %s4425_s7, %s4421_s2 }
  0xf7   :  { %p4428_p4 = por %p4427_p3, %p4426_p2 }
  0xf9   :  { %p4429_p5 = pnand %p4428_p4, %p4422_p1 }
  0xfb   :  { %4432 = shalt.err (!%p4429_p5)
}
  0xfc   :  { %290 = dma.hbm_to_vmem [thread:$0]  %s4684_s20, 16, %s288_s13, [#allocation31]  }
  0xfd   :  { %4453 = dma.done.wait [#allocation4], 512  }
  0xfe   :  { %4454 = vsyncadd [#allocation4], 4294966784 }
  0xff   :  { %4455 = dma.done.wait [#allocation7], 32  }
 0x100   :  { %4456 = vsyncadd [#allocation7], 4294967264 }
 0x101   :  { %4457 = dma.done.wait [#allocation10], 528  }
 0x102   :  { %4458 = vsyncadd [#allocation10], 4294966768 }
 0x103   :  { %4459 = dma.done.wait [#allocation13], 32  }
 0x104   :  { %4460 = vsyncadd [#allocation13], 4294967264 }
 0x105   :  { %4461 = dma.done.wait [#allocation16], 528  }
 0x106   :  { %4462 = vsyncadd [#allocation16], 4294966768 }
 0x107   :  { %4463 = dma.done.wait [#allocation19], 528  }
 0x108   :  { %4464 = vsyncadd [#allocation19], 4294966768 }
 0x109   :  { %4465 = dma.done.wait [#allocation22], 528  }
 0x10a   :  { %4466 = vsyncadd [#allocation22], 4294966768 }
 0x10b   :  { %4467 = dma.done.wait [#allocation25], 32  }
 0x10c   :  { %4468 = vsyncadd [#allocation25], 4294967264 }
 0x10d   :  { %4469 = dma.done.wait [#allocation28], 32  }
 0x10e   :  { %4470 = vsyncadd [#allocation28], 4294967264 }
 0x10f   :  { %4471 = dma.done.wait [#allocation31], 16  }
 0x110   :  { %4472 = vsyncadd [#allocation31], 4294967280  ;;  %s5325_s5 = sld [smem:[#allocation45_spill]]  ;;  %v4525_v0 = vmov 0.0   ;;  %vm4526_vm0 = vmmov 0   ;;  %vm374_vm1 = vcmask 64512  }
 0x111   :  { %s5326_s20 = sld [smem:[#allocation44_spill]]  ;;  %3495 = vmatprep.subr.mxu1 %v4525_v0  ;;  %3503 = vmatprep.mubr.msk.f32.mxu1 %vm4526_vm0, %v4525_v0  ;;  %v4728_v2 = vld [vmem:[#allocation3 + $0x18] sm:$0xff]  ;;  %v4733_v5 = vld [vmem:[#allocation3 + $0x10] sm:$0xff]  ;;  %v4736_v6 = vld [vmem:[#allocation3 + $0x8] sm:$0xff]  ;;  %s4527_s26 = smov 64   ;;  %vm456_vm2 = vcmask 261120  }
 0x112   :  { %3496 = vmatpush3.msra.mxu1 %v4728_v2  ;;  %v4741_v7 = vld [vmem:[#allocation3] sm:$0xff]  ;;  %s5327_s28 = sld [smem:[#allocation46_spill]]  ;;  %s4528_s19 = smov 32   ;;  %vm560_vm3 = vcmask 523264   ;;  %vm662_vm4 = vcmask 254976   ;;  %vm2630_vm5 = vcmask 130048  }
 0x113   :  { %3497 = vmatprep.subr.mxu1 %v4525_v0  ;;  %v3246_v8 = vld [vmem:[#allocation6] ss:$0 sm:$0xff]  ;;  %v4851_v39 = vld [vmem:[#allocation8] ss:$0 sm:$0xff]  ;;  %s5328_s25 = sld [smem:[#allocation48_spill]]  ;;  %vm2911_vm6 = vcmask 517120  }
 0x114   :  { %3498 = vmatpush3.msra.mxu1 %v4733_v5  ;;  %s5329_s30 = sld [smem:[#allocation49_spill]]  ;;  %s4530_s14 = smov [#allocation32]   ;;  %vm3189_vm7 = vcmask 123904  }
 0x115   :  { %3499 = vmatprep.subr.mxu1 %v4525_v0  ;;  %s5330_s3 = sld [smem:[#allocation51_spill]]  ;;  %s3197_s16 = sshll.u32 %s4530_s14, 4  ;;  %s3198_s16 = int_to_ptr.vmem [resolvable:$true] %s3197_s16 }
 0x116   :  { %v345_v1 = vld [vmem:[%s5325_s5] sm:$0xff]  ;;  %3500 = vmatpush3.msra.mxu1 %v4736_v6  ;;  %s5331_s1 = sld [smem:[#allocation52_spill]]  ;;  %s4433_s24 = scalar_lea.vmem %s3198_s16, 32 }
 0x117   :  { %v366_v3 = vld [vmem:[%s5326_s20] sm:$0xff]  ;;  %3490 = vmatprep.subr.mxu0 %v345_v1  ;;  %v367_v4 = vld [vmem:[%s5326_s20 + $0x8] sm:$0xff]  ;;  %3501 = vmatprep.subr.mxu1 %v4525_v0  ;;  %s5332_s17 = sld [smem:[#allocation50_spill]]  ;;  %p4434_p6 = scmp.ne.s32.totalorder %s3198_s16, %s4433_s24 }
 0x118   :  { %3491 = vmatpush3.msra.mxu0 %v345_v1  ;;  %3492 = vmatprep.mubr.msk.f32.mxu0 %vm374_vm1, %v366_v3  ;;  %v4771_v26 = vld [vmem:[%s5327_s28 + $0x38] sm:$0xff]  ;;  %v4774_v27 = vld [vmem:[%s5327_s28 + $0x30] sm:$0xff]  ;;  %v4779_v28 = vld [vmem:[%s5327_s28 + $0x28] sm:$0xff]  ;;  %s5333_s10 = sld [smem:[#allocation53_spill]]  ;;  %p4438_p7 = scmp.lt.s32.totalorder %s3198_s16, %s3198_s16 }
 0x119   :  { %3493 = vmatmul.mubr.msk.f32.vlgmr.msra.gmra.mxu0 %vm374_vm1, %v367_v4  ;;  %3506 = vmatprep.subr.mxu0 %v4525_v0  ;;  %v4784_v29 = vld [vmem:[%s5327_s28 + $0x20] sm:$0xff]  ;;  %v4789_v30 = vld [vmem:[%s5327_s28 + $0x18] sm:$0xff]  ;;  %v4794_v31 = vld [vmem:[%s5327_s28 + $0x10] sm:$0xff]  ;;  %s5334_s11 = sld [smem:[#allocation55_spill]]  ;;  %p4439_p8 = scmp.lt.s32.totalorder %s4433_s24, %s4433_s24 }
 0x11a   :  { %3522 = vmatprep.mubr.msk.f32.mxu0 %vm4526_vm0, %v4525_v0  ;;  %3502 = vmatpush3.msra.mxu1 %v4741_v7  ;;  %v4799_v33 = vld [vmem:[%s5327_s28 + $0x8] sm:$0xff]  ;;  %v4807_v34 = vld [vmem:[%s5327_s28] sm:$0xff]  ;;  %s5335_s15 = sld [smem:[#allocation56_spill]] }
 0x11b   :  { %3504 = vmatmul.mubr.f32.vlgmr.msra.gmra.mxu1 %v4525_v0  ;;  %3525 = vmatprep.subr.mxu1 %v4525_v0  ;;  %p4440_p9 = por %p4439_p8, %p4438_p7 }
 0x11c   :  { %3526 = vmatpush3.msra.mxu1 %v4728_v2  ;;  %3533 = vmatprep.mubr.msk.f32.mxu1 %vm4526_vm0, %v4525_v0 }
 0x11d   :  { %3527 = vmatprep.subr.mxu1 %v4525_v0  ;;  %3507 = vmatpush3.msra.mxu0 %v4771_v26  ;;  %p4441_p10 = pnand %p4440_p9, %p4434_p6 }
 0x11e   :  { %3528 = vmatpush3.msra.mxu1 %v4733_v5  ;;  %3508 = vmatprep.subr.mxu0 %v4525_v0 }
 0x11f   :  { %3529 = vmatprep.subr.mxu1 %v4525_v0  ;;  %3509 = vmatpush3.msra.mxu0 %v4774_v27 }
 0x120   :  { %3530 = vmatpush3.msra.mxu1 %v4736_v6  ;;  %3510 = vmatprep.subr.mxu0 %v4525_v0 }
 0x121   :  { %3531 = vmatprep.subr.mxu1 %v4525_v0  ;;  %3511 = vmatpush3.msra.mxu0 %v4779_v28 }
 0x122   :  { %3532 = vmatpush3.msra.mxu1 %v4741_v7  ;;  %3512 = vmatprep.subr.mxu0 %v4525_v0 }
 0x123   :  { %3536 = vmatprep.subr.mxu1 %v4525_v0  ;;  %3513 = vmatpush3.msra.mxu0 %v4784_v29 }
 0x124   :  { %3514 = vmatprep.subr.mxu0 %v4525_v0 }
 0x125   :  { %3515 = vmatpush3.msra.mxu0 %v4789_v30 }
 0x126   :  { %3516 = vmatprep.subr.mxu0 %v4525_v0 }
 0x127   :  { %3517 = vmatpush3.msra.mxu0 %v4794_v31 }
 0x128   :  { %3518 = vmatprep.subr.mxu0 %v4525_v0 }
 0x129   :  { %3519 = vmatpush3.msra.mxu0 %v4799_v33 }
 0x12a   :  { %3520 = vmatprep.subr.mxu0 %v4525_v0 }
 0x12b   :  { %3521 = vmatpush3.msra.mxu0 %v4807_v34 }
 0x12c   :  { %3566 = vmatprep.subr.mxu0 %v4525_v0 }
 0x1d9   :  { %v3494_v9 = vpop.f32.mrf.mxu0 }
 0x1da   :  { %v4760_v10 = vadd.f32 %v3494_v9, %v3246_v8 }
 0x1db   :  { %v447_v11 = vpop.f32.mrf.mxu0  ;;  %v526_v13 = vpop.f32.mrf.mxu1 }
 0x1dc   :  { %v4762_v12 = vadd.f32 %v3246_v8, %v447_v11 }
 0x1dd   :  { %v3505_v15 = vpop.f32.mrf.mxu1 }
 0x1de   :  { %v530_v14 = vadd.f32 %v526_v13, %v4762_v12 }
 0x1e0   :  { %3926 = vtanh.f32 %v530_v14  ;;  %v3249_v17 = vmul.f32 -1.442695, %v530_v14 }
 0x1e2   :  { %3928 = vpow2.f32 %v3249_v17 }
 0x1ed   :  { %v3927_v16 = vpop.eup %3926 }
 0x1ee   :  { %540 = vrot.lane.b32.xlu0 %v3927_v16, %s4527_s26 }
 0x1ef   :  { %v3929_v18 = vpop.eup %3928 }
 0x1f0   :  { %v534_v19 = vadd.f32 1.0, %v3929_v18 }
 0x1f2   :  { %3930 = vrcp.f32 %v534_v19 }
 0x1ff   :  { %v3931_v20 = vpop.eup %3930 }
 0x200   :  { %v538_v23 = vmul.f32 0.0, %v3931_v20 }
 0x260   :  { %v541_v21 = vpop.permute.xlu0 %540 }
 0x261   :  { %v543_v22 = vmul.f32 %v3931_v20, %v541_v21 }
 0x263   :  { %545 = vrot.lane.b32.xlu0 %v543_v22, %s4528_s19 }
 0x2d5   :  { %v546_v24 = vpop.permute.xlu0 %545 }
 0x2d6   :  { %v4767_v25 = vadd.f32 %v546_v24, %v538_v23 }
 0x2d8   :  { %3932 = vtanh.f32 %v4767_v25  ;;  %v748_v61 = vrot.slane %v4767_v25, 6 }
 0x2e5   :  { %v3933_v32 = vpop.eup %3932 }
 0x2e6   :  { %551 = vrot.lane.b32.xlu1 %v3933_v32, %s4527_s26 }
 0x358   :  { %v552_v35 = vpop.permute.xlu1 %551 }
 0x359   :  { %v554_v36 = vmul.f32 %v3931_v20, %v552_v35 }
 0x35b   :  { %556 = vrot.lane.b32.xlu1 %v554_v36, %s4528_s19 }
 0x3cd   :  { %v557_v37 = vpop.permute.xlu1 %556 }
 0x3ce   :  { %v559_v38 = vsel %vm456_vm2, %v557_v37, 0.0  ;;  %3534 = vmatmul.mubr.msk.f32.vlgmr.msra.gmra.mxu1 %vm456_vm2, %v557_v37 }
 0x3cf   :  { %3523 = vmatmul.mubr.msk.f32.vlgmr.msra.gmra.mxu0 %vm560_vm3, %v559_v38  ;;  %3537 = vmatpush3.msra.mxu1 %v4771_v26 }
 0x3d0   :  { %3538 = vmatprep.subr.mxu1 %v4525_v0  ;;  %3552 = vmatprep.mubr.msk.f32.mxu1 %vm4526_vm0, %v4525_v0 }
 0x3d1   :  { %3539 = vmatpush3.msra.mxu1 %v4774_v27  ;;  %3567 = vmatpush3.msra.mxu0 %v4771_v26 }
 0x3d2   :  { %3540 = vmatprep.subr.mxu1 %v4525_v0  ;;  %3568 = vmatprep.subr.mxu0 %v4525_v0 }
 0x3d3   :  { %3541 = vmatpush3.msra.mxu1 %v4779_v28  ;;  %3569 = vmatpush3.msra.mxu0 %v4774_v27 }
 0x3d4   :  { %3542 = vmatprep.subr.mxu1 %v4525_v0  ;;  %3570 = vmatprep.subr.mxu0 %v4525_v0 }
 0x3d5   :  { %3543 = vmatpush3.msra.mxu1 %v4784_v29  ;;  %3571 = vmatpush3.msra.mxu0 %v4779_v28 }
 0x3d6   :  { %3544 = vmatprep.subr.mxu1 %v4525_v0  ;;  %3572 = vmatprep.subr.mxu0 %v4525_v0 }
 0x3d7   :  { %3545 = vmatpush3.msra.mxu1 %v4789_v30  ;;  %3573 = vmatpush3.msra.mxu0 %v4784_v29 }
 0x3d8   :  { %3546 = vmatprep.subr.mxu1 %v4525_v0  ;;  %3574 = vmatprep.subr.mxu0 %v4525_v0 }
 0x3d9   :  { %3547 = vmatpush3.msra.mxu1 %v4794_v31  ;;  %3575 = vmatpush3.msra.mxu0 %v4789_v30 }
 0x3da   :  { %3548 = vmatprep.subr.mxu1 %v4525_v0  ;;  %3576 = vmatprep.subr.mxu0 %v4525_v0 }
 0x3db   :  { %3549 = vmatpush3.msra.mxu1 %v4799_v33  ;;  %3577 = vmatpush3.msra.mxu0 %v4794_v31 }
 0x3dc   :  { %3550 = vmatprep.subr.mxu1 %v4525_v0  ;;  %3578 = vmatprep.subr.mxu0 %v4525_v0 }
 0x3dd   :  { %3551 = vmatpush3.msra.mxu1 %v4807_v34  ;;  %3579 = vmatpush3.msra.mxu0 %v4799_v33 }
 0x3de   :  { %3555 = vmatprep.subr.mxu1 %v4525_v0  ;;  %3580 = vmatprep.subr.mxu0 %v4525_v0 }
 0x3df   :  { %3581 = vmatpush3.msra.mxu0 %v4807_v34  ;;  %3582 = vmatprep.mubr.msk.f32.mxu0 %vm4526_vm0, %v4525_v0 }
 0x3e0   :  { %3615 = vmatprep.subr.mxu0 %v4525_v0 }
 0x48e   :  { %v732_v40 = vpop.f32.mrf.mxu1 }
 0x48f   :  { %v737_v41 = vrot.slane %v732_v40, 6  ;;  %v630_v42 = vpop.f32.mrf.mxu0 }
 0x490   :  { %v631_v43 = vadd.f32 %v4851_v39, %v630_v42  ;;  %v3535_v44 = vpop.f32.mrf.mxu1 }
 0x491   :  { %v739_v45 = vadd.f32 %v737_v41, %v4762_v12  ;;  %v3524_v46 = vpop.f32.mrf.mxu0 }
 0x492   :  { %3934 = vtanh.f32 %v631_v43  ;;  %v3251_v49 = vmul.f32 -1.442695, %v631_v43 }
 0x493   :  { %3936 = vtanh.f32 %v739_v45  ;;  %v3253_v50 = vmul.f32 -1.442695, %v739_v45 }
 0x494   :  { %3938 = vpow2.f32 %v3251_v49 }
 0x495   :  { %3940 = vpow2.f32 %v3253_v50 }
 0x49f   :  { %v3935_v47 = vpop.eup %3934 }
 0x4a0   :  { %v3937_v48 = vpop.eup %3936  ;;  %643 = vrot.lane.b32.xlu0 %v3935_v47, %s4527_s26 }
 0x4a1   :  { %752 = vrot.lane.b32.xlu1 %v3937_v48, %s4527_s26  ;;  %v3939_v51 = vpop.eup %3938 }
 0x4a2   :  { %v3941_v52 = vpop.eup %3940  ;;  %v637_v53 = vadd.f32 1.0, %v3939_v51 }
 0x4a3   :  { %v743_v54 = vadd.f32 1.0, %v3941_v52 }
 0x4a4   :  { %3942 = vrcp.f32 %v637_v53 }
 0x4a5   :  { %3944 = vrcp.f32 %v743_v54 }
 0x4b1   :  { %v3943_v55 = vpop.eup %3942 }
 0x4b2   :  { %v3945_v57 = vpop.eup %3944  ;;  %v641_v62 = vmul.f32 0.0, %v3943_v55 }
 0x4b3   :  { %v750_v1 = vmul.f32 %v3945_v57, %v748_v61 }
 0x512   :  { %v644_v56 = vpop.permute.xlu0 %643 }
 0x513   :  { %v646_v58 = vmul.f32 %v3943_v55, %v644_v56  ;;  %v753_v59 = vpop.permute.xlu1 %752 }
 0x514   :  { %v755_v60 = vmul.f32 %v3945_v57, %v753_v59 }
 0x515   :  { %648 = vrot.lane.b32.xlu0 %v646_v58, %s4528_s19 }
 0x516   :  { %757 = vrot.lane.b32.xlu1 %v755_v60, %s4528_s19 }
 0x587   :  { %v649_v63 = vpop.permute.xlu0 %648 }
 0x588   :  { %v4860_v3 = vadd.f32 %v649_v63, %v641_v62  ;;  %v758_v4 = vpop.permute.xlu1 %757 }
 0x589   :  { %v4862_v8 = vadd.f32 %v758_v4, %v750_v1 }
 0x58a   :  { %3946 = vtanh.f32 %v4860_v3 }
 0x58b   :  { %3948 = vtanh.f32 %v4862_v8 }
 0x597   :  { %v3947_v9 = vpop.eup %3946 }
 0x598   :  { %v3949_v11 = vpop.eup %3948  ;;  %654 = vrot.lane.b32.xlu0 %v3947_v9, %s4527_s26 }
 0x599   :  { %763 = vrot.lane.b32.xlu1 %v3949_v11, %s4527_s26 }
 0x60a   :  { %v655_v13 = vpop.permute.xlu0 %654 }
 0x60b   :  { %v4868_v14 = vmul.f32 %v3943_v55, %v655_v13  ;;  %v764_v15 = vpop.permute.xlu1 %763 }
 0x60c   :  { %v766_v16 = vmul.f32 %v3945_v57, %v764_v15  ;;  %v966_v57 = vrot.slane %v4862_v8, 6 }
 0x60d   :  { %v771_v17 = vrot.slane %v4868_v14, 6 }
 0x60e   :  { %768 = vrot.lane.b32.xlu0 %v766_v16, %s4528_s19  ;;  %v879_v18 = vrot.slane %v766_v16, 2 }
 0x60f   :  { %772 = vrot.lane.b32.xlu1 %v771_v17, %s4527_s26 }
 0x612   :  { %880 = vrot.lane.b32.xlu0 %v879_v18, %s4528_s19 }
 0x680   :  { %v769_v19 = vpop.permute.xlu0 %768 }
 0x681   :  { %v773_v20 = vpop.permute.xlu1 %772 }
 0x682   :  { %v775_v21 = vsel %vm456_vm2, %v769_v19, %v773_v20 }
 0x683   :  { %v777_v22 = vrot.slane %v775_v21, 2 }
 0x684   :  { %v881_v23 = vpop.permute.xlu0 %880 }
 0x685   :  { %3553 = vmatmul.mubr.msk.f32.vlgmr.msra.gmra.mxu1 %vm560_vm3, %v777_v22 }
 0x686   :  { %3556 = vmatpush3.msra.mxu1 %v4728_v2  ;;  %3563 = vmatprep.mubr.msk.f32.mxu1 %vm4526_vm0, %v4525_v0 }
 0x687   :  { %3557 = vmatprep.subr.mxu1 %v4525_v0 }
 0x688   :  { %3558 = vmatpush3.msra.mxu1 %v4733_v5 }
 0x689   :  { %3559 = vmatprep.subr.mxu1 %v4525_v0 }
 0x68a   :  { %3560 = vmatpush3.msra.mxu1 %v4736_v6 }
 0x68b   :  { %3561 = vmatprep.subr.mxu1 %v4525_v0 }
 0x68c   :  { %3562 = vmatpush3.msra.mxu1 %v4741_v7 }
 0x68d   :  { %3564 = vmatmul.mubr.msk.f32.vlgmr.msra.gmra.mxu1 %vm456_vm2, %v881_v23  ;;  %3585 = vmatprep.subr.mxu1 %v4525_v0 }
 0x68e   :  { %3586 = vmatpush3.msra.mxu1 %v4728_v2  ;;  %3593 = vmatprep.mubr.msk.f32.mxu1 %vm4526_vm0, %v4525_v0 }
 0x68f   :  { %3587 = vmatprep.subr.mxu1 %v4525_v0 }
 0x690   :  { %3588 = vmatpush3.msra.mxu1 %v4733_v5 }
 0x691   :  { %3589 = vmatprep.subr.mxu1 %v4525_v0 }
 0x692   :  { %3590 = vmatpush3.msra.mxu1 %v4736_v6 }
 0x693   :  { %3591 = vmatprep.subr.mxu1 %v4525_v0 }
 0x694   :  { %3592 = vmatpush3.msra.mxu1 %v4741_v7 }
 0x695   :  { %3596 = vmatprep.subr.mxu1 %v4525_v0 }
 0x745   :  { %v846_v24 = vpop.f32.mrf.mxu1 }
 0x746   :  { %v847_v25 = vadd.f32 %v4851_v39, %v846_v24 }
 0x747   :  { %v3554_v32 = vpop.f32.mrf.mxu1 }
 0x748   :  { %3950 = vtanh.f32 %v847_v25  ;;  %v3255_v42 = vmul.f32 -1.442695, %v847_v25 }
 0x74d   :  { %v950_v35 = vpop.f32.mrf.mxu1 }
 0x74e   :  { %v955_v36 = vrot.slane %v950_v35, 4 }
 0x74f   :  { %v3565_v37 = vpop.f32.mrf.mxu1 }
 0x750   :  { %v957_v38 = vadd.f32 %v955_v36, %v4762_v12 }
 0x752   :  { %3952 = vtanh.f32 %v957_v38  ;;  %v3257_v43 = vmul.f32 -1.442695, %v957_v38 }
 0x753   :  { %3954 = vpow2.f32 %v3255_v42 }
 0x754   :  { %3956 = vpow2.f32 %v3257_v43 }
 0x755   :  { %v3951_v40 = vpop.eup %3950 }
 0x756   :  { %859 = vrot.lane.b32.xlu1 %v3951_v40, %s4527_s26 }
 0x75f   :  { %v3953_v41 = vpop.eup %3952 }
 0x760   :  { %970 = vrot.lane.b32.xlu0 %v3953_v41, %s4527_s26  ;;  %v3955_v44 = vpop.eup %3954 }
 0x761   :  { %v853_v45 = vadd.f32 1.0, %v3955_v44  ;;  %v3957_v46 = vpop.eup %3956 }
 0x762   :  { %v961_v47 = vadd.f32 1.0, %v3957_v46 }
 0x763   :  { %3958 = vrcp.f32 %v853_v45 }
 0x764   :  { %3960 = vrcp.f32 %v961_v47 }
 0x770   :  { %v3959_v48 = vpop.eup %3958 }
 0x771   :  { %v3961_v51 = vpop.eup %3960  ;;  %v857_v54 = vmul.f32 %v3959_v48, %v4860_v3 }
 0x772   :  { %v968_v58 = vmul.f32 %v3961_v51, %v966_v57 }
 0x7c8   :  { %v860_v49 = vpop.permute.xlu1 %859 }
 0x7c9   :  { %v862_v50 = vmul.f32 %v3959_v48, %v860_v49 }
 0x7cb   :  { %864 = vrot.lane.b32.xlu1 %v862_v50, %s4528_s19 }
 0x7d2   :  { %v971_v52 = vpop.permute.xlu0 %970 }
 0x7d3   :  { %v973_v53 = vmul.f32 %v3961_v51, %v971_v52 }
 0x7d5   :  { %975 = vrot.lane.b32.xlu0 %v973_v53, %s4528_s19 }
 0x83d   :  { %v865_v55 = vpop.permute.xlu1 %864 }
 0x83e   :  { %v4904_v56 = vadd.f32 %v865_v55, %v857_v54 }
 0x840   :  { %3962 = vtanh.f32 %v4904_v56 }
 0x847   :  { %v976_v59 = vpop.permute.xlu0 %975 }
 0x848   :  { %v4908_v60 = vadd.f32 %v976_v59, %v968_v58 }
 0x84a   :  { %3964 = vtanh.f32 %v4908_v60 }
 0x84d   :  { %v3963_v61 = vpop.eup %3962 }
 0x84e   :  { %870 = vrot.lane.b32.xlu1 %v3963_v61, %s4527_s26 }
 0x857   :  { %v3965_v62 = vpop.eup %3964 }
 0x858   :  { %981 = vrot.lane.b32.xlu0 %v3965_v62, %s4527_s26 }
 0x8c0   :  { %v871_v63 = vpop.permute.xlu1 %870 }
 0x8c1   :  { %v4913_v1 = vmul.f32 %v3959_v48, %v871_v63  ;;  %v1184_v48 = vrot.slane %v4908_v60, 6 }
 0x8c3   :  { %v989_v3 = vrot.slane %v4913_v1, 4 }
 0x8c5   :  { %990 = vrot.lane.b32.xlu0 %v989_v3, %s4527_s26 }
 0x8ca   :  { %v982_v4 = vpop.permute.xlu0 %981 }
 0x8cb   :  { %v984_v8 = vmul.f32 %v3961_v51, %v982_v4 }
 0x8cd   :  { %986 = vrot.lane.b32.xlu1 %v984_v8, %s4528_s19  ;;  %v1097_v9 = vrot.slane %v984_v8, 4 }
 0x8d1   :  { %1098 = vrot.lane.b32.xlu1 %v1097_v9, %s4528_s19 }
 0x937   :  { %v991_v11 = vpop.permute.xlu0 %990 }
 0x93f   :  { %v987_v13 = vpop.permute.xlu1 %986 }
 0x940   :  { %v993_v15 = vsel %vm456_vm2, %v987_v13, %v991_v11 }
 0x941   :  { %v995_v16 = vrot.slane %v993_v15, 4 }
 0x943   :  { %v1099_v17 = vpop.permute.xlu1 %1098  ;;  %3583 = vmatmul.mubr.msk.f32.vlgmr.msra.gmra.mxu0 %vm560_vm3, %v995_v16 }
 0x944   :  { %3594 = vmatmul.mubr.msk.f32.vlgmr.msra.gmra.mxu1 %vm456_vm2, %v1099_v17  ;;  %3616 = vmatpush3.msra.mxu0 %v4728_v2 }
 0x945   :  { %3597 = vmatpush3.msra.mxu1 %v4771_v26  ;;  %3617 = vmatprep.subr.mxu0 %v4525_v0 }
 0x946   :  { %3598 = vmatprep.subr.mxu1 %v4525_v0  ;;  %3618 = vmatpush3.msra.mxu0 %v4733_v5 }
 0x947   :  { %3599 = vmatpush3.msra.mxu1 %v4774_v27  ;;  %3619 = vmatprep.subr.mxu0 %v4525_v0 }
 0x948   :  { %3600 = vmatprep.subr.mxu1 %v4525_v0  ;;  %3620 = vmatpush3.msra.mxu0 %v4736_v6 }
 0x949   :  { %3601 = vmatpush3.msra.mxu1 %v4779_v28  ;;  %3612 = vmatprep.mubr.msk.f32.mxu1 %vm4526_vm0, %v4525_v0 }
 0x94a   :  { %3602 = vmatprep.subr.mxu1 %v4525_v0  ;;  %3621 = vmatprep.subr.mxu0 %v4525_v0 }
 0x94b   :  { %3603 = vmatpush3.msra.mxu1 %v4784_v29  ;;  %3622 = vmatpush3.msra.mxu0 %v4741_v7 }
 0x94c   :  { %3604 = vmatprep.subr.mxu1 %v4525_v0  ;;  %3623 = vmatprep.mubr.msk.f32.mxu0 %vm4526_vm0, %v4525_v0 }
 0x94d   :  { %3605 = vmatpush3.msra.mxu1 %v4789_v30  ;;  %3626 = vmatprep.subr.mxu0 %v4525_v0 }
 0x94e   :  { %3606 = vmatprep.subr.mxu1 %v4525_v0 }
 0x94f   :  { %3607 = vmatpush3.msra.mxu1 %v4794_v31 }
 0x950   :  { %3608 = vmatprep.subr.mxu1 %v4525_v0 }
 0x951   :  { %3609 = vmatpush3.msra.mxu1 %v4799_v33 }
 0x952   :  { %3610 = vmatprep.subr.mxu1 %v4525_v0 }
 0x953   :  { %3611 = vmatpush3.msra.mxu1 %v4807_v34 }
 0x954   :  { %3645 = vmatprep.subr.mxu1 %v4525_v0 }
 0xa03   :  { %v1064_v18 = vpop.f32.mrf.mxu0 }
 0xa04   :  { %v1065_v19 = vadd.f32 %v4851_v39, %v1064_v18  ;;  %v1168_v20 = vpop.f32.mrf.mxu1 }
 0xa05   :  { %v1173_v21 = vrot.slane %v1168_v20, 2  ;;  %v3584_v22 = vpop.f32.mrf.mxu0 }
 0xa06   :  { %3966 = vtanh.f32 %v1065_v19  ;;  %v3595_v23 = vpop.f32.mrf.mxu1  ;;  %v3259_v35 = vmul.f32 -1.442695, %v1065_v19 }
 0xa07   :  { %v1175_v24 = vadd.f32 %v1173_v21, %v4762_v12 }
 0xa09   :  { %3968 = vtanh.f32 %v1175_v24  ;;  %v3261_v36 = vmul.f32 -1.442695, %v1175_v24 }
 0xa0a   :  { %3970 = vpow2.f32 %v3259_v35 }
 0xa0b   :  { %3972 = vpow2.f32 %v3261_v36 }
 0xa13   :  { %v3967_v25 = vpop.eup %3966 }
 0xa14   :  { %1077 = vrot.lane.b32.xlu0 %v3967_v25, %s4527_s26 }
 0xa16   :  { %v3969_v32 = vpop.eup %3968 }
 0xa17   :  { %1188 = vrot.lane.b32.xlu1 %v3969_v32, %s4527_s26  ;;  %v3971_v37 = vpop.eup %3970 }
 0xa18   :  { %v3973_v38 = vpop.eup %3972  ;;  %v1071_v40 = vadd.f32 1.0, %v3971_v37 }
 0xa19   :  { %v1179_v41 = vadd.f32 1.0, %v3973_v38 }
 0xa1a   :  { %3974 = vrcp.f32 %v1071_v40 }
 0xa1b   :  { %3976 = vrcp.f32 %v1179_v41 }
 0xa27   :  { %v3975_v42 = vpop.eup %3974 }
 0xa28   :  { %v3977_v44 = vpop.eup %3976  ;;  %v1075_v47 = vmul.f32 %v3975_v42, %v4904_v56 }
 0xa29   :  { %v1186_v51 = vmul.f32 %v3977_v44, %v1184_v48 }
 0xa86   :  { %v1078_v43 = vpop.permute.xlu0 %1077 }
 0xa87   :  { %v1080_v12 = vmul.f32 %v3975_v42, %v1078_v43 }
 0xa89   :  { %v1189_v45 = vpop.permute.xlu1 %1188  ;;  %1082 = vrot.lane.b32.xlu0 %v1080_v12, %s4528_s19 }
 0xa8a   :  { %v1191_v46 = vmul.f32 %v3977_v44, %v1189_v45 }
 0xa8c   :  { %1193 = vrot.lane.b32.xlu1 %v1191_v46, %s4528_s19 }
 0xafb   :  { %v1083_v49 = vpop.permute.xlu0 %1082 }
 0xafc   :  { %v4958_v50 = vadd.f32 %v1083_v49, %v1075_v47 }
 0xafe   :  { %3978 = vtanh.f32 %v4958_v50  ;;  %v1194_v52 = vpop.permute.xlu1 %1193 }
 0xaff   :  { %v4961_v53 = vadd.f32 %v1194_v52, %v1186_v51 }
 0xb01   :  { %3980 = vtanh.f32 %v4961_v53  ;;  %v1399_v41 = vrot.slane %v4961_v53, 6 }
 0xb0b   :  { %v3979_v54 = vpop.eup %3978 }
 0xb0c   :  { %1088 = vrot.lane.b32.xlu0 %v3979_v54, %s4527_s26 }
 0xb0e   :  { %v3981_v55 = vpop.eup %3980 }
 0xb0f   :  { %1199 = vrot.lane.b32.xlu1 %v3981_v55, %s4527_s26 }
 0xb7e   :  { %v1089_v56 = vpop.permute.xlu0 %1088 }
 0xb7f   :  { %v4966_v57 = vmul.f32 %v3975_v42, %v1089_v56 }
 0xb81   :  { %v1207_v58 = vrot.slane %v4966_v57, 2  ;;  %v1200_v59 = vpop.permute.xlu1 %1199 }
 0xb82   :  { %v1202_v60 = vmul.f32 %v3977_v44, %v1200_v59 }
 0xb83   :  { %1208 = vrot.lane.b32.xlu1 %v1207_v58, %s4527_s26 }
 0xb84   :  { %1204 = vrot.lane.b32.xlu0 %v1202_v60, %s4528_s19  ;;  %v1315_v61 = vrot.slane %v1202_v60, 6 }
 0xb88   :  { %1316 = vrot.lane.b32.xlu0 %v1315_v61, %s4528_s19 }
 0xbf5   :  { %v1209_v62 = vpop.permute.xlu1 %1208 }
 0xbf6   :  { %v1205_v63 = vpop.permute.xlu0 %1204 }
 0xbf7   :  { %v1211_v3 = vsel %vm456_vm2, %v1205_v63, %v1209_v62 }
 0xbf8   :  { %v1213_v4 = vrot.slane %v1211_v3, 6 }
 0xbfa   :  { %3613 = vmatmul.mubr.msk.f32.vlgmr.msra.gmra.mxu1 %vm560_vm3, %v1213_v4  ;;  %v1317_v8 = vpop.permute.xlu0 %1316 }
 0xbfb   :  { %3624 = vmatmul.mubr.msk.f32.vlgmr.msra.gmra.mxu0 %vm456_vm2, %v1317_v8  ;;  %3646 = vmatpush3.msra.mxu1 %v4728_v2 }
 0xbfc   :  { %3627 = vmatpush3.msra.mxu0 %v4771_v26  ;;  %3647 = vmatprep.subr.mxu1 %v4525_v0 }
 0xbfd   :  { %3628 = vmatprep.subr.mxu0 %v4525_v0  ;;  %3648 = vmatpush3.msra.mxu1 %v4733_v5 }
 0xbfe   :  { %3629 = vmatpush3.msra.mxu0 %v4774_v27  ;;  %3649 = vmatprep.subr.mxu1 %v4525_v0 }
 0xbff   :  { %3630 = vmatprep.subr.mxu0 %v4525_v0  ;;  %3650 = vmatpush3.msra.mxu1 %v4736_v6 }
 0xc00   :  { %3631 = vmatpush3.msra.mxu0 %v4779_v28  ;;  %3651 = vmatprep.subr.mxu1 %v4525_v0 }
 0xc01   :  { %3632 = vmatprep.subr.mxu0 %v4525_v0  ;;  %3652 = vmatpush3.msra.mxu1 %v4741_v7 }
 0xc02   :  { %3633 = vmatpush3.msra.mxu0 %v4784_v29  ;;  %3653 = vmatprep.mubr.msk.f32.mxu1 %vm4526_vm0, %v4525_v0 }
 0xc03   :  { %3634 = vmatprep.subr.mxu0 %v4525_v0  ;;  %3642 = vmatprep.mubr.msk.f32.mxu0 %vm4526_vm0, %v4525_v0 }
 0xc04   :  { %3635 = vmatpush3.msra.mxu0 %v4789_v30  ;;  %3656 = vmatprep.subr.mxu1 %v4525_v0 }
 0xc05   :  { %3636 = vmatprep.subr.mxu0 %v4525_v0 }
 0xc06   :  { %3637 = vmatpush3.msra.mxu0 %v4794_v31 }
 0xc07   :  { %3638 = vmatprep.subr.mxu0 %v4525_v0 }
 0xc08   :  { %3639 = vmatpush3.msra.mxu0 %v4799_v33 }
 0xc09   :  { %3640 = vmatprep.subr.mxu0 %v4525_v0 }
 0xc0a   :  { %3641 = vmatpush3.msra.mxu0 %v4807_v34 }
 0xc0b   :  { %3675 = vmatprep.subr.mxu0 %v4525_v0 }
 0xcba   :  { %v1282_v9 = vpop.f32.mrf.mxu1 }
 0xcbb   :  { %v1283_v11 = vadd.f32 %v4851_v39, %v1282_v9  ;;  %v1386_v13 = vpop.f32.mrf.mxu0 }
 0xcbc   :  { %v1390_v15 = vadd.f32 %v1386_v13, %v4760_v10  ;;  %v3614_v16 = vpop.f32.mrf.mxu1 }
 0xcbd   :  { %3982 = vtanh.f32 %v1283_v11  ;;  %v3625_v17 = vpop.f32.mrf.mxu0  ;;  %v3263_v20 = vmul.f32 -1.442695, %v1283_v11 }
 0xcbe   :  { %3984 = vtanh.f32 %v1390_v15  ;;  %v3265_v21 = vmul.f32 -1.442695, %v1390_v15 }
 0xcbf   :  { %3986 = vpow2.f32 %v3263_v20 }
 0xcc0   :  { %3988 = vpow2.f32 %v3265_v21 }
 0xcca   :  { %v3983_v18 = vpop.eup %3982 }
 0xccb   :  { %v3985_v19 = vpop.eup %3984  ;;  %1295 = vrot.lane.b32.xlu1 %v3983_v18, %s4527_s26 }
 0xccc   :  { %1403 = vrot.lane.b32.xlu0 %v3985_v19, %s4527_s26  ;;  %v3987_v22 = vpop.eup %3986 }
 0xccd   :  { %v3989_v23 = vpop.eup %3988  ;;  %v1289_v24 = vadd.f32 1.0, %v3987_v22 }
 0xcce   :  { %v1394_v25 = vadd.f32 1.0, %v3989_v23 }
 0xccf   :  { %3990 = vrcp.f32 %v1289_v24 }
 0xcd0   :  { %3992 = vrcp.f32 %v1394_v25 }
 0xcdc   :  { %v3991_v32 = vpop.eup %3990 }
 0xcdd   :  { %v3993_v36 = vpop.eup %3992  ;;  %v1293_v42 = vmul.f32 %v3991_v32, %v4958_v50 }
 0xcde   :  { %v1401_v12 = vmul.f32 %v3993_v36, %v1399_v41 }
 0xd3d   :  { %v1296_v35 = vpop.permute.xlu1 %1295 }
 0xd3e   :  { %v1298_v37 = vmul.f32 %v3991_v32, %v1296_v35  ;;  %v1404_v38 = vpop.permute.xlu0 %1403 }
 0xd3f   :  { %v1406_v40 = vmul.f32 %v3993_v36, %v1404_v38 }
 0xd40   :  { %1300 = vrot.lane.b32.xlu1 %v1298_v37, %s4528_s19 }
 0xd41   :  { %1408 = vrot.lane.b32.xlu0 %v1406_v40, %s4528_s19 }
 0xdb2   :  { %v1301_v43 = vpop.permute.xlu1 %1300 }
 0xdb3   :  { %v5011_v44 = vadd.f32 %v1301_v43, %v1293_v42  ;;  %v1409_v45 = vpop.permute.xlu0 %1408 }
 0xdb4   :  { %v5013_v46 = vadd.f32 %v1409_v45, %v1401_v12 }
 0xdb5   :  { %3994 = vtanh.f32 %v5011_v44 }
 0xdb6   :  { %3996 = vtanh.f32 %v5013_v46  ;;  %v1612_v19 = vrot.slane %v5013_v46, 6 }
 0xdc2   :  { %v3995_v47 = vpop.eup %3994 }
 0xdc3   :  { %v3997_v48 = vpop.eup %3996  ;;  %1306 = vrot.lane.b32.xlu1 %v3995_v47, %s4527_s26  ;;  %v4060_v47 = vld [vmem:[#allocation3 + $0x18] sm:$0xff] }
 0xdc4   :  { %1414 = vrot.lane.b32.xlu0 %v3997_v48, %s4527_s26  ;;  %v4061_v48 = vld [vmem:[#allocation3 + $0x10] sm:$0xff] }
 0xe35   :  { %v1307_v49 = vpop.permute.xlu1 %1306 }
 0xe36   :  { %v5019_v51 = vmul.f32 %v3991_v32, %v1307_v49  ;;  %v1415_v50 = vpop.permute.xlu0 %1414  ;;  %v4062_v49 = vld [vmem:[#allocation3 + $0x8] sm:$0xff] }
 0xe37   :  { %v1417_v52 = vmul.f32 %v3993_v36, %v1415_v50 }
 0xe38   :  { %1422 = vrot.lane.b32.xlu0 %v5019_v51, %s4527_s26 }
 0xe39   :  { %1419 = vrot.lane.b32.xlu1 %v1417_v52, %s4528_s19 }
 0xeaa   :  { %v1423_v53 = vpop.permute.xlu0 %1422 }
 0xeab   :  { %v1420_v54 = vpop.permute.xlu1 %1419 }
 0xeac   :  { %v1425_v55 = vsel %vm456_vm2, %v1420_v54, %v1423_v53  ;;  %3654 = vmatmul.mubr.msk.f32.vlgmr.msra.gmra.mxu1 %vm456_vm2, %v1420_v54 }
 0xead   :  { %3643 = vmatmul.mubr.msk.f32.vlgmr.msra.gmra.mxu0 %vm560_vm3, %v1425_v55  ;;  %3657 = vmatpush3.msra.mxu1 %v4771_v26 }
 0xeae   :  { %3658 = vmatprep.subr.mxu1 %v4525_v0  ;;  %3676 = vmatpush3.msra.mxu0 %v4728_v2 }
 0xeaf   :  { %3659 = vmatpush3.msra.mxu1 %v4774_v27  ;;  %3677 = vmatprep.subr.mxu0 %v4525_v0 }
 0xeb0   :  { %3660 = vmatprep.subr.mxu1 %v4525_v0  ;;  %3678 = vmatpush3.msra.mxu0 %v4733_v5 }
 0xeb1   :  { %3661 = vmatpush3.msra.mxu1 %v4779_v28  ;;  %3679 = vmatprep.subr.mxu0 %v4525_v0 }
 0xeb2   :  { %3662 = vmatprep.subr.mxu1 %v4525_v0  ;;  %3680 = vmatpush3.msra.mxu0 %v4736_v6 }
 0xeb3   :  { %3663 = vmatpush3.msra.mxu1 %v4784_v29  ;;  %3681 = vmatprep.subr.mxu0 %v4525_v0 }
 0xeb4   :  { %3664 = vmatprep.subr.mxu1 %v4525_v0  ;;  %3672 = vmatprep.mubr.msk.f32.mxu1 %vm4526_vm0, %v4525_v0 }
 0xeb5   :  { %3665 = vmatpush3.msra.mxu1 %v4789_v30  ;;  %3682 = vmatpush3.msra.mxu0 %v4741_v7 }
 0xeb6   :  { %3666 = vmatprep.subr.mxu1 %v4525_v0  ;;  %3683 = vmatprep.mubr.msk.f32.mxu0 %vm4526_vm0, %v4525_v0 }
 0xeb7   :  { %3667 = vmatpush3.msra.mxu1 %v4794_v31  ;;  %3686 = vmatprep.subr.mxu0 %v4525_v0 }
 0xeb8   :  { %3668 = vmatprep.subr.mxu1 %v4525_v0 }
 0xeb9   :  { %3669 = vmatpush3.msra.mxu1 %v4799_v33 }
 0xeba   :  { %3670 = vmatprep.subr.mxu1 %v4525_v0 }
 0xebb   :  { %3671 = vmatpush3.msra.mxu1 %v4807_v34 }
 0xebc   :  { %3705 = vmatprep.subr.mxu1 %v4525_v0 }
 0xf6c   :  { %v1596_v2 = vpop.f32.mrf.mxu1 }
 0xf6d   :  { %v1601_v5 = vrot.slane %v1596_v2, 6  ;;  %v1495_v6 = vpop.f32.mrf.mxu0 }
 0xf6e   :  { %v1496_v7 = vadd.f32 %v4851_v39, %v1495_v6  ;;  %v3655_v56 = vpop.f32.mrf.mxu1 }
 0xf6f   :  { %v1603_v58 = vadd.f32 %v1601_v5, %v4760_v10  ;;  %v3644_v59 = vpop.f32.mrf.mxu0 }
 0xf70   :  { %3998 = vtanh.f32 %v1496_v7  ;;  %v3267_v62 = vmul.f32 -1.442695, %v1496_v7 }
 0xf71   :  { %4000 = vtanh.f32 %v1603_v58  ;;  %v3269_v63 = vmul.f32 -1.442695, %v1603_v58 }
 0xf72   :  { %4002 = vpow2.f32 %v3267_v62 }
 0xf73   :  { %4004 = vpow2.f32 %v3269_v63 }
 0xf7d   :  { %v3999_v60 = vpop.eup %3998 }
 0xf7e   :  { %v4001_v61 = vpop.eup %4000  ;;  %1508 = vrot.lane.b32.xlu1 %v3999_v60, %s4527_s26 }
 0xf7f   :  { %1616 = vrot.lane.b32.xlu0 %v4001_v61, %s4527_s26  ;;  %v4003_v3 = vpop.eup %4002 }
 0xf80   :  { %v4005_v4 = vpop.eup %4004  ;;  %v1502_v8 = vadd.f32 1.0, %v4003_v3 }
 0xf81   :  { %v1607_v9 = vadd.f32 1.0, %v4005_v4 }
 0xf82   :  { %4006 = vrcp.f32 %v1502_v8 }
 0xf83   :  { %4008 = vrcp.f32 %v1607_v9 }
 0xf8f   :  { %v4007_v11 = vpop.eup %4006 }
 0xf90   :  { %v4009_v15 = vpop.eup %4008  ;;  %v1506_v20 = vmul.f32 %v4007_v11, %v5011_v44 }
 0xf91   :  { %v1614_v22 = vmul.f32 %v4009_v15, %v1612_v19 }
 0xff0   :  { %v1509_v13 = vpop.permute.xlu1 %1508 }
 0xff1   :  { %v1511_v16 = vmul.f32 %v4007_v11, %v1509_v13  ;;  %v1617_v17 = vpop.permute.xlu0 %1616 }
 0xff2   :  { %v1619_v18 = vmul.f32 %v4009_v15, %v1617_v17 }
 0xff3   :  { %1513 = vrot.lane.b32.xlu1 %v1511_v16, %s4528_s19 }
 0xff4   :  { %1621 = vrot.lane.b32.xlu0 %v1619_v18, %s4528_s19 }
0x1065   :  { %v1514_v21 = vpop.permute.xlu1 %1513 }
0x1066   :  { %v5063_v23 = vadd.f32 %v1514_v21, %v1506_v20  ;;  %v1622_v24 = vpop.permute.xlu0 %1621 }
0x1067   :  { %v5065_v25 = vadd.f32 %v1622_v24, %v1614_v22 }
0x1068   :  { %4010 = vtanh.f32 %v5063_v23 }
0x1069   :  { %4012 = vtanh.f32 %v5065_v25  ;;  %v1830_v63 = vrot.slane %v5065_v25, 6 }
0x1075   :  { %v4011_v32 = vpop.eup %4010 }
0x1076   :  { %v4013_v35 = vpop.eup %4012  ;;  %1519 = vrot.lane.b32.xlu1 %v4011_v32, %s4527_s26 }
0x1077   :  { %1627 = vrot.lane.b32.xlu0 %v4013_v35, %s4527_s26  ;;  %v4064_v35 = vld [vmem:[%s5327_s28 + $0x38] sm:$0xff] }
0x10e8   :  { %v1520_v36 = vpop.permute.xlu1 %1519 }
0x10e9   :  { %v5071_v37 = vmul.f32 %v4007_v11, %v1520_v36  ;;  %v1628_v38 = vpop.permute.xlu0 %1627  ;;  %v4065_v36 = vld [vmem:[%s5327_s28 + $0x30] sm:$0xff] }
0x10ea   :  { %v1630_v40 = vmul.f32 %v4009_v15, %v1628_v38  ;;  %v4066_v38 = vld [vmem:[%s5327_s28 + $0x28] sm:$0xff] }
0x10eb   :  { %v1635_v41 = vrot.slane %v5071_v37, 6 }
0x10ec   :  { %1632 = vrot.lane.b32.xlu1 %v1630_v40, %s4528_s19  ;;  %v1743_v42 = vrot.slane %v1630_v40, 2  ;;  %v4067_v40 = vld [vmem:[%s5327_s28 + $0x20] sm:$0xff] }
0x10ed   :  { %1636 = vrot.lane.b32.xlu0 %v1635_v41, %s4527_s26  ;;  %v4068_v41 = vld [vmem:[%s5327_s28 + $0x18] sm:$0xff] }
0x10f0   :  { %1744 = vrot.lane.b32.xlu1 %v1743_v42, %s4528_s19  ;;  %v4069_v42 = vld [vmem:[%s5327_s28 + $0x10] sm:$0xff] }
0x115e   :  { %v1633_v43 = vpop.permute.xlu1 %1632 }
0x115f   :  { %v1637_v12 = vpop.permute.xlu0 %1636 }
0x1160   :  { %v1639_v44 = vsel %vm456_vm2, %v1633_v43, %v1637_v12  ;;  %v4070_v43 = vld [vmem:[%s5327_s28 + $0x8] sm:$0xff]  ;;  %v4071_v12 = vld [vmem:[%s5327_s28] sm:$0xff] }
0x1161   :  { %v1641_v45 = vrot.slane %v1639_v44, 2 }
0x1162   :  { %v1745_v46 = vpop.permute.xlu1 %1744 }
0x1163   :  { %3673 = vmatmul.mubr.msk.f32.vlgmr.msra.gmra.mxu1 %vm560_vm3, %v1641_v45  ;;  %3684 = vmatmul.mubr.msk.f32.vlgmr.msra.gmra.mxu0 %vm456_vm2, %v1745_v46 }
0x1164   :  { %3687 = vmatpush3.msra.mxu0 %v4771_v26  ;;  %3706 = vmatpush3.msra.mxu1 %v4060_v47  ;;  %v4063_v26 = vld [vmem:[#allocation3] sm:$0xff] }
0x1165   :  { %3688 = vmatprep.subr.mxu0 %v4525_v0  ;;  %3707 = vmatprep.subr.mxu1 %v4525_v0 }
0x1166   :  { %3689 = vmatpush3.msra.mxu0 %v4774_v27  ;;  %3708 = vmatpush3.msra.mxu1 %v4061_v48 }
0x1167   :  { %3690 = vmatprep.subr.mxu0 %v4525_v0  ;;  %3709 = vmatprep.subr.mxu1 %v4525_v0 }
0x1168   :  { %3691 = vmatpush3.msra.mxu0 %v4779_v28  ;;  %3710 = vmatpush3.msra.mxu1 %v4062_v49 }
0x1169   :  { %3692 = vmatprep.subr.mxu0 %v4525_v0  ;;  %3702 = vmatprep.mubr.msk.f32.mxu0 %vm4526_vm0, %v4525_v0 }
0x116a   :  { %3693 = vmatpush3.msra.mxu0 %v4784_v29  ;;  %3711 = vmatprep.subr.mxu1 %v4525_v0 }
0x116b   :  { %3694 = vmatprep.subr.mxu0 %v4525_v0  ;;  %3712 = vmatpush3.msra.mxu1 %v4063_v26 }
0x116c   :  { %3695 = vmatpush3.msra.mxu0 %v4789_v30  ;;  %3713 = vmatprep.mubr.msk.f32.mxu1 %vm4526_vm0, %v4525_v0 }
0x116d   :  { %3696 = vmatprep.subr.mxu0 %v4525_v0  ;;  %3716 = vmatprep.subr.mxu1 %v4525_v0 }
0x116e   :  { %3697 = vmatpush3.msra.mxu0 %v4794_v31 }
0x116f   :  { %3698 = vmatprep.subr.mxu0 %v4525_v0 }
0x1170   :  { %3699 = vmatpush3.msra.mxu0 %v4799_v33 }
0x1171   :  { %3700 = vmatprep.subr.mxu0 %v4525_v0 }
0x1172   :  { %3701 = vmatpush3.msra.mxu0 %v4807_v34 }
0x1223   :  { %v1710_v27 = vpop.f32.mrf.mxu1  ;;  %v1814_v28 = vpop.f32.mrf.mxu0 }
0x1224   :  { %v1711_v29 = vadd.f32 %v4851_v39, %v1710_v27  ;;  %v1819_v30 = vrot.slane %v1814_v28, 4 }
0x1225   :  { %v3674_v50 = vpop.f32.mrf.mxu1  ;;  %v3685_v52 = vpop.f32.mrf.mxu0 }
0x1226   :  { %4014 = vtanh.f32 %v1711_v29  ;;  %v1821_v53 = vadd.f32 %v1819_v30, %v4760_v10  ;;  %v3271_v33 = vmul.f32 -1.442695, %v1711_v29 }
0x1228   :  { %4016 = vtanh.f32 %v1821_v53  ;;  %v3273_v55 = vmul.f32 -1.442695, %v1821_v53 }
0x1229   :  { %4018 = vpow2.f32 %v3271_v33 }
0x122a   :  { %4020 = vpow2.f32 %v3273_v55 }
0x1233   :  { %v4015_v31 = vpop.eup %4014 }
0x1234   :  { %1723 = vrot.lane.b32.xlu0 %v4015_v31, %s4527_s26 }
0x1235   :  { %v4017_v54 = vpop.eup %4016 }
0x1236   :  { %1834 = vrot.lane.b32.xlu1 %v4017_v54, %s4527_s26  ;;  %v4019_v34 = vpop.eup %4018 }
0x1237   :  { %v4021_v2 = vpop.eup %4020  ;;  %v1717_v5 = vadd.f32 1.0, %v4019_v34 }
0x1238   :  { %v1825_v6 = vadd.f32 1.0, %v4021_v2 }
0x1239   :  { %4022 = vrcp.f32 %v1717_v5 }
0x123a   :  { %4024 = vrcp.f32 %v1825_v6 }
0x1246   :  { %v4023_v7 = vpop.eup %4022 }
0x1247   :  { %v4025_v59 = vpop.eup %4024  ;;  %v1721_v62 = vmul.f32 %v4023_v7, %v5063_v23 }
0x1248   :  { %v1832_v8 = vmul.f32 %v4025_v59, %v1830_v63 }
0x12a6   :  { %v1724_v56 = vpop.permute.xlu0 %1723 }
0x12a7   :  { %v1726_v58 = vmul.f32 %v4023_v7, %v1724_v56 }
0x12a8   :  { %v1835_v60 = vpop.permute.xlu1 %1834 }
0x12a9   :  { %1728 = vrot.lane.b32.xlu0 %v1726_v58, %s4528_s19  ;;  %v1837_v61 = vmul.f32 %v4025_v59, %v1835_v60 }
0x12ab   :  { %1839 = vrot.lane.b32.xlu1 %v1837_v61, %s4528_s19 }
0x131b   :  { %v1729_v3 = vpop.permute.xlu0 %1728 }
0x131c   :  { %v5111_v4 = vadd.f32 %v1729_v3, %v1721_v62 }
0x131d   :  { %v1840_v9 = vpop.permute.xlu1 %1839 }
0x131e   :  { %4026 = vtanh.f32 %v5111_v4  ;;  %v5114_v11 = vadd.f32 %v1840_v9, %v1832_v8 }
0x1320   :  { %4028 = vtanh.f32 %v5114_v11  ;;  %v2048_v5 = vrot.slane %v5114_v11, 6 }
0x132b   :  { %v4027_v13 = vpop.eup %4026 }
0x132c   :  { %1734 = vrot.lane.b32.xlu0 %v4027_v13, %s4527_s26 }
0x132d   :  { %v4029_v15 = vpop.eup %4028 }
0x132e   :  { %1845 = vrot.lane.b32.xlu1 %v4029_v15, %s4527_s26 }
0x139e   :  { %v1735_v16 = vpop.permute.xlu0 %1734 }
0x139f   :  { %v5119_v17 = vmul.f32 %v4023_v7, %v1735_v16 }
0x13a0   :  { %v1846_v19 = vpop.permute.xlu1 %1845 }
0x13a1   :  { %v1853_v18 = vrot.slane %v5119_v17, 4  ;;  %v1848_v20 = vmul.f32 %v4025_v59, %v1846_v19 }
0x13a3   :  { %1854 = vrot.lane.b32.xlu1 %v1853_v18, %s4527_s26  ;;  %1850 = vrot.lane.b32.xlu0 %v1848_v20, %s4528_s19  ;;  %v1961_v21 = vrot.slane %v1848_v20, 4  ;;  %v4072_v18 = vld [vmem:[#allocation8] ss:$0 sm:$0xff] }
0x13a7   :  { %1962 = vrot.lane.b32.xlu0 %v1961_v21, %s4528_s19 }
0x1415   :  { %v1855_v22 = vpop.permute.xlu1 %1854  ;;  %v1851_v23 = vpop.permute.xlu0 %1850 }
0x1416   :  { %v1857_v24 = vsel %vm456_vm2, %v1851_v23, %v1855_v22 }
0x1417   :  { %v1859_v25 = vrot.slane %v1857_v24, 4 }
0x1419   :  { %v1963_v32 = vpop.permute.xlu0 %1962  ;;  %3703 = vmatmul.mubr.msk.f32.vlgmr.msra.gmra.mxu0 %vm560_vm3, %v1859_v25 }
0x141a   :  { %3714 = vmatmul.mubr.msk.f32.vlgmr.msra.gmra.mxu1 %vm456_vm2, %v1963_v32 }
0x141b   :  { %3717 = vmatpush3.msra.mxu1 %v4064_v35  ;;  %3732 = vmatprep.mubr.msk.f32.mxu1 %vm4526_vm0, %v4525_v0 }
0x141c   :  { %3718 = vmatprep.subr.mxu1 %v4525_v0 }
0x141d   :  { %3719 = vmatpush3.msra.mxu1 %v4065_v36 }
0x141e   :  { %3720 = vmatprep.subr.mxu1 %v4525_v0 }
0x141f   :  { %3721 = vmatpush3.msra.mxu1 %v4066_v38 }
0x1420   :  { %3722 = vmatprep.subr.mxu1 %v4525_v0 }
0x1421   :  { %3723 = vmatpush3.msra.mxu1 %v4067_v40 }
0x1422   :  { %3724 = vmatprep.subr.mxu1 %v4525_v0 }
0x1423   :  { %3725 = vmatpush3.msra.mxu1 %v4068_v41 }
0x1424   :  { %3726 = vmatprep.subr.mxu1 %v4525_v0 }
0x1425   :  { %3727 = vmatpush3.msra.mxu1 %v4069_v42 }
0x1426   :  { %3728 = vmatprep.subr.mxu1 %v4525_v0 }
0x1427   :  { %3729 = vmatpush3.msra.mxu1 %v4070_v43 }
0x1428   :  { %3730 = vmatprep.subr.mxu1 %v4525_v0 }
0x1429   :  { %3731 = vmatpush3.msra.mxu1 %v4071_v12  ;;  %v2183_v12 = vld [vmem:[#allocation9 + $0x10] sm:$0xff] }
0x14d9   :  { %v1928_v44 = vpop.f32.mrf.mxu0 }
0x14da   :  { %v1929_v45 = vadd.f32 %v4851_v39, %v1928_v44  ;;  %v2032_v46 = vpop.f32.mrf.mxu1  ;;  %v2182_v44 = vld [vmem:[#allocation9 + $0x8] sm:$0xff] }
0x14db   :  { %v2037_v47 = vrot.slane %v2032_v46, 2  ;;  %v3704_v48 = vpop.f32.mrf.mxu0 }
0x14dc   :  { %4030 = vtanh.f32 %v1929_v45  ;;  %v3715_v49 = vpop.f32.mrf.mxu1  ;;  %v3275_v29 = vmul.f32 -1.442695, %v1929_v45  ;;  %v2181_v45 = vld [vmem:[#allocation9] sm:$0xff] }
0x14dd   :  { %v2039_v26 = vadd.f32 %v2037_v47, %v4760_v10 }
0x14df   :  { %4032 = vtanh.f32 %v2039_v26  ;;  %v3277_v30 = vmul.f32 -1.442695, %v2039_v26 }
0x14e0   :  { %4034 = vpow2.f32 %v3275_v29 }
0x14e1   :  { %4036 = vpow2.f32 %v3277_v30 }
0x14e9   :  { %v4031_v27 = vpop.eup %4030 }
0x14ea   :  { %1941 = vrot.lane.b32.xlu1 %v4031_v27, %s4527_s26  ;;  %v3280_v27 = vld [vmem:[#allocation11] ss:$0 sm:$0xff] }
0x14ec   :  { %v4033_v28 = vpop.eup %4032 }
0x14ed   :  { %2052 = vrot.lane.b32.xlu0 %v4033_v28, %s4527_s26  ;;  %v4035_v50 = vpop.eup %4034 }
0x14ee   :  { %v4037_v39 = vpop.eup %4036  ;;  %v1935_v52 = vadd.f32 1.0, %v4035_v50 }
0x14ef   :  { %v2043_v53 = vadd.f32 1.0, %v4037_v39 }
0x14f0   :  { %4038 = vrcp.f32 %v1935_v52 }
0x14f1   :  { %4040 = vrcp.f32 %v2043_v53 }
0x14fd   :  { %v4039_v31 = vpop.eup %4038 }
0x14fe   :  { %v4041_v33 = vpop.eup %4040  ;;  %v1939_v2 = vmul.f32 %v4039_v31, %v5111_v4 }
0x14ff   :  { %v2050_v56 = vmul.f32 %v4041_v33, %v2048_v5 }
0x155c   :  { %v1942_v54 = vpop.permute.xlu1 %1941 }
0x155d   :  { %v1944_v10 = vmul.f32 %v4039_v31, %v1942_v54 }
0x155f   :  { %v2053_v55 = vpop.permute.xlu0 %2052  ;;  %1946 = vrot.lane.b32.xlu1 %v1944_v10, %s4528_s19 }
0x1560   :  { %v2055_v34 = vmul.f32 %v4041_v33, %v2053_v55 }
0x1562   :  { %2057 = vrot.lane.b32.xlu0 %v2055_v34, %s4528_s19 }
0x15d1   :  { %v1947_v6 = vpop.permute.xlu1 %1946 }
0x15d2   :  { %v1949_v7 = vadd.f32 %v1947_v6, %v1939_v2 }
0x15d4   :  { %4042 = vtanh.f32 %v1949_v7  ;;  %v2058_v58 = vpop.permute.xlu0 %2057 }
0x15d5   :  { %v2060_v59 = vadd.f32 %v2058_v58, %v2050_v56  ;;  %v2280_v58 = vld [vmem:[#allocation15 + $0x18] sm:$0xff] }
0x15d7   :  { %4044 = vtanh.f32 %v2060_v59  ;;  %v2279_v59 = vld [vmem:[#allocation15 + $0x10] sm:$0xff] }
0x15e1   :  { %v4043_v60 = vpop.eup %4042 }
0x15e2   :  { %1952 = vrot.lane.b32.xlu1 %v4043_v60, %s4527_s26  ;;  %v2278_v60 = vld [vmem:[#allocation15 + $0x8] sm:$0xff] }
0x15e4   :  { %v4045_v61 = vpop.eup %4044 }
0x15e5   :  { %2063 = vrot.lane.b32.xlu0 %v4045_v61, %s4527_s26  ;;  %v2277_v61 = vld [vmem:[#allocation15] sm:$0xff] }
0x1654   :  { %v1953_v62 = vpop.permute.xlu1 %1952 }
0x1655   :  { %v1955_v63 = vmul.f32 %v4039_v31, %v1953_v62 }
0x1657   :  { %v2071_v3 = vrot.slane %v1955_v63, 2  ;;  %v2064_v8 = vpop.permute.xlu0 %2063 }
0x1658   :  { %v2066_v4 = vmul.f32 %v4041_v33, %v2064_v8 }
0x1659   :  { %2072 = vrot.lane.b32.xlu0 %v2071_v3, %s4527_s26 }
0x165a   :  { %2068 = vrot.lane.b32.xlu1 %v2066_v4, %s4528_s19 }
0x16cb   :  { %v2073_v9 = vpop.permute.xlu0 %2072 }
0x16cc   :  { %v2069_v11 = vpop.permute.xlu1 %2068 }
0x16cd   :  { %v2075_v13 = vsel %vm456_vm2, %v2069_v11, %v2073_v9 }
0x16ce   :  { %v2077_v15 = vrot.slane %v2075_v13, 6  ;;  %v3283_v13 = vld [vmem:[#allocation12] ss:$0 sm:$0xff] }
0x16d0   :  { %3733 = vmatmul.mubr.msk.f32.vlgmr.msra.gmra.mxu1 %vm560_vm3, %v2077_v15 }
0x1790   :  { %v2146_v16 = vpop.f32.mrf.mxu1 }
0x1791   :  { %v2147_v19 = vadd.f32 %v4072_v18, %v2146_v16  ;;  %v3284_v16 = vld [vmem:[#allocation14] ss:$0 sm:$0xff] }
0x1792   :  { %v3734_v20 = vpop.f32.mrf.mxu1 }
0x1793   :  { %4046 = vtanh.f32 %v2147_v19  ;;  %v3279_v22 = vmul.f32 -1.442695, %v2147_v19 }
0x1795   :  { %4048 = vpow2.f32 %v3279_v22 }
0x17a0   :  { %v4047_v21 = vpop.eup %4046 }
0x17a1   :  { %2159 = vrot.lane.b32.xlu1 %v4047_v21, %s4527_s26 }
0x17a2   :  { %v4049_v23 = vpop.eup %4048 }
0x17a3   :  { %v2153_v24 = vadd.f32 1.0, %v4049_v23 }
0x17a5   :  { %4050 = vrcp.f32 %v2153_v24  ;;  %v2285_v24 = vld [vmem:[#allocation18 + $0x18] sm:$0xff] }
0x17a6   :  { %3757 = vmatprep.subr.mxu1 %v2285_v24 }
0x17a7   :  { %3758 = vmatpush3.msra.mxu1 %v2285_v24 }
0x17b2   :  { %v4051_v25 = vpop.eup %4050 }
0x17b3   :  { %v2157_v36 = vmul.f32 %v4051_v25, %v1949_v7 }
0x1813   :  { %v2160_v32 = vpop.permute.xlu1 %2159 }
0x1814   :  { %v2162_v35 = vmul.f32 %v4051_v25, %v2160_v32  ;;  %v2283_v32 = vld [vmem:[#allocation18 + $0x8] sm:$0xff] }
0x1816   :  { %2164 = vrot.lane.b32.xlu0 %v2162_v35, %s4528_s19  ;;  %v2282_v35 = vld [vmem:[#allocation18] sm:$0xff] }
0x181a   :  { %659 = vrot.lane.b32.xlu0 %v4868_v14, %s4528_s19 }
0x181e   :  { %1093 = vrot.lane.b32.xlu0 %v4966_v57, %s4528_s19 }
0x1822   :  { %1524 = vrot.lane.b32.xlu0 %v5071_v37, %s4528_s19  ;;  %v2184_v37 = vld [vmem:[#allocation9 + $0x18] sm:$0xff] }
0x1823   :  { %3735 = vmatprep.subr.mxu0 %v2184_v37 }
0x1824   :  { %3736 = vmatpush3.msra.mxu0 %v2184_v37  ;;  %v2512_v37 = vld [vmem:[#allocation21 + $0x10] sm:$0xff] }
0x1825   :  { %3737 = vmatprep.subr.mxu0 %v2183_v12 }
0x1826   :  { %1957 = vrot.lane.b32.xlu0 %v1955_v63, %s4528_s19  ;;  %3738 = vmatpush3.msra.mxu0 %v2183_v12  ;;  %v2511_v12 = vld [vmem:[#allocation21 + $0x8] sm:$0xff] }
0x1827   :  { %3739 = vmatprep.subr.mxu0 %v2182_v44 }
0x1828   :  { %3740 = vmatpush3.msra.mxu0 %v2182_v44  ;;  %v2510_v44 = vld [vmem:[#allocation21] sm:$0xff] }
0x1829   :  { %3741 = vmatprep.subr.mxu0 %v2181_v45 }
0x182a   :  { %3742 = vmatpush3.msra.mxu0 %v2181_v45 }
0x182b   :  { %3746 = vmatprep.subr.mxu0 %v2280_v58 }
0x1888   :  { %v2165_v38 = vpop.permute.xlu0 %2164 }
0x1889   :  { %v2167_v40 = vadd.f32 %v2165_v38, %v2157_v36  ;;  %v3285_v36 = vld [vmem:[#allocation17] ss:$0 sm:$0xff] }
0x188b   :  { %4052 = vtanh.f32 %v2167_v40 }
0x188c   :  { %v660_v41 = vpop.permute.xlu0 %659 }
0x188d   :  { %663 = vst.msk [vmem:[#allocation2] sm:$0x3] %vm662_vm4, %v660_v41 }
0x1890   :  { %v1094_v42 = vpop.permute.xlu0 %1093 }
0x1891   :  { %1096 = vst.msk [vmem:[#allocation2 + $0x4] sm:$0x3] %vm662_vm4, %v1094_v42 }
0x1894   :  { %v1525_v14 = vpop.permute.xlu0 %1524 }
0x1895   :  { %1527 = vst.msk [vmem:[#allocation2 + $0x8] sm:$0x3] %vm662_vm4, %v1525_v14 }
0x1898   :  { %v4053_v57 = vpop.eup %4052  ;;  %v1958_v43 = vpop.permute.xlu0 %1957 }
0x1899   :  { %1960 = vst.msk [vmem:[#allocation2 + $0xc] sm:$0x3] %vm662_vm4, %v1958_v43  ;;  %2170 = vrot.lane.b32.xlu1 %v4053_v57, %s4527_s26  ;;  %v2513_v43 = vld [vmem:[#allocation21 + $0x18] sm:$0xff] }
0x189d   :  { %875 = vrot.lane.b32.xlu1 %v4913_v1, %s4528_s19 }
0x18a1   :  { %1311 = vrot.lane.b32.xlu1 %v5019_v51, %s4528_s19 }
0x18a5   :  { %1739 = vrot.lane.b32.xlu1 %v5119_v17, %s4528_s19 }
0x190b   :  { %v2171_v46 = vpop.permute.xlu1 %2170 }
0x190c   :  { %v2173_v1 = vmul.f32 %v4051_v25, %v2171_v46  ;;  %v2284_v25 = vld [vmem:[#allocation18 + $0x10] sm:$0xff] }
0x190d   :  { %3759 = vmatprep.subr.mxu1 %v2284_v25 }
0x190e   :  { %2175 = vrot.lane.b32.xlu1 %v2173_v1, %s4528_s19  ;;  %3760 = vmatpush3.msra.mxu1 %v2284_v25 }
0x190f   :  { %v876_v51 = vpop.permute.xlu1 %875  ;;  %3761 = vmatprep.subr.mxu1 %v2283_v32 }
0x1910   :  { %878 = vst.msk [vmem:[#allocation2 + $0x2] sm:$0x3] %vm662_vm4, %v876_v51  ;;  %3762 = vmatpush3.msra.mxu1 %v2283_v32  ;;  %v3290_v51 = vld [vmem:[#allocation20] ss:$0 sm:$0xff] }
0x1911   :  { %3763 = vmatprep.subr.mxu1 %v2282_v35 }
0x1912   :  { %3764 = vmatpush3.msra.mxu1 %v2282_v35 }
0x1913   :  { %v1312_v17 = vpop.permute.xlu1 %1311 }
0x1914   :  { %1314 = vst.msk [vmem:[#allocation2 + $0x6] sm:$0x3] %vm662_vm4, %v1312_v17 }
0x1917   :  { %v1740_v47 = vpop.permute.xlu1 %1739 }
0x1918   :  { %1742 = vst.msk [vmem:[#allocation2 + $0xa] sm:$0x3] %vm662_vm4, %v1740_v47 }
0x191b   :  { %v2179_v48 = vld [vmem:[#allocation2] sm:$0xff] }
0x191c   :  { %3743 = vmatprep.mubr.msk.f32.mxu0 %vm456_vm2, %v2179_v48 }
0x1980   :  { %v2176_v49 = vpop.permute.xlu1 %2175 }
0x1981   :  { %2178 = vst.msk [vmem:[#allocation2 + $0xe] sm:$0x3] %vm662_vm4, %v2176_v49  ;;  %v2602_v49 = vld [vmem:[%s5328_s25] sm:$0xff] }
0x1988   :  { %v2180_v26 = vld [vmem:[#allocation2 + $0x8] sm:$0xff] }
0x1989   :  { %3744 = vmatmul.mubr.msk.f32.vlgmr.msra.gmra.mxu0 %vm456_vm2, %v2180_v26  ;;  %v2609_v26 = vld [vmem:[%s5329_s30 + $0x18] sm:$0xff] }
0x198a   :  { %3747 = vmatpush3.msra.mxu0 %v2280_v58 }
0x198b   :  { %3748 = vmatprep.subr.mxu0 %v2279_v59 }
0x198c   :  { %3749 = vmatpush3.msra.mxu0 %v2279_v59 }
0x198d   :  { %3750 = vmatprep.subr.mxu0 %v2278_v60 }
0x198e   :  { %3751 = vmatpush3.msra.mxu0 %v2278_v60 }
0x198f   :  { %3752 = vmatprep.subr.mxu0 %v2277_v61 }
0x1990   :  { %3753 = vmatpush3.msra.mxu0 %v2277_v61 }
0x1991   :  { %3768 = vmatprep.subr.mxu0 %v2513_v43 }
0x1a49   :  { %v3745_v28 = vpop.f32.mrf.mxu0 }
0x1a4a   :  { %v2270_v29 = vadd.f32 %v3745_v28, %v3280_v27  ;;  %v2608_v28 = vld [vmem:[%s5329_s30 + $0x10] sm:$0xff] }
0x1a4b   :  { %v2264_v30 = vpop.f32.mrf.mxu0 }
0x1a4c   :  { %v5186_v50 = vmax.f32 %v2270_v29, 0.0  ;;  %v2265_v39 = vadd.f32 %v3280_v27, %v2264_v30  ;;  %v4529_v27 = vmov 0   ;;  %v2607_v29 = vld [vmem:[%s5329_s30 + $0x8] sm:$0xff]  ;;  %v2606_v30 = vld [vmem:[%s5329_s30] sm:$0xff] }
0x1a4d   :  { %3924 = vset.pattern.permute.xlu1 %v4529_v27  ;;  %3925 = vset.pattern.permute.xlu0 %v4529_v27 }
0x1a4e   :  { %v5188_v52 = vmax.f32 %v2265_v39, 0.0  ;;  %v2290_v53 = vsel %vm456_vm2, %v5186_v50, 0.0  ;;  %v3291_v39 = vld [vmem:[#allocation23] ss:$0 sm:$0xff] }
0x1a4f   :  { %2291 = vadd.xlane.f32.xlu1 %v2290_v53 }
0x1a50   :  { %v2287_v31 = vsel %vm456_vm2, %v5188_v52, 0.0 }
0x1a51   :  { %2288 = vadd.xlane.f32.xlu0 %v2287_v31 }
0x1a60   :  { %2627 = vperm.xlu1 %3924, %v2609_v26  }
0x1a64   :  { %2617 = vperm.xlu1 %3924, %v2607_v29  }
0x1a68   :  { %2612 = vperm.xlu1 %3924, %v2606_v30   ;;  %v3300_v30 = vld [vmem:[#allocation24] ss:$0 sm:$0xff] }
0x1ad8   :  { %v2292_v54 = vpop.xlane.xlu1 %2291 }
0x1ad9   :  { %v2295_v10 = vmul.f32 0.03125, %v2292_v54 }
0x1ada   :  { %v2289_v33 = vpop.xlane.xlu0 %2288 }
0x1adb   :  { %v2294_v55 = vmul.f32 0.03125, %v2289_v33  ;;  %v2297_v34 = vsub.f32 %v5186_v50, %v2295_v10  ;;  %v2603_v10 = vld [vmem:[%s5328_s25 + $0x8] sm:$0xff]  ;;  %v2604_v33 = vld [vmem:[%s5328_s25 + $0x10] sm:$0xff] }
0x1add   :  { %v2296_v2 = vsub.f32 %v5188_v52, %v2294_v55  ;;  %v2299_v7 = vmul.f32 %v2297_v34, %v2297_v34  ;;  %v2605_v55 = vld [vmem:[%s5328_s25 + $0x18] sm:$0xff] }
0x1adf   :  { %v2298_v5 = vmul.f32 %v2296_v2, %v2296_v2  ;;  %v2303_v56 = vsel %vm456_vm2, %v2299_v7, 0.0 }
0x1ae1   :  { %v2300_v6 = vsel %vm456_vm2, %v2298_v5, 0.0  ;;  %v2628_v5 = vpop.permute.xlu1 %2627 }
0x1ae2   :  { %2301 = vadd.xlane.f32.xlu0 %v2300_v6 }
0x1ae5   :  { %v2618_v7 = vpop.permute.xlu1 %2617 }
0x1ae6   :  { %2304 = vadd.xlane.f32.xlu0 %v2303_v56 }
0x1afc   :  { %2622 = vperm.xlu0 %3925, %v2608_v28  }
0x1b6b   :  { %v2302_v62 = vpop.xlane.xlu0 %2301 }
0x1b6c   :  { %v2306_v63 = vmul.f32 0.03125, %v2302_v62 }
0x1b6e   :  { %v2308_v3 = vadd.f32 1e-05, %v2306_v63 }
0x1b6f   :  { %v2305_v8 = vpop.xlane.xlu0 %2304 }
0x1b70   :  { %4054 = vrsqrt.f32 %v2308_v3  ;;  %v2307_v4 = vmul.f32 0.03125, %v2305_v8  ;;  %v2613_v8 = vpop.permute.xlu1 %2612 }
0x1b72   :  { %v2309_v9 = vadd.f32 1e-05, %v2307_v4 }
0x1b74   :  { %4056 = vrsqrt.f32 %v2309_v9 }
0x1b77   :  { %v2623_v59 = vpop.permute.xlu0 %2622 }
0x1b7d   :  { %v4055_v11 = vpop.eup %4054 }
0x1b7e   :  { %v2312_v15 = vmul.f32 %v4055_v11, %v2296_v2  ;;  %v2814_v2 = vld [vmem:[%s5331_s1 + $0x10] sm:$0xff] }
0x1b80   :  { %v2320_v18 = vmul.f32 %v3283_v13, %v2312_v15  ;;  %v2732_v15 = vld [vmem:[%s5332_s17] sm:$0x3] }
0x1b81   :  { %v4057_v19 = vpop.eup %4056 }
0x1b82   :  { %v2313_v20 = vmul.f32 %v4057_v19, %v2297_v34  ;;  %v2328_v21 = vadd.f32 %v3284_v16, %v2320_v18  ;;  %v2815_v34 = vld [vmem:[%s5331_s1 + $0x18] sm:$0xff]  ;;  %v2812_v18 = vld [vmem:[%s5331_s1] sm:$0xff] }
0x1b84   :  { %v2321_v22 = vmul.f32 %v3283_v13, %v2313_v20  ;;  %3754 = vmatprep.mubr.msk.f32.mxu0 %vm456_vm2, %v2328_v21 }
0x1b86   :  { %v2329_v23 = vadd.f32 %v3284_v16, %v2321_v22  ;;  %v2813_v16 = vld [vmem:[%s5331_s1 + $0x8] sm:$0xff] }
0x1b88   :  { %3755 = vmatmul.mubr.msk.f32.vlgmr.msra.gmra.mxu0 %vm456_vm2, %v2329_v23  ;;  %v2816_v23 = vld [vmem:[%s5333_s10] sm:$0x3] }
0x1b89   :  { %3769 = vmatpush3.msra.mxu0 %v2513_v43  ;;  %v2899_v43 = vld [vmem:[%s5334_s11 + $0x30] sm:$0xff] }
0x1b8a   :  { %3770 = vmatprep.subr.mxu0 %v2512_v37 }
0x1b8b   :  { %3771 = vmatpush3.msra.mxu0 %v2512_v37  ;;  %v2898_v37 = vld [vmem:[%s5334_s11 + $0x28] sm:$0xff] }
0x1b8c   :  { %3772 = vmatprep.subr.mxu0 %v2511_v12 }
0x1b8d   :  { %3773 = vmatpush3.msra.mxu0 %v2511_v12  ;;  %v2897_v12 = vld [vmem:[%s5334_s11 + $0x20] sm:$0xff] }
0x1b8e   :  { %3774 = vmatprep.subr.mxu0 %v2510_v44 }
0x1b8f   :  { %3775 = vmatpush3.msra.mxu0 %v2510_v44  ;;  %v2896_v44 = vld [vmem:[%s5334_s11 + $0x18] sm:$0xff] }
0x1b90   :  { %3789 = vmatprep.subr.mxu0 %v4525_v0 }
0x1c48   :  { %v3756_v38 = vpop.f32.mrf.mxu0 }
0x1c49   :  { %v2414_v40 = vadd.f32 %v3756_v38, %v3285_v36 }
0x1c4a   :  { %v2408_v41 = vpop.f32.mrf.mxu0 }
0x1c4b   :  { %v2409_v42 = vadd.f32 %v3285_v36, %v2408_v41  ;;  %v2418_v57 = vmax.f32 %v2414_v40, 0.0 }
0x1c4d   :  { %v2417_v14 = vmax.f32 %v2409_v42, 0.0 }
0x1c4f   :  { %3765 = vmatprep.mubr.msk.f32.mxu1 %vm456_vm2, %v2417_v14 }
0x1c50   :  { %3766 = vmatmul.mubr.msk.f32.vlgmr.msra.gmra.mxu1 %vm456_vm2, %v2418_v57  ;;  %v2900_v57 = vld [vmem:[%s5334_s11 + $0x38] sm:$0xff] }
0x1c51   :  { %3783 = vmatprep.mubr.msk.f32.mxu1 %vm2630_vm5, %v2602_v49  ;;  %v2905_v49 = vld [vmem:[%s5335_s15 + $0x18] sm:$0xff] }
0x1d10   :  { %v3767_v45 = vpop.f32.mrf.mxu1 }
0x1d11   :  { %v2501_v46 = vadd.f32 %v3767_v45, %v5186_v50  ;;  %v2733_v50 = vld [vmem:[%s5330_s3] sm:$0x3]  ;;  %v2895_v45 = vld [vmem:[%s5334_s11 + $0x10] sm:$0xff] }
0x1d12   :  { %v2491_v1 = vpop.f32.mrf.mxu1  ;;  %2736 = vperm.xlu1 %3924, %v2733_v50  }
0x1d13   :  { %v2500_v17 = vadd.f32 %v2491_v1, %v5188_v52  ;;  %v2509_v48 = vadd.f32 %v3290_v51, %v2501_v46  ;;  %v2894_v46 = vld [vmem:[%s5334_s11 + $0x8] sm:$0xff]  ;;  %v2893_v1 = vld [vmem:[%s5334_s11] sm:$0xff] }
0x1d15   :  { %v2508_v47 = vadd.f32 %v3290_v51, %v2500_v17  ;;  %v2909_v51 = vld [vmem:[%s5335_s15 + $0x38] sm:$0xff]  ;;  %v2908_v17 = vld [vmem:[%s5335_s15 + $0x30] sm:$0xff] }
0x1d17   :  { %3776 = vmatprep.mubr.msk.f32.mxu0 %vm456_vm2, %v2508_v47  ;;  %v2907_v47 = vld [vmem:[%s5335_s15 + $0x28] sm:$0xff] }
0x1d18   :  { %3777 = vmatmul.mubr.msk.f32.vlgmr.msra.gmra.mxu0 %vm456_vm2, %v2509_v48  ;;  %v2906_v48 = vld [vmem:[%s5335_s15 + $0x20] sm:$0xff] }
0x1d19   :  { %3797 = vmatprep.mubr.msk.f32.mxu0 %vm4526_vm0, %v4525_v0 }
0x1d8d   :  { %v2737_v19 = vpop.permute.xlu1 %2736 }
0x1dd8   :  { %v3778_v52 = vpop.f32.mrf.mxu0 }
0x1dd9   :  { %v2599_v53 = vadd.f32 %v3778_v52, %v3291_v39 }
0x1dda   :  { %v2593_v31 = vpop.f32.mrf.mxu0 }
0x1ddb   :  { %v2594_v54 = vadd.f32 %v3291_v39, %v2593_v31  ;;  %3779 = vmatprep.subr.mxu1 %v2599_v53  ;;  %v3301_v39 = vld [vmem:[#allocation26] ss:$0 sm:$0xff]  ;;  %v2904_v31 = vld [vmem:[%s5335_s15 + $0x10] sm:$0xff] }
0x1ddc   :  { %3780 = vmatpush3.msra.mxu1 %v2599_v53 }
0x1ddd   :  { %3781 = vmatprep.subr.mxu1 %v2594_v54 }
0x1dde   :  { %3782 = vmatpush3.msra.mxu1 %v2594_v54  ;;  %v2903_v54 = vld [vmem:[%s5335_s15 + $0x8] sm:$0xff] }
0x1ddf   :  { %3784 = vmatmul.mubr.msk.f32.vlgmr.msra.gmra.mxu1 %vm2630_vm5, %v2603_v10  ;;  %3800 = vmatprep.subr.mxu1 %v4525_v0  ;;  %v2902_v10 = vld [vmem:[%s5335_s15] sm:$0xff] }
0x1de0   :  { %3786 = vmatprep.mubr.msk.f32.mxu1 %vm2630_vm5, %v2604_v33  ;;  %3801 = vmatpush3.msra.mxu1 %v2815_v34  ;;  %v3108_v33 = vld [vmem:[%s4679_s27 + $0x38] sm:$0xff]  ;;  %v3106_v34 = vld [vmem:[%s4679_s27 + $0x28] sm:$0xff] }
0x1de1   :  { %3802 = vmatprep.subr.mxu1 %v4525_v0 }
0x1de2   :  { %3803 = vmatpush3.msra.mxu1 %v2814_v2  ;;  %v3105_v2 = vld [vmem:[%s4679_s27 + $0x20] sm:$0xff] }
0x1de3   :  { %3787 = vmatmul.mubr.msk.f32.gmra.mxu1 %vm2630_vm5, %v2605_v55  ;;  %3804 = vmatprep.subr.mxu1 %v4525_v0  ;;  %v3107_v55 = vld [vmem:[%s4679_s27 + $0x30] sm:$0xff] }
0x1de4   :  { %3808 = vmatprep.mubr.msk.f32.mxu1 %vm4526_vm0, %v4525_v0  ;;  %3805 = vmatpush3.msra.mxu1 %v2813_v16 }
0x1de5   :  { %3806 = vmatprep.subr.mxu1 %v4525_v0 }
0x1de6   :  { %3807 = vmatpush3.msra.mxu1 %v2812_v18 }
0x1de7   :  { %3830 = vmatprep.subr.mxu1 %v4525_v0 }
0x1e9f   :  { %v3785_v6 = vpop.f32.mrf.mxu1 }
0x1ea0   :  { %v2715_v62 = vadd.f32 %v3785_v6, %v2618_v7  ;;  %v3302_v6 = vld [vmem:[#allocation27] ss:$0 sm:$0xff] }
0x1ea1   :  { %v2709_v56 = vpop.f32.mrf.mxu1 }
0x1ea2   :  { %v2710_v4 = vadd.f32 %v2709_v56, %v2613_v8  ;;  %v2729_v11 = vmax.f32 %v2715_v62, 0.0  ;;  %v3101_v62 = vld [vmem:[%s4679_s27] sm:$0xff] }
0x1ea3   :  { %v3788_v58 = vpop.f32.mrf.mxu1 }
0x1ea4   :  { %v2725_v60 = vadd.f32 %v3788_v58, %v2628_v5  ;;  %v2728_v13 = vmax.f32 %v2710_v4, 0.0  ;;  %v3104_v5 = vld [vmem:[%s4679_s27 + $0x18] sm:$0xff] }
0x1ea5   :  { %v2719_v61 = vpop.f32.mrf.mxu1 }
0x1ea6   :  { %v2731_v63 = vmax.f32 %v2725_v60, 0.0  ;;  %v2720_v3 = vadd.f32 %v2719_v61, %v2623_v59  ;;  %v3103_v60 = vld [vmem:[%s4679_s27 + $0x10] sm:$0xff]  ;;  %v3102_v61 = vld [vmem:[%s4679_s27 + $0x8] sm:$0xff] }
0x1ea8   :  { %v2730_v9 = vmax.f32 %v2720_v3, 0.0  ;;  %3790 = vmatpush3.msra.mxu0 %v2731_v63  ;;  %v3305_v63 = vld [vmem:[#allocation29] ss:$0 sm:$0xff] }
0x1ea9   :  { %3791 = vmatprep.subr.mxu0 %v4525_v0 }
0x1eaa   :  { %3792 = vmatpush3.msra.mxu0 %v2730_v9 }
0x1eab   :  { %3793 = vmatprep.subr.mxu0 %v4525_v0 }
0x1eac   :  { %3794 = vmatpush3.msra.mxu0 %v2729_v11  ;;  %v3306_v11 = vld [vmem:[#allocation30] ss:$0 sm:$0xff] }
0x1ead   :  { %3795 = vmatprep.subr.mxu0 %v4525_v0 }
0x1eae   :  { %3796 = vmatpush3.msra.mxu0 %v2728_v13 }
0x1eaf   :  { %3798 = vmatmul.mubr.msk.f32.vlgmr.msra.gmra.mxu0 %vm456_vm2, %v2732_v15  ;;  %3811 = vmatprep.subr.mxu0 %v4525_v0 }
0x1eb0   :  { %3827 = vmatprep.mubr.msk.f32.mxu0 %vm4526_vm0, %v4525_v0  ;;  %3812 = vmatpush3.msra.mxu0 %v2900_v57 }
0x1eb1   :  { %3813 = vmatprep.subr.mxu0 %v4525_v0 }
0x1eb2   :  { %3814 = vmatpush3.msra.mxu0 %v2899_v43 }
0x1eb3   :  { %3815 = vmatprep.subr.mxu0 %v4525_v0 }
0x1eb4   :  { %3816 = vmatpush3.msra.mxu0 %v2898_v37 }
0x1eb5   :  { %3817 = vmatprep.subr.mxu0 %v4525_v0 }
0x1eb6   :  { %3818 = vmatpush3.msra.mxu0 %v2897_v12 }
0x1eb7   :  { %3819 = vmatprep.subr.mxu0 %v4525_v0 }
0x1eb8   :  { %3820 = vmatpush3.msra.mxu0 %v2896_v44 }
0x1eb9   :  { %3821 = vmatprep.subr.mxu0 %v4525_v0 }
0x1eba   :  { %3822 = vmatpush3.msra.mxu0 %v2895_v45 }
0x1ebb   :  { %3823 = vmatprep.subr.mxu0 %v4525_v0 }
0x1ebc   :  { %3824 = vmatpush3.msra.mxu0 %v2894_v46 }
0x1ebd   :  { %3825 = vmatprep.subr.mxu0 %v4525_v0 }
0x1ebe   :  { %3826 = vmatpush3.msra.mxu0 %v2893_v1 }
0x1ebf   :  { %3849 = vmatprep.subr.mxu0 %v4525_v0 }
0x1f6f   :  { %v2808_v20 = vpop.f32.mrf.mxu0 }
0x1f70   :  { %v2809_v21 = vadd.f32 %v2808_v20, %v2737_v19 }
0x1f71   :  { %v3799_v22 = vpop.f32.mrf.mxu0 }
0x1f72   :  { %3809 = vmatmul.mubr.msk.f32.vlgmr.msra.gmra.mxu1 %vm456_vm2, %v2809_v21 }
0x1f73   :  { %3846 = vmatprep.mubr.msk.f32.mxu1 %vm4526_vm0, %v4525_v0  ;;  %3831 = vmatpush3.msra.mxu1 %v2909_v51 }
0x1f74   :  { %3832 = vmatprep.subr.mxu1 %v4525_v0 }
0x1f75   :  { %3833 = vmatpush3.msra.mxu1 %v2908_v17 }
0x1f76   :  { %3834 = vmatprep.subr.mxu1 %v4525_v0 }
0x1f77   :  { %3835 = vmatpush3.msra.mxu1 %v2907_v47 }
0x1f78   :  { %3836 = vmatprep.subr.mxu1 %v4525_v0 }
0x1f79   :  { %3837 = vmatpush3.msra.mxu1 %v2906_v48 }
0x1f7a   :  { %3838 = vmatprep.subr.mxu1 %v4525_v0 }
0x1f7b   :  { %3839 = vmatpush3.msra.mxu1 %v2905_v49 }
0x1f7c   :  { %3840 = vmatprep.subr.mxu1 %v4525_v0 }
0x1f7d   :  { %3841 = vmatpush3.msra.mxu1 %v2904_v31 }
0x1f7e   :  { %3842 = vmatprep.subr.mxu1 %v4525_v0 }
0x1f7f   :  { %3843 = vmatpush3.msra.mxu1 %v2903_v54 }
0x1f80   :  { %3844 = vmatprep.subr.mxu1 %v4525_v0 }
0x1f81   :  { %3845 = vmatpush3.msra.mxu1 %v2902_v10 }
0x2032   :  { %v2886_v24 = vpop.f32.mrf.mxu1 }
0x2033   :  { %v2887_v25 = vadd.f32 %v2886_v24, %v2816_v23 }
0x2034   :  { %v3810_v32 = vpop.f32.mrf.mxu1 }
0x2035   :  { %v5245_v35 = vmax.f32 %v2887_v25, 0.0 }
0x2037   :  { %v2912_v36 = vsel %vm2911_vm6, %v5245_v35, 0.0 }
0x2038   :  { %2913 = vadd.xlane.f32.xlu1 %v2912_v36 }
0x20c1   :  { %v2914_v38 = vpop.xlane.xlu1 %2913 }
0x20c2   :  { %v2916_v40 = vmul.f32 0.015625, %v2914_v38 }
0x20c4   :  { %v2917_v41 = vsub.f32 %v5245_v35, %v2916_v40 }
0x20c6   :  { %v2918_v42 = vmul.f32 %v2917_v41, %v2917_v41 }
0x20c8   :  { %v2919_v14 = vsel %vm2911_vm6, %v2918_v42, 0.0 }
0x20c9   :  { %2920 = vadd.xlane.f32.xlu0 %v2919_v14 }
0x2152   :  { %v2921_v26 = vpop.xlane.xlu0 %2920 }
0x2153   :  { %v2922_v27 = vmul.f32 0.015625, %v2921_v26 }
0x2155   :  { %v2923_v28 = vadd.f32 1e-05, %v2922_v27 }
0x2157   :  { %4058 = vrsqrt.f32 %v2923_v28 }
0x2164   :  { %v4059_v29 = vpop.eup %4058 }
0x2165   :  { %v2925_v50 = vmul.f32 %v4059_v29, %v2917_v41 }
0x2167   :  { %v2932_v52 = vmul.f32 %v3300_v30, %v2925_v50 }
0x2169   :  { %v2939_v53 = vadd.f32 %v3301_v39, %v2932_v52 }
0x216b   :  { %3828 = vmatmul.mubr.msk.f32.vlgmr.msra.gmra.mxu0 %vm560_vm3, %v2939_v53 }
0x216c   :  { %3865 = vmatprep.mubr.msk.f32.mxu0 %vm4526_vm0, %v4525_v0  ;;  %3850 = vmatpush3.msra.mxu0 %v3108_v33 }
0x216d   :  { %3851 = vmatprep.subr.mxu0 %v4525_v0 }
0x216e   :  { %3852 = vmatpush3.msra.mxu0 %v3107_v55 }
0x216f   :  { %3853 = vmatprep.subr.mxu0 %v4525_v0 }
0x2170   :  { %3854 = vmatpush3.msra.mxu0 %v3106_v34 }
0x2171   :  { %3855 = vmatprep.subr.mxu0 %v4525_v0 }
0x2172   :  { %3856 = vmatpush3.msra.mxu0 %v3105_v2 }
0x2173   :  { %3857 = vmatprep.subr.mxu0 %v4525_v0 }
0x2174   :  { %3858 = vmatpush3.msra.mxu0 %v3104_v5 }
0x2175   :  { %3859 = vmatprep.subr.mxu0 %v4525_v0 }
0x2176   :  { %3860 = vmatpush3.msra.mxu0 %v3103_v60 }
0x2177   :  { %3861 = vmatprep.subr.mxu0 %v4525_v0 }
0x2178   :  { %3862 = vmatpush3.msra.mxu0 %v3102_v61 }
0x2179   :  { %3863 = vmatprep.subr.mxu0 %v4525_v0 }
0x217a   :  { %3864 = vmatpush3.msra.mxu0 %v3101_v62 }
0x222b   :  { %v3015_v7 = vpop.f32.mrf.mxu0 }
0x222c   :  { %v3016_v56 = vadd.f32 %v3302_v6, %v3015_v7 }
0x222d   :  { %v3829_v58 = vpop.f32.mrf.mxu0 }
0x222e   :  { %v3019_v59 = vmax.f32 %v3016_v56, 0.0 }
0x2230   :  { %3847 = vmatmul.mubr.msk.f32.vlgmr.msra.gmra.mxu1 %vm560_vm3, %v3019_v59 }
0x22f0   :  { %v3089_v3 = vpop.f32.mrf.mxu1 }
0x22f1   :  { %v3093_v8 = vadd.f32 %v3089_v3, %v5245_v35 }
0x22f2   :  { %v3848_v4 = vpop.f32.mrf.mxu1 }
0x22f3   :  { %v3100_v9 = vadd.f32 %v3305_v63, %v3093_v8 }
0x22f5   :  { %3866 = vmatmul.mubr.msk.f32.vlgmr.msra.gmra.mxu0 %vm560_vm3, %v3100_v9 }
0x23b5   :  { %v3185_v13 = vpop.f32.mrf.mxu0 }
0x23b6   :  { %v3186_v15 = vadd.f32 %v3306_v11, %v3185_v13 }
0x23b7   :  { %v3867_v16 = vpop.f32.mrf.mxu0 }
0x23b8   :  { %3190 = vst.msk [vmem:[#allocation32] sm:$0x3] %vm3189_vm7, %v3186_v15 }
0x23b9   :  { %4444 = shalt.err (!%p4441_p10)
}
0x23ba   :  { %3200 = dma.vmem_to_hbm [thread:$0]  %s3198_s16, 32, %s4689_s9, [#allocation5]  }
0x23bb   :  { %4473 = dma.done.wait [#allocation5], 32  }
0x23bc   :  { %4474 = vsyncadd [#allocation5], 4294967264 }
0x23bd   :  { %3204 = vsyncpa [#allocation4], 1 }
0x23be   :  { %3205 = vsyncpa [#allocation7], 1 }
0x23bf   :  { %3206 = vsyncpa [#allocation10], 1 }
0x23c0   :  { %3207 = vsyncpa [#allocation13], 1 }
0x23c1   :  { %3208 = vsyncpa [#allocation16], 1 }
0x23c2   :  { %3209 = vsyncpa [#allocation19], 1 }
0x23c3   :  { %3210 = vsyncpa [#allocation22], 1 }
0x23c4   :  { %3211 = vsyncpa [#allocation25], 1 }
0x23c5   :  { %3212 = vsyncpa [#allocation28], 1 }
0x23c6   :  { %3213 = vsyncpa [#allocation31], 1 }
0x23c7   :  { %3214 = vsyncpa [#allocation5], 1 }

</bundles_post_ra>
